<compile_context>
chip_gen: v7x
topology: tpu7x:2x2x1
jax: 0.10.0
libtpu: 0.0.40
codegen_flags: <defaults>
</compile_context>

<pallas_src>
import functools
import math

import jax
import jax.numpy as jnp
import numpy as np
from jax.experimental import pallas as pl
from jax.experimental.pallas import tpu as pltpu


# ----------------------------- in-kernel helpers -----------------------------

def _layernorm(x, w, b, eps=1e-5):
    # x: (N, E) f32, w/b: (1, E); biased variance like torch.nn.LayerNorm
    mean = jnp.mean(x, axis=-1, keepdims=True)
    xc = x - mean
    var = jnp.mean(xc * xc, axis=-1, keepdims=True)
    return xc * jax.lax.rsqrt(var + eps) * w + b


def _split_heads(t, num_heads):
    # (N, E) -> (H, N, D): a single relayout instead of H per-head slices + stack.
    n, e = t.shape
    d = e // num_heads
    return jnp.transpose(t.reshape(n, num_heads, d), (1, 0, 2))


def _merge_heads(t):
    # (H, N, D) -> (N, H*D): a single relayout instead of an H-way concatenate.
    h, n, d = t.shape
    return jnp.transpose(t, (1, 0, 2)).reshape(n, h * d)


def _mha_block(xq_bf, xkv_bf, res_f32, w, num_heads, need_weights):
    """Multi-head attention + out-proj + residual + LayerNorm.

    xq_bf:  (Lq, E) bf16 query-side activations
    xkv_bf: (S , E) bf16 key/value-side activations
    res_f32:(Lq, E) f32 residual input
    w: (wq, bq, wk, bk, wv, bv, wo, bo, ln_w, ln_b) refs; 1/sqrt(D) pre-folded into wq/bq.
    """
    wq, bq, wk, bk, wv, bv, wo, bo, lnw, lnb = w

    q = jnp.dot(xq_bf, wq[...], preferred_element_type=jnp.float32) + bq[...]
    k = jnp.dot(xkv_bf, wk[...], preferred_element_type=jnp.float32) + bk[...]
    v = jnp.dot(xkv_bf, wv[...], preferred_element_type=jnp.float32) + bv[...]

    qh = _split_heads(q.astype(jnp.bfloat16), num_heads)    # (H, Lq, D)
    kh = _split_heads(k.astype(jnp.bfloat16), num_heads)    # (H, S , D)
    vh = _split_heads(v.astype(jnp.bfloat16), num_heads)    # (H, S , D)

    # scores in f32; one bf16 cast of p right before the PV matmul (no extra round-trips).
    s = jnp.einsum("hld,hsd->hls", qh, kh, preferred_element_type=jnp.float32)
    s = s - jnp.max(s, axis=-1, keepdims=True)
    p = jnp.exp(s)                                           # (H, Lq, S) f32
    denom = jnp.sum(p, axis=-1, keepdims=True)               # (H, Lq, 1)

    att = None
    if need_weights:
        # user-visible weights -> exact reciprocal (not the EUP approximation).
        p = p * (1.0 / denom)
        o = jnp.einsum("hls,hsd->hld", p.astype(jnp.bfloat16), vh,
                       preferred_element_type=jnp.float32)
        att = jnp.sum(p, axis=0) * (1.0 / num_heads)         # torch: mean over heads
    else:
        # weights discarded: skip the (H,Lq,S) normalization pass entirely; scale the
        # (H,Lq,D) output instead (review item 3).
        o = jnp.einsum("hls,hsd->hld", p.astype(jnp.bfloat16), vh,
                       preferred_element_type=jnp.float32)
        o = o * pl.reciprocal(denom, approx=True)

    concat = _merge_heads(o)                                 # (Lq, E) f32
    proj = jnp.dot(concat.astype(jnp.bfloat16), wo[...],
                   preferred_element_type=jnp.float32) + bo[...]
    return _layernorm(proj + res_f32, lnw[...], lnb[...]), att


def _ffn_block(x_f32, w):
    w1, b1, w2, b2, lnw, lnb = w
    h = jnp.dot(x_f32.astype(jnp.bfloat16), w1[...],
                preferred_element_type=jnp.float32) + b1[...]
    h = jnp.maximum(h, 0.0)
    y = jnp.dot(h.astype(jnp.bfloat16), w2[...],
                preferred_element_type=jnp.float32) + b2[...]
    return _layernorm(y + x_f32, lnw[...], lnb[...])


# ------------------------------- fused kernel -------------------------------

def layer_kernel(*refs, num_heads, has_context, need_weights):
    n_in = 2 + (1 if has_context else 0) + 10 + (10 if has_context else 0) + 6
    in_refs, out_refs = refs[:n_in], refs[n_in:]

    i = 0
    xq_ref = in_refs[i]; i += 1          # (1, tq, E) bf16 query tile
    xkv_ref = in_refs[i]; i += 1         # (1, L , E) bf16 full sequence (self-attn K/V)
    ctx_ref = None
    if has_context:
        ctx_ref = in_refs[i]; i += 1     # (1, S , E) bf16 context (cross-attn K/V)
    sa = in_refs[i:i + 10]; i += 10
    ca = None
    if has_context:
        ca = in_refs[i:i + 10]; i += 10
    fw = in_refs[i:i + 6]

    out_ref = out_refs[0]
    att_ref = out_refs[1] if need_weights else None

    x_q = xq_ref[0]                       # (tq, E) bf16
    x_kv = xkv_ref[0]                     # (L , E) bf16
    x_q_f32 = x_q.astype(jnp.float32)

    # --- self attention (+ residual + LN) ---
    h, att = _mha_block(x_q, x_kv, x_q_f32, sa, num_heads, need_weights)

    # --- cross attention (+ residual + LN); its weights are never computed ---
    if has_context:
        ctx = ctx_ref[0]                  # (S, E) bf16
        h, _ = _mha_block(h.astype(jnp.bfloat16), ctx, h, ca, num_heads, False)

    # --- feed-forward (+ residual + LN) ---
    out = _ffn_block(h, fw)

    out_ref[0] = out.astype(out_ref.dtype)
    if need_weights:
        att_ref[0] = att.astype(att_ref.dtype)


# ------------------------- host-side parameter preparation -------------------------
# One-time transform of torch-convention ((out,in)) params into kernel-ready (in,out) bf16
# weights, with the 1/sqrt(D) softmax scale folded into Wq/bq (before the bf16 cast).

def _prep_mha(p, num_heads):
    E = p["out_proj_w"].shape[0]
    D = E // num_heads
    scale = 1.0 / math.sqrt(D)
    W = p["in_proj_w"]                    # (3E, E) torch convention [q; k; v]
    b = p["in_proj_b"].reshape(-1)        # (3E,)
    return (
        (W[0:E] * scale).T.astype(jnp.bfloat16),
        (b[0:E] * scale).reshape(1, E).astype(jnp.float32),
        W[E:2 * E].T.astype(jnp.bfloat16),
        b[E:2 * E].reshape(1, E).astype(jnp.float32),
        W[2 * E:3 * E].T.astype(jnp.bfloat16),
        b[2 * E:3 * E].reshape(1, E).astype(jnp.float32),
        p["out_proj_w"].T.astype(jnp.bfloat16),
        p["out_proj_b"].reshape(1, E).astype(jnp.float32),
        p["ln_w"].reshape(1, E).astype(jnp.float32),
        p["ln_b"].reshape(1, E).astype(jnp.float32),
    )


def _prep_ffn(p):
    F, E = p["w1"].shape
    return (
        p["w1"].T.astype(jnp.bfloat16),                    # (E, F)
        p["b1"].reshape(1, F).astype(jnp.float32),
        p["w2"].T.astype(jnp.bfloat16),                    # (F, E)
        p["b2"].reshape(1, E).astype(jnp.float32),
        p["ln_w"].reshape(1, E).astype(jnp.float32),
        p["ln_b"].reshape(1, E).astype(jnp.float32),
    )


# ------------------------------- wrapper -------------------------------

def _pick_q_tile(L):
    # >= 256 query rows keeps the 256-wide v6e/v7x MXU M-dim reasonably full (review #8).
    if L % 256 == 0:
        return 256
    return L


def _vmem_limit_bytes(weight_bytes, block_bytes, scratch_bytes):
    need = weight_bytes + 2 * block_bytes + scratch_bytes     # activation blocks double-buffered
    need = int(1.5 * need) + (4 << 20)                        # headroom
    return max(32 << 20, min(need, 64 << 20))                 # 64 MiB = v7x physical VMEM


def gen_transformer_layer(x, context, params, num_heads, *,
                          need_weights=True, att_dtype=jnp.float32, q_tile=None):
    """Forward pass of GenTransformerLayer (masks None, dropout=0).

    Single fused pallas_call; grid = (batch, query-tile). The hidden activation never
    leaves VMEM between self-attn -> cross-attn -> FFN. Activations cross the kernel
    boundary in bf16; the returned hidden state is bf16, attention weights `att_dtype`.
    """
    B, L, E = x.shape
    assert E % num_heads == 0
    tq = q_tile or _pick_q_tile(L)
    assert L % tq == 0
    n_tiles = L // tq
    has_context = context is not None

    x_bf = x.astype(jnp.bfloat16)
    sa = _prep_mha(params["self_attn"], num_heads)
    fw = _prep_ffn(params["ffn"])

    # Whole-array VMEM residency -> single-buffered weights (no per-step double buffering).
    weight_spec = pl.BlockSpec(memory_space=pltpu.MemorySpace.VMEM)

    in_specs = [pl.BlockSpec((1, tq, E), lambda b, i: (b, i, 0)),   # query tile
                pl.BlockSpec((1, L, E), lambda b, i: (b, 0, 0))]    # full seq for self K/V
    args = [x_bf, x_bf]

    S_kv = 0
    if has_context:
        S_kv = context.shape[1]
        ctx_bf = context.astype(jnp.bfloat16)
        in_specs.append(pl.BlockSpec((1, S_kv, E), lambda b, i: (b, 0, 0)))
        args.append(ctx_bf)
        ca = _prep_mha(params["cross_attn"], num_heads)
    weights = sa + (ca if has_context else ()) + fw
    in_specs += [weight_spec] * len(weights)
    args += list(weights)

    out_shapes = [jax.ShapeDtypeStruct((B, L, E), jnp.bfloat16)]
    out_specs = [pl.BlockSpec((1, tq, E), lambda b, i: (b, i, 0))]
    if need_weights:
        out_shapes.append(jax.ShapeDtypeStruct((B, L, L), att_dtype))
        out_specs.append(pl.BlockSpec((1, tq, L), lambda b, i: (b, i, 0)))

    # VMEM budget: resident weights + double-buffered activation blocks + score/FFN scratch.
    weight_bytes = sum(int(w.size) * w.dtype.itemsize for w in weights)
    blk = 2 * (tq * E + L * E + S_kv * E) + 2 * tq * E
    if need_weights:
        blk += tq * L * np.dtype(att_dtype).itemsize
    S_max = max(L, S_kv)
    F = params["ffn"]["w1"].shape[0]
    scratch = 4 * (4 * num_heads * tq * S_max) + 4 * (2 * tq * F) + 4 * (8 * tq * E)
    vmem_limit = _vmem_limit_bytes(weight_bytes, blk, scratch)

    kernel = functools.partial(layer_kernel, num_heads=num_heads,
                               has_context=has_context, need_weights=need_weights)

    outs = pl.pallas_call(
        kernel,
        out_shape=tuple(out_shapes),
        grid=(B, n_tiles),
        in_specs=in_specs,
        out_specs=tuple(out_specs),
        compiler_params=pltpu.CompilerParams(
            dimension_semantics=("parallel", "parallel"),   # batch + query tiles independent
            vmem_limit_bytes=vmem_limit),
    )(*args)

    if need_weights:
        out, att = outs
        return out, att
    (out,) = outs
    return out, None


# ------------------------------- parameter init -------------------------------

def init_mha_params(key, embed_dim):
    k1, k2, k3, k4 = jax.random.split(key, 4)
    E = embed_dim
    return {
        "in_proj_w": 0.1 * jax.random.normal(k1, (3 * E, E), jnp.float32),
        "in_proj_b": 0.1 * jax.random.normal(k2, (1, 3 * E), jnp.float32),
        "out_proj_w": 0.1 * jax.random.normal(k3, (E, E), jnp.float32),
        "out_proj_b": 0.1 * jax.random.normal(k4, (1, E), jnp.float32),
        "ln_w": jnp.ones((1, E), jnp.float32),
        "ln_b": jnp.zeros((1, E), jnp.float32),
    }


def init_ffn_params(key, embed_dim, fwd_dim):
    k1, k2, k3, k4 = jax.random.split(key, 4)
    E, F = embed_dim, fwd_dim
    return {
        "w1": 0.1 * jax.random.normal(k1, (F, E), jnp.float32),
        "b1": 0.1 * jax.random.normal(k2, (1, F), jnp.float32),
        "w2": 0.1 * jax.random.normal(k3, (E, F), jnp.float32),
        "b2": 0.1 * jax.random.normal(k4, (1, E), jnp.float32),
        "ln_w": jnp.ones((1, E), jnp.float32),
        "ln_b": jnp.zeros((1, E), jnp.float32),
    }


# ------------------------------- pure-JAX f32 reference -------------------------------

def _ref_layernorm(x, w, b, eps=1e-5):
    m = jnp.mean(x, axis=-1, keepdims=True)
    v = jnp.mean((x - m) ** 2, axis=-1, keepdims=True)
    return (x - m) / jnp.sqrt(v + eps) * w + b


def _ref_mha(x_q, x_kv, p, H):
    B, L, E = x_q.shape
    S = x_kv.shape[1]
    D = E // H
    W, bqkv = p["in_proj_w"], p["in_proj_b"][0]
    q = x_q @ W[0:E].T + bqkv[0:E]
    k = x_kv @ W[E:2 * E].T + bqkv[E:2 * E]
    v = x_kv @ W[2 * E:].T + bqkv[2 * E:]
    q = q.reshape(B, L, H, D).transpose(0, 2, 1, 3)
    k = k.reshape(B, S, H, D).transpose(0, 2, 1, 3)
    v = v.reshape(B, S, H, D).transpose(0, 2, 1, 3)
    s = jnp.einsum("bhld,bhsd->bhls", q, k) / jnp.sqrt(D).astype(jnp.float32)
    a = jax.nn.softmax(s, axis=-1)
    o = jnp.einsum("bhls,bhsd->bhld", a, v).transpose(0, 2, 1, 3).reshape(B, L, E)
    o = o @ p["out_proj_w"].T + p["out_proj_b"][0]
    return _ref_layernorm(o + x_q, p["ln_w"][0], p["ln_b"][0]), jnp.mean(a, axis=1)


def _ref_ffn(x, p):
    y = jnp.maximum(x @ p["w1"].T + p["b1"][0], 0.0) @ p["w2"].T + p["b2"][0]
    return _ref_layernorm(y + x, p["ln_w"][0], p["ln_b"][0])


def _ref_layer(x, ctx, params, H):
    h, self_att = _ref_mha(x, x, params["self_attn"], H)
    if ctx is not None:
        h, _ = _ref_mha(h, ctx, params["cross_attn"], H)
    return _ref_ffn(h, params["ffn"]), self_att


# ------------------------------- main -------------------------------

if __name__ == "__main__":
    B, L, S_CTX = 2, 8, 12
    EMBED, HEADS, FWD = 32, 4, 64

    key = jax.random.PRNGKey(0)
    kx, kc, kp1, kp2, kp3 = jax.random.split(key, 5)

    x = jax.random.normal(kx, (B, L, EMBED), jnp.float32)
    context = jax.random.normal(kc, (B, S_CTX, EMBED), jnp.float32)

    params = {
        "self_attn": init_mha_params(kp1, EMBED),
        "cross_attn": init_mha_params(kp2, EMBED),
        "ffn": init_ffn_params(kp3, EMBED, FWD),
    }

    # --- with context (self-attn + cross-attn + FFN) ---
    out, self_att = gen_transformer_layer(x, context, params, HEADS)
    out = jax.block_until_ready(out)
    self_att = jax.block_until_ready(self_att)

    ref_out, ref_att = _ref_layer(x, context, params, HEADS)
    assert out.shape == (B, L, EMBED)
    assert self_att.shape == (B, L, L)
    # bf16 activations/weights at the MXU vs a pure-f32 reference -> loosened tolerances.
    assert jnp.allclose(out.astype(jnp.float32), ref_out, rtol=5e-2, atol=5e-2), \
        "output mismatch vs reference"
    assert jnp.allclose(self_att.astype(jnp.float32), ref_att, rtol=2e-2, atol=1e-2), \
        "attention mismatch vs reference"

    # --- context=None path (self-attn + FFN only) ---
    out2, att2 = gen_transformer_layer(x, None, params, HEADS)
    out2 = jax.block_until_ready(out2)
    ref_out2, ref_att2 = _ref_layer(x, None, params, HEADS)
    assert jnp.allclose(out2.astype(jnp.float32), ref_out2, rtol=5e-2, atol=5e-2), \
        "no-context output mismatch"
    assert jnp.allclose(att2.astype(jnp.float32), ref_att2, rtol=2e-2, atol=1e-2), \
        "no-context attention mismatch"

    # --- need_weights=False path (no attention-weights writeback at all) ---
    out3, att3 = gen_transformer_layer(x, context, params, HEADS, need_weights=False)
    out3 = jax.block_until_ready(out3)
    assert att3 is None
    assert jnp.allclose(out3.astype(jnp.float32), ref_out, rtol=5e-2, atol=5e-2), \
        "need_weights=False output mismatch"

    print("KERNEL_OK")
</pallas_src>

<mosaic_0001>
module attributes {stable_mosaic.version = 11 : i64} {
  func.func @layer_kernel(%arg0: i32, %arg1: i32, %arg2: memref<1x8x32xbf16, #tpu.memory_space<vmem>>, %arg3: memref<1x8x32xbf16, #tpu.memory_space<vmem>>, %arg4: memref<1x12x32xbf16, #tpu.memory_space<vmem>>, %arg5: memref<32x32xbf16, #tpu.memory_space<vmem>>, %arg6: memref<1x32xf32, #tpu.memory_space<vmem>>, %arg7: memref<32x32xbf16, #tpu.memory_space<vmem>>, %arg8: memref<1x32xf32, #tpu.memory_space<vmem>>, %arg9: memref<32x32xbf16, #tpu.memory_space<vmem>>, %arg10: memref<1x32xf32, #tpu.memory_space<vmem>>, %arg11: memref<32x32xbf16, #tpu.memory_space<vmem>>, %arg12: memref<1x32xf32, #tpu.memory_space<vmem>>, %arg13: memref<1x32xf32, #tpu.memory_space<vmem>>, %arg14: memref<1x32xf32, #tpu.memory_space<vmem>>, %arg15: memref<32x32xbf16, #tpu.memory_space<vmem>>, %arg16: memref<1x32xf32, #tpu.memory_space<vmem>>, %arg17: memref<32x32xbf16, #tpu.memory_space<vmem>>, %arg18: memref<1x32xf32, #tpu.memory_space<vmem>>, %arg19: memref<32x32xbf16, #tpu.memory_space<vmem>>, %arg20: memref<1x32xf32, #tpu.memory_space<vmem>>, %arg21: memref<32x32xbf16, #tpu.memory_space<vmem>>, %arg22: memref<1x32xf32, #tpu.memory_space<vmem>>, %arg23: memref<1x32xf32, #tpu.memory_space<vmem>>, %arg24: memref<1x32xf32, #tpu.memory_space<vmem>>, %arg25: memref<32x64xbf16, #tpu.memory_space<vmem>>, %arg26: memref<1x64xf32, #tpu.memory_space<vmem>>, %arg27: memref<64x32xbf16, #tpu.memory_space<vmem>>, %arg28: memref<1x32xf32, #tpu.memory_space<vmem>>, %arg29: memref<1x32xf32, #tpu.memory_space<vmem>>, %arg30: memref<1x32xf32, #tpu.memory_space<vmem>>, %arg31: memref<1x8x32xbf16, #tpu.memory_space<vmem>>, %arg32: memref<1x8x8xf32, #tpu.memory_space<vmem>>) attributes {dimension_semantics = [#tpu.dimension_semantics<parallel>, #tpu.dimension_semantics<parallel>], iteration_bounds = array<i64: 2, 1>, scalar_prefetch = 0 : i64, scratch_operands = 0 : i64, tpu.core_type = #tpu.core_type<tc>, window_params = [{transform_indices = @transform_0, window_bounds = array<i64: 1, 8, 32>}, {transform_indices = @transform_1, window_bounds = array<i64: 1, 8, 32>}, {transform_indices = @transform_2, window_bounds = array<i64: 1, 12, 32>}, {pipeline_mode = #tpu.pipeline_mode<synchronous>, transform_indices = @transform_3, window_bounds = array<i64: 32, 32>}, {pipeline_mode = #tpu.pipeline_mode<synchronous>, transform_indices = @transform_4, window_bounds = array<i64: 1, 32>}, {pipeline_mode = #tpu.pipeline_mode<synchronous>, transform_indices = @transform_5, window_bounds = array<i64: 32, 32>}, {pipeline_mode = #tpu.pipeline_mode<synchronous>, transform_indices = @transform_6, window_bounds = array<i64: 1, 32>}, {pipeline_mode = #tpu.pipeline_mode<synchronous>, transform_indices = @transform_7, window_bounds = array<i64: 32, 32>}, {pipeline_mode = #tpu.pipeline_mode<synchronous>, transform_indices = @transform_8, window_bounds = array<i64: 1, 32>}, {pipeline_mode = #tpu.pipeline_mode<synchronous>, transform_indices = @transform_9, window_bounds = array<i64: 32, 32>}, {pipeline_mode = #tpu.pipeline_mode<synchronous>, transform_indices = @transform_10, window_bounds = array<i64: 1, 32>}, {pipeline_mode = #tpu.pipeline_mode<synchronous>, transform_indices = @transform_11, window_bounds = array<i64: 1, 32>}, {pipeline_mode = #tpu.pipeline_mode<synchronous>, transform_indices = @transform_12, window_bounds = array<i64: 1, 32>}, {pipeline_mode = #tpu.pipeline_mode<synchronous>, transform_indices = @transform_13, window_bounds = array<i64: 32, 32>}, {pipeline_mode = #tpu.pipeline_mode<synchronous>, transform_indices = @transform_14, window_bounds = array<i64: 1, 32>}, {pipeline_mode = #tpu.pipeline_mode<synchronous>, transform_indices = @transform_15, window_bounds = array<i64: 32, 32>}, {pipeline_mode = #tpu.pipeline_mode<synchronous>, transform_indices = @transform_16, window_bounds = array<i64: 1, 32>}, {pipeline_mode = #tpu.pipeline_mode<synchronous>, transform_indices = @transform_17, window_bounds = array<i64: 32, 32>}, {pipeline_mode = #tpu.pipeline_mode<synchronous>, transform_indices = @transform_18, window_bounds = array<i64: 1, 32>}, {pipeline_mode = #tpu.pipeline_mode<synchronous>, transform_indices = @transform_19, window_bounds = array<i64: 32, 32>}, {pipeline_mode = #tpu.pipeline_mode<synchronous>, transform_indices = @transform_20, window_bounds = array<i64: 1, 32>}, {pipeline_mode = #tpu.pipeline_mode<synchronous>, transform_indices = @transform_21, window_bounds = array<i64: 1, 32>}, {pipeline_mode = #tpu.pipeline_mode<synchronous>, transform_indices = @transform_22, window_bounds = array<i64: 1, 32>}, {pipeline_mode = #tpu.pipeline_mode<synchronous>, transform_indices = @transform_23, window_bounds = array<i64: 32, 64>}, {pipeline_mode = #tpu.pipeline_mode<synchronous>, transform_indices = @transform_24, window_bounds = array<i64: 1, 64>}, {pipeline_mode = #tpu.pipeline_mode<synchronous>, transform_indices = @transform_25, window_bounds = array<i64: 64, 32>}, {pipeline_mode = #tpu.pipeline_mode<synchronous>, transform_indices = @transform_26, window_bounds = array<i64: 1, 32>}, {pipeline_mode = #tpu.pipeline_mode<synchronous>, transform_indices = @transform_27, window_bounds = array<i64: 1, 32>}, {pipeline_mode = #tpu.pipeline_mode<synchronous>, transform_indices = @transform_28, window_bounds = array<i64: 1, 32>}, {transform_indices = @transform_29, window_bounds = array<i64: 1, 8, 32>}, {transform_indices = @transform_30, window_bounds = array<i64: 1, 8, 8>}]} {
    %c0 = arith.constant 0 : index
    %c0_0 = arith.constant 0 : index
    %c0_1 = arith.constant 0 : index
    %0 = vector.load %arg2[%c0, %c0_0, %c0_1] : memref<1x8x32xbf16, #tpu.memory_space<vmem>>, vector<1x8x32xbf16>
    %1 = vector.shape_cast %0 : vector<1x8x32xbf16> to vector<8x32xbf16>
    %c0_2 = arith.constant 0 : index
    %c0_3 = arith.constant 0 : index
    %c0_4 = arith.constant 0 : index
    %2 = vector.load %arg3[%c0_2, %c0_3, %c0_4] : memref<1x8x32xbf16, #tpu.memory_space<vmem>>, vector<1x8x32xbf16>
    %3 = vector.shape_cast %2 : vector<1x8x32xbf16> to vector<8x32xbf16>
    %4 = arith.extf %1 : vector<8x32xbf16> to vector<8x32xf32>
    %c0_5 = arith.constant 0 : index
    %c0_6 = arith.constant 0 : index
    %5 = vector.load %arg5[%c0_5, %c0_6] : memref<32x32xbf16, #tpu.memory_space<vmem>>, vector<32x32xbf16>
    %cst = arith.constant dense<0.000000e+00> : vector<8x32xf32>
    %6 = tpu.matmul %1, %5, %cst {dimension_numbers = #tpu.dot_dimension_numbers<[1], [0], [0], [1], [0, 0, 1, 1], [], []>} : vector<8x32xbf16>, vector<32x32xbf16>, vector<8x32xf32> -> vector<8x32xf32>
    %c0_7 = arith.constant 0 : index
    %c0_8 = arith.constant 0 : index
    %7 = vector.load %arg6[%c0_7, %c0_8] : memref<1x32xf32, #tpu.memory_space<vmem>>, vector<1x32xf32>
    %8 = vector.broadcast %7 : vector<1x32xf32> to vector<8x32xf32>
    %9 = arith.addf %6, %8 : vector<8x32xf32>
    %c0_9 = arith.constant 0 : index
    %c0_10 = arith.constant 0 : index
    %10 = vector.load %arg7[%c0_9, %c0_10] : memref<32x32xbf16, #tpu.memory_space<vmem>>, vector<32x32xbf16>
    %cst_11 = arith.constant dense<0.000000e+00> : vector<8x32xf32>
    %11 = tpu.matmul %3, %10, %cst_11 {dimension_numbers = #tpu.dot_dimension_numbers<[1], [0], [0], [1], [0, 0, 1, 1], [], []>} : vector<8x32xbf16>, vector<32x32xbf16>, vector<8x32xf32> -> vector<8x32xf32>
    %c0_12 = arith.constant 0 : index
    %c0_13 = arith.constant 0 : index
    %12 = vector.load %arg8[%c0_12, %c0_13] : memref<1x32xf32, #tpu.memory_space<vmem>>, vector<1x32xf32>
    %13 = vector.broadcast %12 : vector<1x32xf32> to vector<8x32xf32>
    %14 = arith.addf %11, %13 : vector<8x32xf32>
    %c0_14 = arith.constant 0 : index
    %c0_15 = arith.constant 0 : index
    %15 = vector.load %arg9[%c0_14, %c0_15] : memref<32x32xbf16, #tpu.memory_space<vmem>>, vector<32x32xbf16>
    %cst_16 = arith.constant dense<0.000000e+00> : vector<8x32xf32>
    %16 = tpu.matmul %3, %15, %cst_16 {dimension_numbers = #tpu.dot_dimension_numbers<[1], [0], [0], [1], [0, 0, 1, 1], [], []>} : vector<8x32xbf16>, vector<32x32xbf16>, vector<8x32xf32> -> vector<8x32xf32>
    %c0_17 = arith.constant 0 : index
    %c0_18 = arith.constant 0 : index
    %17 = vector.load %arg10[%c0_17, %c0_18] : memref<1x32xf32, #tpu.memory_space<vmem>>, vector<1x32xf32>
    %18 = vector.broadcast %17 : vector<1x32xf32> to vector<8x32xf32>
    %19 = arith.addf %16, %18 : vector<8x32xf32>
    %20 = arith.truncf %9 : vector<8x32xf32> to vector<8x32xbf16>
    %21 = vector.shape_cast %20 : vector<8x32xbf16> to vector<8x4x8xbf16>
    %22 = tpu.transpose %21, [1, 0, 2] : vector<8x4x8xbf16> -> vector<4x8x8xbf16>
    %23 = arith.truncf %14 : vector<8x32xf32> to vector<8x32xbf16>
    %24 = vector.shape_cast %23 : vector<8x32xbf16> to vector<8x4x8xbf16>
    %25 = tpu.transpose %24, [1, 0, 2] : vector<8x4x8xbf16> -> vector<4x8x8xbf16>
    %26 = arith.truncf %19 : vector<8x32xf32> to vector<8x32xbf16>
    %27 = vector.shape_cast %26 : vector<8x32xbf16> to vector<8x4x8xbf16>
    %28 = tpu.transpose %27, [1, 0, 2] : vector<8x4x8xbf16> -> vector<4x8x8xbf16>
    "tpu.trace_start"() <{level = 10 : i32, message = "hld,hsd->hls"}> : () -> ()
    %cst_19 = arith.constant dense<0.000000e+00> : vector<4x8x8xf32>
    %29 = tpu.matmul %22, %25, %cst_19 {dimension_numbers = #tpu.dot_dimension_numbers<[2], [2], [1], [1], [0, 0, 0, 1, 1, 1], [0], [0]>} : vector<4x8x8xbf16>, vector<4x8x8xbf16>, vector<4x8x8xf32> -> vector<4x8x8xf32>
    "tpu.trace_stop"() : () -> ()
    %cst_20 = arith.constant dense<0xFF800000> : vector<4x8xf32>
    %30 = vector.multi_reduction <maximumf>, %29, %cst_20 [2] : vector<4x8x8xf32> to vector<4x8xf32>
    %31 = vector.shape_cast %30 : vector<4x8xf32> to vector<4x8x1xf32>
    %32 = vector.broadcast %31 : vector<4x8x1xf32> to vector<4x8x8xf32>
    %33 = arith.subf %29, %32 : vector<4x8x8xf32>
    %34 = math.exp %33 : vector<4x8x8xf32>
    %cst_21 = arith.constant dense<0.000000e+00> : vector<4x8xf32>
    %35 = vector.multi_reduction <add>, %34, %cst_21 [2] : vector<4x8x8xf32> to vector<4x8xf32>
    %36 = vector.shape_cast %35 : vector<4x8xf32> to vector<4x8x1xf32>
    %cst_22 = arith.constant 1.000000e+00 : f32
    %37 = vector.broadcast %cst_22 : f32 to vector<4x8x1xf32>
    %38 = arith.divf %37, %36 : vector<4x8x1xf32>
    %39 = vector.broadcast %38 : vector<4x8x1xf32> to vector<4x8x8xf32>
    %40 = arith.mulf %34, %39 : vector<4x8x8xf32>
    %41 = arith.truncf %40 : vector<4x8x8xf32> to vector<4x8x8xbf16>
    "tpu.trace_start"() <{level = 10 : i32, message = "hls,hsd->hld"}> : () -> ()
    %cst_23 = arith.constant dense<0.000000e+00> : vector<4x8x8xf32>
    %42 = tpu.matmul %41, %28, %cst_23 {dimension_numbers = #tpu.dot_dimension_numbers<[2], [1], [1], [2], [0, 0, 0, 1, 1, 2], [0], [0]>} : vector<4x8x8xbf16>, vector<4x8x8xbf16>, vector<4x8x8xf32> -> vector<4x8x8xf32>
    "tpu.trace_stop"() : () -> ()
    %cst_24 = arith.constant dense<0.000000e+00> : vector<8x8xf32>
    %43 = vector.multi_reduction <add>, %40, %cst_24 [0] : vector<4x8x8xf32> to vector<8x8xf32>
    %cst_25 = arith.constant 2.500000e-01 : f32
    %44 = vector.broadcast %cst_25 : f32 to vector<8x8xf32>
    %45 = arith.mulf %43, %44 : vector<8x8xf32>
    %46 = tpu.transpose %42, [1, 0, 2] : vector<4x8x8xf32> -> vector<8x4x8xf32>
    %47 = vector.shape_cast %46 : vector<8x4x8xf32> to vector<8x32xf32>
    %48 = arith.truncf %47 : vector<8x32xf32> to vector<8x32xbf16>
    %c0_26 = arith.constant 0 : index
    %c0_27 = arith.constant 0 : index
    %49 = vector.load %arg11[%c0_26, %c0_27] : memref<32x32xbf16, #tpu.memory_space<vmem>>, vector<32x32xbf16>
    %cst_28 = arith.constant dense<0.000000e+00> : vector<8x32xf32>
    %50 = tpu.matmul %48, %49, %cst_28 {dimension_numbers = #tpu.dot_dimension_numbers<[1], [0], [0], [1], [0, 0, 1, 1], [], []>} : vector<8x32xbf16>, vector<32x32xbf16>, vector<8x32xf32> -> vector<8x32xf32>
    %c0_29 = arith.constant 0 : index
    %c0_30 = arith.constant 0 : index
    %51 = vector.load %arg12[%c0_29, %c0_30] : memref<1x32xf32, #tpu.memory_space<vmem>>, vector<1x32xf32>
    %52 = vector.broadcast %51 : vector<1x32xf32> to vector<8x32xf32>
    %53 = arith.addf %50, %52 : vector<8x32xf32>
    %54 = arith.addf %53, %4 : vector<8x32xf32>
    %c0_31 = arith.constant 0 : index
    %c0_32 = arith.constant 0 : index
    %55 = vector.load %arg13[%c0_31, %c0_32] : memref<1x32xf32, #tpu.memory_space<vmem>>, vector<1x32xf32>
    %c0_33 = arith.constant 0 : index
    %c0_34 = arith.constant 0 : index
    %56 = vector.load %arg14[%c0_33, %c0_34] : memref<1x32xf32, #tpu.memory_space<vmem>>, vector<1x32xf32>
    %cst_35 = arith.constant dense<0.000000e+00> : vector<8xf32>
    %57 = vector.multi_reduction <add>, %54, %cst_35 [1] : vector<8x32xf32> to vector<8xf32>
    %58 = vector.shape_cast %57 : vector<8xf32> to vector<8x1xf32>
    %cst_36 = arith.constant 3.200000e+01 : f32
    %59 = vector.broadcast %cst_36 : f32 to vector<8x1xf32>
    %60 = arith.divf %58, %59 : vector<8x1xf32>
    %61 = vector.broadcast %60 : vector<8x1xf32> to vector<8x32xf32>
    %62 = arith.subf %54, %61 : vector<8x32xf32>
    %63 = arith.mulf %62, %62 : vector<8x32xf32>
    %cst_37 = arith.constant dense<0.000000e+00> : vector<8xf32>
    %64 = vector.multi_reduction <add>, %63, %cst_37 [1] : vector<8x32xf32> to vector<8xf32>
    %65 = vector.shape_cast %64 : vector<8xf32> to vector<8x1xf32>
    %cst_38 = arith.constant 3.200000e+01 : f32
    %66 = vector.broadcast %cst_38 : f32 to vector<8x1xf32>
    %67 = arith.divf %65, %66 : vector<8x1xf32>
    %cst_39 = arith.constant 9.99999974E-6 : f32
    %68 = vector.broadcast %cst_39 : f32 to vector<8x1xf32>
    %69 = arith.addf %67, %68 : vector<8x1xf32>
    %70 = math.rsqrt %69 : vector<8x1xf32>
    %71 = vector.broadcast %70 : vector<8x1xf32> to vector<8x32xf32>
    %72 = arith.mulf %62, %71 : vector<8x32xf32>
    %73 = vector.broadcast %55 : vector<1x32xf32> to vector<8x32xf32>
    %74 = arith.mulf %72, %73 : vector<8x32xf32>
    %75 = vector.broadcast %56 : vector<1x32xf32> to vector<8x32xf32>
    %76 = arith.addf %74, %75 : vector<8x32xf32>
    %c0_40 = arith.constant 0 : index
    %c0_41 = arith.constant 0 : index
    %c0_42 = arith.constant 0 : index
    %77 = vector.load %arg4[%c0_40, %c0_41, %c0_42] : memref<1x12x32xbf16, #tpu.memory_space<vmem>>, vector<1x12x32xbf16>
    %78 = vector.shape_cast %77 : vector<1x12x32xbf16> to vector<12x32xbf16>
    %79 = arith.truncf %76 : vector<8x32xf32> to vector<8x32xbf16>
    %c0_43 = arith.constant 0 : index
    %c0_44 = arith.constant 0 : index
    %80 = vector.load %arg15[%c0_43, %c0_44] : memref<32x32xbf16, #tpu.memory_space<vmem>>, vector<32x32xbf16>
    %cst_45 = arith.constant dense<0.000000e+00> : vector<8x32xf32>
    %81 = tpu.matmul %79, %80, %cst_45 {dimension_numbers = #tpu.dot_dimension_numbers<[1], [0], [0], [1], [0, 0, 1, 1], [], []>} : vector<8x32xbf16>, vector<32x32xbf16>, vector<8x32xf32> -> vector<8x32xf32>
    %c0_46 = arith.constant 0 : index
    %c0_47 = arith.constant 0 : index
    %82 = vector.load %arg16[%c0_46, %c0_47] : memref<1x32xf32, #tpu.memory_space<vmem>>, vector<1x32xf32>
    %83 = vector.broadcast %82 : vector<1x32xf32> to vector<8x32xf32>
    %84 = arith.addf %81, %83 : vector<8x32xf32>
    %c0_48 = arith.constant 0 : index
    %c0_49 = arith.constant 0 : index
    %85 = vector.load %arg17[%c0_48, %c0_49] : memref<32x32xbf16, #tpu.memory_space<vmem>>, vector<32x32xbf16>
    %cst_50 = arith.constant dense<0.000000e+00> : vector<12x32xf32>
    %86 = tpu.matmul %78, %85, %cst_50 {dimension_numbers = #tpu.dot_dimension_numbers<[1], [0], [0], [1], [0, 0, 1, 1], [], []>} : vector<12x32xbf16>, vector<32x32xbf16>, vector<12x32xf32> -> vector<12x32xf32>
    %c0_51 = arith.constant 0 : index
    %c0_52 = arith.constant 0 : index
    %87 = vector.load %arg18[%c0_51, %c0_52] : memref<1x32xf32, #tpu.memory_space<vmem>>, vector<1x32xf32>
    %88 = vector.broadcast %87 : vector<1x32xf32> to vector<12x32xf32>
    %89 = arith.addf %86, %88 : vector<12x32xf32>
    %c0_53 = arith.constant 0 : index
    %c0_54 = arith.constant 0 : index
    %90 = vector.load %arg19[%c0_53, %c0_54] : memref<32x32xbf16, #tpu.memory_space<vmem>>, vector<32x32xbf16>
    %cst_55 = arith.constant dense<0.000000e+00> : vector<12x32xf32>
    %91 = tpu.matmul %78, %90, %cst_55 {dimension_numbers = #tpu.dot_dimension_numbers<[1], [0], [0], [1], [0, 0, 1, 1], [], []>} : vector<12x32xbf16>, vector<32x32xbf16>, vector<12x32xf32> -> vector<12x32xf32>
    %c0_56 = arith.constant 0 : index
    %c0_57 = arith.constant 0 : index
    %92 = vector.load %arg20[%c0_56, %c0_57] : memref<1x32xf32, #tpu.memory_space<vmem>>, vector<1x32xf32>
    %93 = vector.broadcast %92 : vector<1x32xf32> to vector<12x32xf32>
    %94 = arith.addf %91, %93 : vector<12x32xf32>
    %95 = arith.truncf %84 : vector<8x32xf32> to vector<8x32xbf16>
    %96 = vector.shape_cast %95 : vector<8x32xbf16> to vector<8x4x8xbf16>
    %97 = tpu.transpose %96, [1, 0, 2] : vector<8x4x8xbf16> -> vector<4x8x8xbf16>
    %98 = arith.truncf %89 : vector<12x32xf32> to vector<12x32xbf16>
    %99 = vector.shape_cast %98 : vector<12x32xbf16> to vector<12x4x8xbf16>
    %100 = tpu.transpose %99, [1, 0, 2] : vector<12x4x8xbf16> -> vector<4x12x8xbf16>
    %101 = arith.truncf %94 : vector<12x32xf32> to vector<12x32xbf16>
    %102 = vector.shape_cast %101 : vector<12x32xbf16> to vector<12x4x8xbf16>
    %103 = tpu.transpose %102, [1, 0, 2] : vector<12x4x8xbf16> -> vector<4x12x8xbf16>
    "tpu.trace_start"() <{level = 10 : i32, message = "hld,hsd->hls"}> : () -> ()
    %cst_58 = arith.constant dense<0.000000e+00> : vector<4x8x12xf32>
    %104 = tpu.matmul %97, %100, %cst_58 {dimension_numbers = #tpu.dot_dimension_numbers<[2], [2], [1], [1], [0, 0, 0, 1, 1, 1], [0], [0]>} : vector<4x8x8xbf16>, vector<4x12x8xbf16>, vector<4x8x12xf32> -> vector<4x8x12xf32>
    "tpu.trace_stop"() : () -> ()
    %cst_59 = arith.constant dense<0xFF800000> : vector<4x8xf32>
    %105 = vector.multi_reduction <maximumf>, %104, %cst_59 [2] : vector<4x8x12xf32> to vector<4x8xf32>
    %106 = vector.shape_cast %105 : vector<4x8xf32> to vector<4x8x1xf32>
    %107 = vector.broadcast %106 : vector<4x8x1xf32> to vector<4x8x12xf32>
    %108 = arith.subf %104, %107 : vector<4x8x12xf32>
    %109 = math.exp %108 : vector<4x8x12xf32>
    %cst_60 = arith.constant dense<0.000000e+00> : vector<4x8xf32>
    %110 = vector.multi_reduction <add>, %109, %cst_60 [2] : vector<4x8x12xf32> to vector<4x8xf32>
    %111 = vector.shape_cast %110 : vector<4x8xf32> to vector<4x8x1xf32>
    %112 = arith.truncf %109 : vector<4x8x12xf32> to vector<4x8x12xbf16>
    "tpu.trace_start"() <{level = 10 : i32, message = "hls,hsd->hld"}> : () -> ()
    %cst_61 = arith.constant dense<0.000000e+00> : vector<4x8x8xf32>
    %113 = tpu.matmul %112, %103, %cst_61 {dimension_numbers = #tpu.dot_dimension_numbers<[2], [1], [1], [2], [0, 0, 0, 1, 1, 2], [0], [0]>} : vector<4x8x12xbf16>, vector<4x12x8xbf16>, vector<4x8x8xf32> -> vector<4x8x8xf32>
    "tpu.trace_stop"() : () -> ()
    %114 = tpu.reciprocal %111 {approx = true} : vector<4x8x1xf32> -> vector<4x8x1xf32>
    %115 = vector.broadcast %114 : vector<4x8x1xf32> to vector<4x8x8xf32>
    %116 = arith.mulf %113, %115 : vector<4x8x8xf32>
    %117 = tpu.transpose %116, [1, 0, 2] : vector<4x8x8xf32> -> vector<8x4x8xf32>
    %118 = vector.shape_cast %117 : vector<8x4x8xf32> to vector<8x32xf32>
    %119 = arith.truncf %118 : vector<8x32xf32> to vector<8x32xbf16>
    %c0_62 = arith.constant 0 : index
    %c0_63 = arith.constant 0 : index
    %120 = vector.load %arg21[%c0_62, %c0_63] : memref<32x32xbf16, #tpu.memory_space<vmem>>, vector<32x32xbf16>
    %cst_64 = arith.constant dense<0.000000e+00> : vector<8x32xf32>
    %121 = tpu.matmul %119, %120, %cst_64 {dimension_numbers = #tpu.dot_dimension_numbers<[1], [0], [0], [1], [0, 0, 1, 1], [], []>} : vector<8x32xbf16>, vector<32x32xbf16>, vector<8x32xf32> -> vector<8x32xf32>
    %c0_65 = arith.constant 0 : index
    %c0_66 = arith.constant 0 : index
    %122 = vector.load %arg22[%c0_65, %c0_66] : memref<1x32xf32, #tpu.memory_space<vmem>>, vector<1x32xf32>
    %123 = vector.broadcast %122 : vector<1x32xf32> to vector<8x32xf32>
    %124 = arith.addf %121, %123 : vector<8x32xf32>
    %125 = arith.addf %124, %76 : vector<8x32xf32>
    %c0_67 = arith.constant 0 : index
    %c0_68 = arith.constant 0 : index
    %126 = vector.load %arg23[%c0_67, %c0_68] : memref<1x32xf32, #tpu.memory_space<vmem>>, vector<1x32xf32>
    %c0_69 = arith.constant 0 : index
    %c0_70 = arith.constant 0 : index
    %127 = vector.load %arg24[%c0_69, %c0_70] : memref<1x32xf32, #tpu.memory_space<vmem>>, vector<1x32xf32>
    %cst_71 = arith.constant dense<0.000000e+00> : vector<8xf32>
    %128 = vector.multi_reduction <add>, %125, %cst_71 [1] : vector<8x32xf32> to vector<8xf32>
    %129 = vector.shape_cast %128 : vector<8xf32> to vector<8x1xf32>
    %cst_72 = arith.constant 3.200000e+01 : f32
    %130 = vector.broadcast %cst_72 : f32 to vector<8x1xf32>
    %131 = arith.divf %129, %130 : vector<8x1xf32>
    %132 = vector.broadcast %131 : vector<8x1xf32> to vector<8x32xf32>
    %133 = arith.subf %125, %132 : vector<8x32xf32>
    %134 = arith.mulf %133, %133 : vector<8x32xf32>
    %cst_73 = arith.constant dense<0.000000e+00> : vector<8xf32>
    %135 = vector.multi_reduction <add>, %134, %cst_73 [1] : vector<8x32xf32> to vector<8xf32>
    %136 = vector.shape_cast %135 : vector<8xf32> to vector<8x1xf32>
    %cst_74 = arith.constant 3.200000e+01 : f32
    %137 = vector.broadcast %cst_74 : f32 to vector<8x1xf32>
    %138 = arith.divf %136, %137 : vector<8x1xf32>
    %cst_75 = arith.constant 9.99999974E-6 : f32
    %139 = vector.broadcast %cst_75 : f32 to vector<8x1xf32>
    %140 = arith.addf %138, %139 : vector<8x1xf32>
    %141 = math.rsqrt %140 : vector<8x1xf32>
    %142 = vector.broadcast %141 : vector<8x1xf32> to vector<8x32xf32>
    %143 = arith.mulf %133, %142 : vector<8x32xf32>
    %144 = vector.broadcast %126 : vector<1x32xf32> to vector<8x32xf32>
    %145 = arith.mulf %143, %144 : vector<8x32xf32>
    %146 = vector.broadcast %127 : vector<1x32xf32> to vector<8x32xf32>
    %147 = arith.addf %145, %146 : vector<8x32xf32>
    %148 = arith.truncf %147 : vector<8x32xf32> to vector<8x32xbf16>
    %c0_76 = arith.constant 0 : index
    %c0_77 = arith.constant 0 : index
    %149 = vector.load %arg25[%c0_76, %c0_77] : memref<32x64xbf16, #tpu.memory_space<vmem>>, vector<32x64xbf16>
    %cst_78 = arith.constant dense<0.000000e+00> : vector<8x64xf32>
    %150 = tpu.matmul %148, %149, %cst_78 {dimension_numbers = #tpu.dot_dimension_numbers<[1], [0], [0], [1], [0, 0, 1, 1], [], []>} : vector<8x32xbf16>, vector<32x64xbf16>, vector<8x64xf32> -> vector<8x64xf32>
    %c0_79 = arith.constant 0 : index
    %c0_80 = arith.constant 0 : index
    %151 = vector.load %arg26[%c0_79, %c0_80] : memref<1x64xf32, #tpu.memory_space<vmem>>, vector<1x64xf32>
    %152 = vector.broadcast %151 : vector<1x64xf32> to vector<8x64xf32>
    %153 = arith.addf %150, %152 : vector<8x64xf32>
    %cst_81 = arith.constant 0.000000e+00 : f32
    %154 = vector.broadcast %cst_81 : f32 to vector<8x64xf32>
    %155 = arith.maximumf %153, %154 : vector<8x64xf32>
    %156 = arith.truncf %155 : vector<8x64xf32> to vector<8x64xbf16>
    %c0_82 = arith.constant 0 : index
    %c0_83 = arith.constant 0 : index
    %157 = vector.load %arg27[%c0_82, %c0_83] : memref<64x32xbf16, #tpu.memory_space<vmem>>, vector<64x32xbf16>
    %cst_84 = arith.constant dense<0.000000e+00> : vector<8x32xf32>
    %158 = tpu.matmul %156, %157, %cst_84 {dimension_numbers = #tpu.dot_dimension_numbers<[1], [0], [0], [1], [0, 0, 1, 1], [], []>} : vector<8x64xbf16>, vector<64x32xbf16>, vector<8x32xf32> -> vector<8x32xf32>
    %c0_85 = arith.constant 0 : index
    %c0_86 = arith.constant 0 : index
    %159 = vector.load %arg28[%c0_85, %c0_86] : memref<1x32xf32, #tpu.memory_space<vmem>>, vector<1x32xf32>
    %160 = vector.broadcast %159 : vector<1x32xf32> to vector<8x32xf32>
    %161 = arith.addf %158, %160 : vector<8x32xf32>
    %162 = arith.addf %161, %147 : vector<8x32xf32>
    %c0_87 = arith.constant 0 : index
    %c0_88 = arith.constant 0 : index
    %163 = vector.load %arg29[%c0_87, %c0_88] : memref<1x32xf32, #tpu.memory_space<vmem>>, vector<1x32xf32>
    %c0_89 = arith.constant 0 : index
    %c0_90 = arith.constant 0 : index
    %164 = vector.load %arg30[%c0_89, %c0_90] : memref<1x32xf32, #tpu.memory_space<vmem>>, vector<1x32xf32>
    %cst_91 = arith.constant dense<0.000000e+00> : vector<8xf32>
    %165 = vector.multi_reduction <add>, %162, %cst_91 [1] : vector<8x32xf32> to vector<8xf32>
    %166 = vector.shape_cast %165 : vector<8xf32> to vector<8x1xf32>
    %cst_92 = arith.constant 3.200000e+01 : f32
    %167 = vector.broadcast %cst_92 : f32 to vector<8x1xf32>
    %168 = arith.divf %166, %167 : vector<8x1xf32>
    %169 = vector.broadcast %168 : vector<8x1xf32> to vector<8x32xf32>
    %170 = arith.subf %162, %169 : vector<8x32xf32>
    %171 = arith.mulf %170, %170 : vector<8x32xf32>
    %cst_93 = arith.constant dense<0.000000e+00> : vector<8xf32>
    %172 = vector.multi_reduction <add>, %171, %cst_93 [1] : vector<8x32xf32> to vector<8xf32>
    %173 = vector.shape_cast %172 : vector<8xf32> to vector<8x1xf32>
    %cst_94 = arith.constant 3.200000e+01 : f32
    %174 = vector.broadcast %cst_94 : f32 to vector<8x1xf32>
    %175 = arith.divf %173, %174 : vector<8x1xf32>
    %cst_95 = arith.constant 9.99999974E-6 : f32
    %176 = vector.broadcast %cst_95 : f32 to vector<8x1xf32>
    %177 = arith.addf %175, %176 : vector<8x1xf32>
    %178 = math.rsqrt %177 : vector<8x1xf32>
    %179 = vector.broadcast %178 : vector<8x1xf32> to vector<8x32xf32>
    %180 = arith.mulf %170, %179 : vector<8x32xf32>
    %181 = vector.broadcast %163 : vector<1x32xf32> to vector<8x32xf32>
    %182 = arith.mulf %180, %181 : vector<8x32xf32>
    %183 = vector.broadcast %164 : vector<1x32xf32> to vector<8x32xf32>
    %184 = arith.addf %182, %183 : vector<8x32xf32>
    %185 = arith.truncf %184 : vector<8x32xf32> to vector<8x32xbf16>
    %c0_96 = arith.constant 0 : index
    %c0_97 = arith.constant 0 : index
    %c0_98 = arith.constant 0 : index
    %186 = vector.load %arg31[%c0_96, %c0_97, %c0_98] : memref<1x8x32xbf16, #tpu.memory_space<vmem>>, vector<1x8x32xbf16>
    %187 = vector.shape_cast %186 : vector<1x8x32xbf16> to vector<8x32xbf16>
    %188 = vector.shape_cast %185 : vector<8x32xbf16> to vector<1x8x32xbf16>
    tpu.vector_store %arg31[%c0_96, %c0_97, %c0_98], %188 {strides = array<i32>} : memref<1x8x32xbf16, #tpu.memory_space<vmem>>, vector<1x8x32xbf16>,
    %c0_99 = arith.constant 0 : index
    %c0_100 = arith.constant 0 : index
    %c0_101 = arith.constant 0 : index
    %189 = vector.load %arg32[%c0_99, %c0_100, %c0_101] : memref<1x8x8xf32, #tpu.memory_space<vmem>>, vector<1x8x8xf32>
    %190 = vector.shape_cast %189 : vector<1x8x8xf32> to vector<8x8xf32>
    %191 = vector.shape_cast %45 : vector<8x8xf32> to vector<1x8x8xf32>
    tpu.vector_store %arg32[%c0_99, %c0_100, %c0_101], %191 {strides = array<i32>} : memref<1x8x8xf32, #tpu.memory_space<vmem>>, vector<1x8x8xf32>,
    return
  }
  func.func @transform_0(%arg0: i32, %arg1: i32) -> (i32, i32, i32) {
    %c0_i32 = arith.constant 0 : i32
    %c0_i32_0 = arith.constant 0 : i32
    return %arg0, %arg1, %c0_i32 : i32, i32, i32
  }
  func.func @transform_1(%arg0: i32, %arg1: i32) -> (i32, i32, i32) {
    %c0_i32 = arith.constant 0 : i32
    %c0_i32_0 = arith.constant 0 : i32
    %c0_i32_1 = arith.constant 0 : i32
    return %arg0, %c0_i32, %c0_i32_0 : i32, i32, i32
  }
  func.func @transform_2(%arg0: i32, %arg1: i32) -> (i32, i32, i32) {
    %c0_i32 = arith.constant 0 : i32
    %c0_i32_0 = arith.constant 0 : i32
    %c0_i32_1 = arith.constant 0 : i32
    return %arg0, %c0_i32, %c0_i32_0 : i32, i32, i32
  }
  func.func @transform_3(%arg0: i32, %arg1: i32) -> (i32, i32) {
    %c0_i32 = arith.constant 0 : i32
    %c0_i32_0 = arith.constant 0 : i32
    %c0_i32_1 = arith.constant 0 : i32
    return %c0_i32, %c0_i32_0 : i32, i32
  }
  func.func @transform_4(%arg0: i32, %arg1: i32) -> (i32, i32) {
    %c0_i32 = arith.constant 0 : i32
    %c0_i32_0 = arith.constant 0 : i32
    %c0_i32_1 = arith.constant 0 : i32
    return %c0_i32, %c0_i32_0 : i32, i32
  }
  func.func @transform_5(%arg0: i32, %arg1: i32) -> (i32, i32) {
    %c0_i32 = arith.constant 0 : i32
    %c0_i32_0 = arith.constant 0 : i32
    %c0_i32_1 = arith.constant 0 : i32
    return %c0_i32, %c0_i32_0 : i32, i32
  }
  func.func @transform_6(%arg0: i32, %arg1: i32) -> (i32, i32) {
    %c0_i32 = arith.constant 0 : i32
    %c0_i32_0 = arith.constant 0 : i32
    %c0_i32_1 = arith.constant 0 : i32
    return %c0_i32, %c0_i32_0 : i32, i32
  }
  func.func @transform_7(%arg0: i32, %arg1: i32) -> (i32, i32) {
    %c0_i32 = arith.constant 0 : i32
    %c0_i32_0 = arith.constant 0 : i32
    %c0_i32_1 = arith.constant 0 : i32
    return %c0_i32, %c0_i32_0 : i32, i32
  }
  func.func @transform_8(%arg0: i32, %arg1: i32) -> (i32, i32) {
    %c0_i32 = arith.constant 0 : i32
    %c0_i32_0 = arith.constant 0 : i32
    %c0_i32_1 = arith.constant 0 : i32
    return %c0_i32, %c0_i32_0 : i32, i32
  }
  func.func @transform_9(%arg0: i32, %arg1: i32) -> (i32, i32) {
    %c0_i32 = arith.constant 0 : i32
    %c0_i32_0 = arith.constant 0 : i32
    %c0_i32_1 = arith.constant 0 : i32
    return %c0_i32, %c0_i32_0 : i32, i32
  }
  func.func @transform_10(%arg0: i32, %arg1: i32) -> (i32, i32) {
    %c0_i32 = arith.constant 0 : i32
    %c0_i32_0 = arith.constant 0 : i32
    %c0_i32_1 = arith.constant 0 : i32
    return %c0_i32, %c0_i32_0 : i32, i32
  }
  func.func @transform_11(%arg0: i32, %arg1: i32) -> (i32, i32) {
    %c0_i32 = arith.constant 0 : i32
    %c0_i32_0 = arith.constant 0 : i32
    %c0_i32_1 = arith.constant 0 : i32
    return %c0_i32, %c0_i32_0 : i32, i32
  }
  func.func @transform_12(%arg0: i32, %arg1: i32) -> (i32, i32) {
    %c0_i32 = arith.constant 0 : i32
    %c0_i32_0 = arith.constant 0 : i32
    %c0_i32_1 = arith.constant 0 : i32
    return %c0_i32, %c0_i32_0 : i32, i32
  }
  func.func @transform_13(%arg0: i32, %arg1: i32) -> (i32, i32) {
    %c0_i32 = arith.constant 0 : i32
    %c0_i32_0 = arith.constant 0 : i32
    %c0_i32_1 = arith.constant 0 : i32
    return %c0_i32, %c0_i32_0 : i32, i32
  }
  func.func @transform_14(%arg0: i32, %arg1: i32) -> (i32, i32) {
    %c0_i32 = arith.constant 0 : i32
    %c0_i32_0 = arith.constant 0 : i32
    %c0_i32_1 = arith.constant 0 : i32
    return %c0_i32, %c0_i32_0 : i32, i32
  }
  func.func @transform_15(%arg0: i32, %arg1: i32) -> (i32, i32) {
    %c0_i32 = arith.constant 0 : i32
    %c0_i32_0 = arith.constant 0 : i32
    %c0_i32_1 = arith.constant 0 : i32
    return %c0_i32, %c0_i32_0 : i32, i32
  }
  func.func @transform_16(%arg0: i32, %arg1: i32) -> (i32, i32) {
    %c0_i32 = arith.constant 0 : i32
    %c0_i32_0 = arith.constant 0 : i32
    %c0_i32_1 = arith.constant 0 : i32
    return %c0_i32, %c0_i32_0 : i32, i32
  }
  func.func @transform_17(%arg0: i32, %arg1: i32) -> (i32, i32) {
    %c0_i32 = arith.constant 0 : i32
    %c0_i32_0 = arith.constant 0 : i32
    %c0_i32_1 = arith.constant 0 : i32
    return %c0_i32, %c0_i32_0 : i32, i32
  }
  func.func @transform_18(%arg0: i32, %arg1: i32) -> (i32, i32) {
    %c0_i32 = arith.constant 0 : i32
    %c0_i32_0 = arith.constant 0 : i32
    %c0_i32_1 = arith.constant 0 : i32
    return %c0_i32, %c0_i32_0 : i32, i32
  }
  func.func @transform_19(%arg0: i32, %arg1: i32) -> (i32, i32) {
    %c0_i32 = arith.constant 0 : i32
    %c0_i32_0 = arith.constant 0 : i32
    %c0_i32_1 = arith.constant 0 : i32
    return %c0_i32, %c0_i32_0 : i32, i32
  }
  func.func @transform_20(%arg0: i32, %arg1: i32) -> (i32, i32) {
    %c0_i32 = arith.constant 0 : i32
    %c0_i32_0 = arith.constant 0 : i32
    %c0_i32_1 = arith.constant 0 : i32
    return %c0_i32, %c0_i32_0 : i32, i32
  }
  func.func @transform_21(%arg0: i32, %arg1: i32) -> (i32, i32) {
    %c0_i32 = arith.constant 0 : i32
    %c0_i32_0 = arith.constant 0 : i32
    %c0_i32_1 = arith.constant 0 : i32
    return %c0_i32, %c0_i32_0 : i32, i32
  }
  func.func @transform_22(%arg0: i32, %arg1: i32) -> (i32, i32) {
    %c0_i32 = arith.constant 0 : i32
    %c0_i32_0 = arith.constant 0 : i32
    %c0_i32_1 = arith.constant 0 : i32
    return %c0_i32, %c0_i32_0 : i32, i32
  }
  func.func @transform_23(%arg0: i32, %arg1: i32) -> (i32, i32) {
    %c0_i32 = arith.constant 0 : i32
    %c0_i32_0 = arith.constant 0 : i32
    %c0_i32_1 = arith.constant 0 : i32
    return %c0_i32, %c0_i32_0 : i32, i32
  }
  func.func @transform_24(%arg0: i32, %arg1: i32) -> (i32, i32) {
    %c0_i32 = arith.constant 0 : i32
    %c0_i32_0 = arith.constant 0 : i32
    %c0_i32_1 = arith.constant 0 : i32
    return %c0_i32, %c0_i32_0 : i32, i32
  }
  func.func @transform_25(%arg0: i32, %arg1: i32) -> (i32, i32) {
    %c0_i32 = arith.constant 0 : i32
    %c0_i32_0 = arith.constant 0 : i32
    %c0_i32_1 = arith.constant 0 : i32
    return %c0_i32, %c0_i32_0 : i32, i32
  }
  func.func @transform_26(%arg0: i32, %arg1: i32) -> (i32, i32) {
    %c0_i32 = arith.constant 0 : i32
    %c0_i32_0 = arith.constant 0 : i32
    %c0_i32_1 = arith.constant 0 : i32
    return %c0_i32, %c0_i32_0 : i32, i32
  }
  func.func @transform_27(%arg0: i32, %arg1: i32) -> (i32, i32) {
    %c0_i32 = arith.constant 0 : i32
    %c0_i32_0 = arith.constant 0 : i32
    %c0_i32_1 = arith.constant 0 : i32
    return %c0_i32, %c0_i32_0 : i32, i32
  }
  func.func @transform_28(%arg0: i32, %arg1: i32) -> (i32, i32) {
    %c0_i32 = arith.constant 0 : i32
    %c0_i32_0 = arith.constant 0 : i32
    %c0_i32_1 = arith.constant 0 : i32
    return %c0_i32, %c0_i32_0 : i32, i32
  }
  func.func @transform_29(%arg0: i32, %arg1: i32) -> (i32, i32, i32) {
    %c0_i32 = arith.constant 0 : i32
    %c0_i32_0 = arith.constant 0 : i32
    return %arg0, %arg1, %c0_i32 : i32, i32, i32
  }
  func.func @transform_30(%arg0: i32, %arg1: i32) -> (i32, i32, i32) {
    %c0_i32 = arith.constant 0 : i32
    %c0_i32_0 = arith.constant 0 : i32
    return %arg0, %arg1, %c0_i32 : i32, i32, i32
  }
}

</mosaic_0001>

<bundles_post_ra>
// kernel: tpu_custom_call.1
= control target key start
LH: loop header
LB: loop body
LE: loop exit
PB: predicated region body
PF: predicated region fallthrough
CT: control target
= control target key end

     0   :  { %s5580_s6 = smov 1   ;;  %s5581_s10 = smov 2   ;;  %s6604_s0 = inlined_call_operand.smem [shape: u32[31], index: -1, kind: input, shape index: {}] }
   0x1   :  { %s5642_s5 = sld [smem:[%s6604_s0]]   ;;  %s5582_s14 = smov 3  }
   0x2   :  { %s5647_s9 = sld [smem:[%s6604_s0 + %s5580_s6]]   ;;  %s5583_s18 = smov 4  }
   0x3   :  { %s5652_s13 = sld [smem:[%s6604_s0 + %s5581_s10]]   ;;  %s5584_s22 = smov 5  }
   0x4   :  { %s5657_s17 = sld [smem:[%s6604_s0 + %s5582_s14]]   ;;  %s5585_s26 = smov 6  }
   0x5   :  { %s5662_s21 = sld [smem:[%s6604_s0 + %s5583_s18]]   ;;  %s5586_s30 = smov 7  }
   0x6   :  { %s5667_s25 = sld [smem:[%s6604_s0 + %s5584_s22]]   ;;  %s5587_s4 = smov 8  }
   0x7   :  { %6631 = sst [smem:[#allocation32_spill]] %s5642_s5  ;;  %s5588_s10 = smov 9  }
   0x8   :  { %s5672_s29 = sld [smem:[%s6604_s0 + %s5585_s26]]   ;;  %s5589_s15 = smov 10  }
   0x9   :  { %6632 = sst [smem:[#allocation33_spill]] %s5652_s13  ;;  %s5590_s20 = smov 11  }
   0xa   :  { %s5677_s3 = sld [smem:[%s6604_s0 + %s5586_s30]]   ;;  %s5591_s26 = smov 12  }
   0xb   :  { %6633 = sst [smem:[#allocation34_spill]] %s5662_s21  ;;  %s5592_s1 = smov 13  }
   0xc   :  { %s5682_s8 = sld [smem:[%s6604_s0 + %s5587_s4]]   ;;  %s5593_s7 = smov 14  }
   0xd   :  { %s5687_s14 = sld [smem:[%s6604_s0 + %s5588_s10]]   ;;  %s5595_s22 = smov 16  }
   0xe   :  { %6634 = sst [smem:[#allocation35_spill]] %s5672_s29  ;;  %s5596_s28 = smov 17  }
   0xf   :  { %s5692_s19 = sld [smem:[%s6604_s0 + %s5589_s15]]   ;;  %s5594_s15 = smov 15  }
  0x10   :  { %6635 = sst [smem:[#allocation36_spill]] %s5677_s3 }
  0x11   :  { %s5697_s24 = sld [smem:[%s6604_s0 + %s5590_s20]]  }
  0x12   :  { %6636 = sst [smem:[#allocation37_spill]] %s5682_s8 }
  0x13   :  { %6637 = sst [smem:[#allocation38_spill]] %s5687_s14 }
  0x14   :  { %s5702_s30 = sld [smem:[%s6604_s0 + %s5591_s26]]  }
  0x15   :  { %6638 = sst [smem:[#allocation39_spill]] %s5692_s19 }
  0x16   :  { %s5707_s6 = sld [smem:[%s6604_s0 + %s5592_s1]]  }
  0x17   :  { %6639 = sst [smem:[#allocation40_spill]] %s5697_s24 }
  0x18   :  { %s5712_s12 = sld [smem:[%s6604_s0 + %s5593_s7]]   ;;  %s5597_s7 = smov 18  }
  0x19   :  { %s5717_s20 = sld [smem:[%s6604_s0 + %s5594_s15]]   ;;  %s5598_s15 = smov 19  }
  0x1a   :  { %6640 = sst [smem:[#allocation41_spill]] %s5702_s30 }
  0x1b   :  { %s5722_s27 = sld [smem:[%s6604_s0 + %s5595_s22]]   ;;  %s5599_s22 = smov 20  }
  0x1c   :  { %6641 = sst [smem:[#allocation42_spill]] %s5707_s6 }
  0x1d   :  { %s5727_s4 = sld [smem:[%s6604_s0 + %s5596_s28]]   ;;  %s5600_s28 = smov 21  }
  0x1e   :  { %6642 = sst [smem:[#allocation43_spill]] %s5712_s12 }
  0x1f   :  { %6643 = sst [smem:[#allocation44_spill]] %s5717_s20 }
  0x20   :  { %s5732_s6 = sld [smem:[%s6604_s0 + %s5597_s7]]   ;;  %s5601_s7 = smov 22  }
  0x21   :  { %6644 = sst [smem:[#allocation45_spill]] %s5722_s27 }
  0x22   :  { %s5737_s13 = sld [smem:[%s6604_s0 + %s5598_s15]]   ;;  %s5602_s15 = smov 23  }
  0x23   :  { %6645 = sst [smem:[#allocation46_spill]] %s5727_s4 }
  0x24   :  { %s5742_s20 = sld [smem:[%s6604_s0 + %s5599_s22]]   ;;  %s5603_s22 = smov 24  }
  0x25   :  { %s5747_s4 = sld [smem:[%s6604_s0 + %s5600_s28]]   ;;  %s5604_s28 = smov 25  }
  0x26   :  { %6646 = sst [smem:[#allocation47_spill]] %s5732_s6 }
  0x27   :  { %s5752_s14 = sld [smem:[%s6604_s0 + %s5601_s7]]   ;;  %s5605_s7 = smov 26  }
  0x28   :  { %6647 = sst [smem:[#allocation48_spill]] %s5737_s13 }
  0x29   :  { %s5757_s13 = sld [smem:[%s6604_s0 + %s5602_s15]]   ;;  %s5606_s15 = smov 27  }
  0x2a   :  { %6648 = sst [smem:[#allocation49_spill]] %s5742_s20 }
  0x2b   :  { %6649 = sst [smem:[#allocation50_spill]] %s5747_s4 }
  0x2c   :  { %s5762_s20 = sld [smem:[%s6604_s0 + %s5603_s22]]   ;;  %s5607_s22 = smov 28  }
  0x2d   :  { %6650 = sst [smem:[#allocation51_spill]] %s5752_s14 }
  0x2e   :  { %s5767_s4 = sld [smem:[%s6604_s0 + %s5604_s28]]   ;;  %s5608_s28 = smov 29  }
  0x2f   :  { %6651 = sst [smem:[#allocation52_spill]] %s5757_s13 }
  0x30   :  { %s5772_s14 = sld [smem:[%s6604_s0 + %s5605_s7]]   ;;  %s5609_s7 = smov 30  }
  0x31   :  { %s5777_s13 = sld [smem:[%s6604_s0 + %s5606_s15]]  }
  0x32   :  { %6652 = sst [smem:[#allocation53_spill]] %s5762_s20 }
  0x33   :  { %s5782_s20 = sld [smem:[%s6604_s0 + %s5607_s22]]  }
  0x34   :  { %6653 = sst [smem:[#allocation54_spill]] %s5767_s4 }
  0x35   :  { %s5787_s4 = sld [smem:[%s6604_s0 + %s5608_s28]]  }
  0x36   :  { %6654 = sst [smem:[#allocation55_spill]] %s5772_s14 }
  0x37   :  { %6655 = sst [smem:[#allocation56_spill]] %s5777_s13 }
  0x38   :  { %s5792_s14 = sld [smem:[%s6604_s0 + %s5609_s7]]  }
  0x39   :  { %6656 = sst [smem:[#allocation57_spill]] %s5782_s20 }
  0x3b   :  { %6657 = sst [smem:[#allocation58_spill]] %s5787_s4 }
  0x3c   :  { %67 = vsyncpa [#allocation3], 0 }
  0x3d   :  { %69 = vsyncpa [#allocation3 + $0x1], 0 }
  0x3e   :  { %70 = vsyncpa [#allocation6], 0 }
  0x3f   :  { %72 = vsyncpa [#allocation6 + $0x1], 0 }
  0x40   :  { %73 = vsyncpa [#allocation9], 0 }
  0x41   :  { %74 = vsyncpa [#allocation12], 0 }
  0x42   :  { %75 = vsyncpa [#allocation15], 0 }
  0x43   :  { %76 = vsyncpa [#allocation18], 0 }
  0x44   :  { %77 = vsyncpa [#allocation4], 0 }
  0x45   :  { %79 = vsyncpa [#allocation4 + $0x1], 0 }
  0x46   :  { %80 = vsyncpa [#allocation22], 0 }
  0x47   :  { %82 = vsyncpa [#allocation22 + $0x1], 0  ;;  %s5794_s15 = smov 0   ;;  %s5796_s16 = smov 0  }
  0x48   :  { %s5798_s18 = smov 0   ;;  %s5800_s0 = smov 0  }
  0x49   :  { %s5802_s22 = smov 0   ;;  %s5804_s23 = smov 0  }
  0x4a LB: > { %s6658_s5 = sld [smem:[#allocation32_spill]]  ;;  %s6659_s3 = sld [smem:[#allocation36_spill]]  ;;  %s5574_s22 = sphi %s5802_s22, %s6715_s22   ;;  %s5570_s0 = sphi %s5800_s0, %s6714_s0   ;;  %s5566_s18 = sphi %s5798_s18, %s6713_s18   ;;  %s5562_s16 = sphi %s5796_s16, %s6712_s16   ;;  %s5558_s15 = sphi %s5794_s15, %s6711_s15   ;;  %s5578_s23 = sphi %s5804_s23, %s88_s23  }
  0x4b   : > { %s6660_s30 = sld [smem:[#allocation41_spill]]  ;;  %s6661_s27 = sld [smem:[#allocation45_spill]] }
  0x4c   : > { %s6662_s24 = sld [smem:[#allocation40_spill]]  ;;  %s6663_s19 = sld [smem:[#allocation39_spill]] }
  0x4d   : > { %s6664_s12 = sld [smem:[#allocation43_spill]]  ;;  %s6665_s8 = sld [smem:[#allocation37_spill]] }
  0x4e   : > { %s6666_s6 = sld [smem:[#allocation47_spill]]  ;;  %s6667_s29 = sld [smem:[#allocation35_spill]] }
  0x4f   : > { %s6668_s21 = sld [smem:[#allocation34_spill]]  ;;  %s5825_s26 = sadd.s32 4294967295, %s5578_s23  }
  0x50   : > { %p4508_p0 = scmp.ge.s32.totalorder %s5578_s23, 1  ;;  %p6613_p1 = scmp.eq.s32.totalorder %s5825_s26, 0 }
  0x51   : > { %p787_p2 = scmp.lt.s32.totalorder %s5578_s23, 3  ;;  %s5610_s1 = smov [#allocation7]  }
  0x52   : > { %s803_s2 = sshll.u32 %s5610_s1, 4  ;;  %s5611_s7 = smov [#allocation8]   ;;  %s804_s2 = int_to_ptr.vmem [resolvable:$true] %s803_s2 }
  0x53   : > { %p5830_p3 = pnand %p4508_p0, %p787_p2  ;;  %s817_s10 = sshll.u32 %s5611_s7, 4  ;;  %s5843_s10 = int_to_ptr.vmem [resolvable:$true] %s817_s10 }
  0x54   : > { %s5612_s4 = smov [#allocation11]  }
  0x55   : > { %s6669_s28 = scalar_select %p5830_p3, 1, 0 }
  0x56   : > { %p4907_p5 = pneg %p5830_p3  ;;  %s845_s20 = sshll.u32 %s5612_s4, 4  ;;  %s5845_s20 = int_to_ptr.vmem [resolvable:$true] %s845_s20 }
  0x57   : > { %s5128_s1 = scalar_lea.hbm %s6668_s21, 16 }
  0x58   : > { %p5839_p6 = pnand %p4907_p5, %p6613_p1  ;;  %p5129_p7 = scmp.ne.s32.totalorder %s6668_s21, %s5128_s1 }
  0x59   : > { %p5135_p11 = scmp.lt.u32.totalorder %s5128_s1, %s6668_s21 }
  0x5a   : > { %p5851_p8 = pneg %p5839_p6 }
  0x5c   : > { %p5131_p9 = pnand %p5851_p8, %p5129_p7 }
  0x5e   : > { %p5132_p10 = pneg %p5131_p9 }
  0x60   : > { %p5137_p12 = pnand %p5135_p11, %p5132_p10 }
  0x62   : > { %5140 = shalt.err (!%p5137_p12)
}
  0x63   : > { %s5141_s7 = scalar_lea.vmem %s804_s2, 16  ;;  %s5148_s4 = scalar_lea.vmem %s804_s2, 32 }
  0x64   : > { %p5142_p13 = scmp.ne.s32.totalorder %s804_s2, %s5141_s7  ;;  %p5149_p5 = scmp.lt.s32.totalorder %s804_s2, %s804_s2 }
  0x65   : > { %p5150_p4 = scmp.lt.s32.totalorder %s5148_s4, %s5141_s7 }
  0x66   : > { %p5144_p0 = pnand %p5142_p13, %p5851_p8 }
  0x67   : > { %p5151_p1 = por %p5150_p4, %p5149_p5 }
  0x68   : > { %p5145_p2 = pneg %p5144_p0 }
  0x6a   : > { %p5152_p3 = pnand %p5151_p1, %p5145_p2 }
  0x6c   : > { %5155 = shalt.err (!%p5152_p3)
}
  0x6d   : > { %4910 = dma.hbm_to_vmem [thread:$0]  (!%p5839_p6), %s6668_s21, 16, %s804_s2, [#allocation6]  }
  0x6e   : > { %s5156_s1 = scalar_lea.hbm %s6667_s29, 16 }
  0x6f   : > { %p5157_p7 = scmp.ne.s32.totalorder %s6667_s29, %s5156_s1  ;;  %p5163_p11 = scmp.lt.u32.totalorder %s5156_s1, %s6667_s29 }
  0x71   : > { %p5159_p9 = pnand %p5157_p7, %p5851_p8 }
  0x73   : > { %p5160_p10 = pneg %p5159_p9 }
  0x75   : > { %p5165_p12 = pnand %p5163_p11, %p5160_p10 }
  0x77   : > { %5168 = shalt.err (!%p5165_p12)
}
  0x78   : > { %s5169_s7 = scalar_lea.vmem %s5843_s10, 16  ;;  %s5176_s4 = scalar_lea.vmem %s5843_s10, 32 }
  0x79   : > { %p5170_p1 = scmp.ne.s32.totalorder %s5843_s10, %s5169_s7  ;;  %p5177_p13 = scmp.lt.s32.totalorder %s5843_s10, %s5843_s10 }
  0x7a   : > { %p5178_p0 = scmp.lt.s32.totalorder %s5176_s4, %s5169_s7 }
  0x7b   : > { %p5172_p3 = pnand %p5170_p1, %p5851_p8 }
  0x7c   : > { %p5179_p2 = por %p5178_p0, %p5177_p13 }
  0x7d   : > { %p5173_p4 = pneg %p5172_p3 }
  0x7f   : > { %p5180_p5 = pnand %p5179_p2, %p5173_p4 }
  0x81   : > { %5183 = shalt.err (!%p5180_p5)
}
  0x82   : > { %4913 = dma.hbm_to_vmem [thread:$0]  (!%p5839_p6), %s6667_s29, 16, %s5843_s10, [#allocation9]  }
  0x83   : > { %s5184_s2 = scalar_lea.hbm %s6663_s19, 16 }
  0x84   : > { %p5185_p7 = scmp.ne.s32.totalorder %s6663_s19, %s5184_s2  ;;  %p5191_p11 = scmp.lt.u32.totalorder %s5184_s2, %s6663_s19 }
  0x86   : > { %p5187_p9 = pnand %p5185_p7, %p5851_p8 }
  0x88   : > { %p5188_p10 = pneg %p5187_p9 }
  0x8a   : > { %p5193_p12 = pnand %p5191_p11, %p5188_p10 }
  0x8c   : > { %5196 = shalt.err (!%p5193_p12)
}
  0x8d   : > { %s5197_s1 = scalar_lea.vmem %s5845_s20, 16  ;;  %s5204_s7 = scalar_lea.vmem %s5845_s20, 32 }
  0x8e   : > { %p5198_p1 = scmp.ne.s32.totalorder %s5845_s20, %s5197_s1  ;;  %p5205_p13 = scmp.lt.s32.totalorder %s5845_s20, %s5845_s20 }
  0x8f   : > { %p5206_p0 = scmp.lt.s32.totalorder %s5204_s7, %s5197_s1 }
  0x90   : > { %p5200_p3 = pnand %p5198_p1, %p5851_p8 }
  0x91   : > { %p5207_p2 = por %p5206_p0, %p5205_p13 }
  0x92   : > { %p5201_p4 = pneg %p5200_p3 }
  0x94   : > { %p5208_p5 = pnand %p5207_p2, %p5201_p4 }
  0x96   : > { %5211 = shalt.err (!%p5208_p5)
}
  0x97   : > { %4919 = dma.hbm_to_vmem [thread:$0]  (!%p5839_p6), %s6663_s19, 16, %s5845_s20, [#allocation12]  }
  0x98   : > { %s5613_s10 = smov [#allocation14]   ;;  %s5614_s2 = smov [#allocation17]  }
  0x99   : > { %s867_s4 = sshll.u32 %s5613_s10, 4  ;;  %s895_s21 = sshll.u32 %s5614_s2, 4  ;;  %s868_s4 = int_to_ptr.vmem [resolvable:$true] %s867_s4  ;;  %s896_s21 = int_to_ptr.vmem [resolvable:$true] %s895_s21 }
  0x9a   : > { %s5212_s29 = scalar_lea.hbm %s6660_s30, 16 }
  0x9b   : > { %p5213_p7 = scmp.ne.s32.totalorder %s6660_s30, %s5212_s29  ;;  %p5219_p11 = scmp.lt.u32.totalorder %s5212_s29, %s6660_s30 }
  0x9d   : > { %p5215_p9 = pnand %p5213_p7, %p5851_p8 }
  0x9f   : > { %p5216_p10 = pneg %p5215_p9 }
  0xa1   : > { %p5221_p12 = pnand %p5219_p11, %p5216_p10 }
  0xa3   : > { %5224 = shalt.err (!%p5221_p12)
}
  0xa4   : > { %s5225_s1 = scalar_lea.vmem %s868_s4, 16  ;;  %s5232_s20 = scalar_lea.vmem %s868_s4, 32 }
  0xa5   : > { %p5226_p1 = scmp.ne.s32.totalorder %s868_s4, %s5225_s1  ;;  %p5233_p13 = scmp.lt.s32.totalorder %s868_s4, %s868_s4 }
  0xa6   : > { %p5234_p0 = scmp.lt.s32.totalorder %s5232_s20, %s5225_s1 }
  0xa7   : > { %p5228_p3 = pnand %p5226_p1, %p5851_p8 }
  0xa8   : > { %p5235_p2 = por %p5234_p0, %p5233_p13 }
  0xa9   : > { %p5229_p4 = pneg %p5228_p3 }
  0xab   : > { %p5236_p5 = pnand %p5235_p2, %p5229_p4 }
  0xad   : > { %5239 = shalt.err (!%p5236_p5)
}
  0xae   : > { %4925 = dma.hbm_to_vmem [thread:$0]  (!%p5839_p6), %s6660_s30, 16, %s868_s4, [#allocation15]  }
  0xaf   : > { %s5240_s29 = scalar_lea.hbm %s6661_s27, 16 }
  0xb0   : > { %p5241_p7 = scmp.ne.s32.totalorder %s6661_s27, %s5240_s29  ;;  %p5247_p11 = scmp.lt.u32.totalorder %s5240_s29, %s6661_s27 }
  0xb2   : > { %p5243_p9 = pnand %p5241_p7, %p5851_p8 }
  0xb4   : > { %p5244_p10 = pneg %p5243_p9 }
  0xb6   : > { %p5249_p12 = pnand %p5247_p11, %p5244_p10 }
  0xb8   : > { %5252 = shalt.err (!%p5249_p12)
}
  0xb9   : > { %s5253_s7 = scalar_lea.vmem %s896_s21, 16  ;;  %s5260_s10 = scalar_lea.vmem %s896_s21, 32 }
  0xba   : > { %p5254_p1 = scmp.ne.s32.totalorder %s896_s21, %s5253_s7  ;;  %p5261_p13 = scmp.lt.s32.totalorder %s896_s21, %s896_s21 }
  0xbb   : > { %p5262_p0 = scmp.lt.s32.totalorder %s5260_s10, %s5253_s7 }
  0xbc   : > { %p5256_p3 = pnand %p5254_p1, %p5851_p8 }
  0xbd   : > { %p5263_p2 = por %p5262_p0, %p5261_p13 }
  0xbe   : > { %p5257_p4 = pneg %p5256_p3 }
  0xc0   : > { %p5264_p5 = pnand %p5263_p2, %p5257_p4 }
  0xc2   : > { %5267 = shalt.err (!%p5264_p5)
}
  0xc3   : > { %4931 = dma.hbm_to_vmem [thread:$0]  (!%p5839_p6), %s6661_s27, 16, %s896_s21, [#allocation18]  }
  0xc4   : > { %s5615_s4 = smov [#allocation10]   ;;  %s5616_s1 = smov [#allocation13]  }
  0xc5   : > { %s831_s2 = sshll.u32 %s5615_s4, 4  ;;  %s856_s20 = sshll.u32 %s5616_s1, 4  ;;  %s832_s2 = int_to_ptr.vmem [resolvable:$true] %s831_s2  ;;  %s857_s20 = int_to_ptr.vmem [resolvable:$true] %s856_s20 }
  0xc6   : > { %s5268_s29 = scalar_lea.hbm %s6665_s8, 16 }
  0xc7   : > { %p5269_p7 = scmp.ne.s32.totalorder %s6665_s8, %s5268_s29  ;;  %p5275_p11 = scmp.lt.u32.totalorder %s5268_s29, %s6665_s8 }
  0xc9   : > { %p5271_p9 = pnand %p5269_p7, %p5851_p8 }
  0xcb   : > { %p5272_p10 = pneg %p5271_p9 }
  0xcd   : > { %p5277_p12 = pnand %p5275_p11, %p5272_p10 }
  0xcf   : > { %5280 = shalt.err (!%p5277_p12)
}
  0xd0   : > { %s5281_s7 = scalar_lea.vmem %s832_s2, 16  ;;  %s5288_s21 = scalar_lea.vmem %s832_s2, 32 }
  0xd1   : > { %p5282_p1 = scmp.ne.s32.totalorder %s832_s2, %s5281_s7  ;;  %p5289_p13 = scmp.lt.s32.totalorder %s832_s2, %s832_s2 }
  0xd2   : > { %p5290_p0 = scmp.lt.s32.totalorder %s5288_s21, %s5281_s7 }
  0xd3   : > { %p5284_p3 = pnand %p5282_p1, %p5851_p8 }
  0xd4   : > { %p5291_p2 = por %p5290_p0, %p5289_p13 }
  0xd5   : > { %p5285_p4 = pneg %p5284_p3 }
  0xd7   : > { %p5292_p5 = pnand %p5291_p2, %p5285_p4 }
  0xd9   : > { %5295 = shalt.err (!%p5292_p5)
}
  0xda   : > { %4916 = dma.hbm_to_vmem [thread:$0]  (!%p5839_p6), %s6665_s8, 16, %s832_s2, [#allocation9]  }
  0xdb   : > { %s5296_s10 = scalar_lea.hbm %s6662_s24, 16 }
  0xdc   : > { %p5297_p7 = scmp.ne.s32.totalorder %s6662_s24, %s5296_s10  ;;  %p5303_p11 = scmp.lt.u32.totalorder %s5296_s10, %s6662_s24 }
  0xde   : > { %p5299_p9 = pnand %p5297_p7, %p5851_p8 }
  0xe0   : > { %p5300_p10 = pneg %p5299_p9 }
  0xe2   : > { %p5305_p12 = pnand %p5303_p11, %p5300_p10 }
  0xe4   : > { %5308 = shalt.err (!%p5305_p12)
}
  0xe5   : > { %s5309_s4 = scalar_lea.vmem %s857_s20, 16  ;;  %s5316_s1 = scalar_lea.vmem %s857_s20, 32 }
  0xe6   : > { %p5310_p1 = scmp.ne.s32.totalorder %s857_s20, %s5309_s4  ;;  %p5317_p13 = scmp.lt.s32.totalorder %s857_s20, %s857_s20 }
  0xe7   : > { %p5318_p0 = scmp.lt.s32.totalorder %s5316_s1, %s5309_s4 }
  0xe8   : > { %p5312_p3 = pnand %p5310_p1, %p5851_p8 }
  0xe9   : > { %p5319_p2 = por %p5318_p0, %p5317_p13 }
  0xea   : > { %p5313_p4 = pneg %p5312_p3 }
  0xec   : > { %p5320_p5 = pnand %p5319_p2, %p5313_p4 }
  0xee   : > { %5323 = shalt.err (!%p5320_p5)
}
  0xef   : > { %4922 = dma.hbm_to_vmem [thread:$0]  (!%p5839_p6), %s6662_s24, 16, %s857_s20, [#allocation12]  }
  0xf0   : > { %s5617_s2 = smov [#allocation16]   ;;  %s5618_s7 = smov [#allocation19]  }
  0xf1   : > { %s881_s29 = sshll.u32 %s5617_s2, 4  ;;  %s909_s21 = sshll.u32 %s5618_s7, 4  ;;  %s882_s29 = int_to_ptr.vmem [resolvable:$true] %s881_s29  ;;  %s910_s21 = int_to_ptr.vmem [resolvable:$true] %s909_s21 }
  0xf2   : > { %s5324_s10 = scalar_lea.hbm %s6664_s12, 16 }
  0xf3   : > { %p5325_p7 = scmp.ne.s32.totalorder %s6664_s12, %s5324_s10  ;;  %p5331_p11 = scmp.lt.u32.totalorder %s5324_s10, %s6664_s12 }
  0xf5   : > { %p5327_p9 = pnand %p5325_p7, %p5851_p8 }
  0xf7   : > { %p5328_p10 = pneg %p5327_p9 }
  0xf9   : > { %p5333_p12 = pnand %p5331_p11, %p5328_p10 }
  0xfb   : > { %5336 = shalt.err (!%p5333_p12)
}
  0xfc   : > { %s5337_s4 = scalar_lea.vmem %s882_s29, 16  ;;  %s5344_s20 = scalar_lea.vmem %s882_s29, 32 }
  0xfd   : > { %p5338_p1 = scmp.ne.s32.totalorder %s882_s29, %s5337_s4  ;;  %p5345_p13 = scmp.lt.s32.totalorder %s882_s29, %s882_s29 }
  0xfe   : > { %p5346_p0 = scmp.lt.s32.totalorder %s5344_s20, %s5337_s4 }
  0xff   : > { %p5340_p3 = pnand %p5338_p1, %p5851_p8 }
 0x100   : > { %p5347_p2 = por %p5346_p0, %p5345_p13 }
 0x101   : > { %p5341_p4 = pneg %p5340_p3 }
 0x103   : > { %p5348_p5 = pnand %p5347_p2, %p5341_p4 }
 0x105   : > { %5351 = shalt.err (!%p5348_p5)
}
 0x106   : > { %4928 = dma.hbm_to_vmem [thread:$0]  (!%p5839_p6), %s6664_s12, 16, %s882_s29, [#allocation15]  }
 0x107   : > { %s5352_s1 = scalar_lea.hbm %s6666_s6, 16 }
 0x108   : > { %p5353_p7 = scmp.ne.s32.totalorder %s6666_s6, %s5352_s1  ;;  %p5359_p11 = scmp.lt.u32.totalorder %s5352_s1, %s6666_s6 }
 0x10a   : > { %p5355_p9 = pnand %p5353_p7, %p5851_p8 }
 0x10c   : > { %p5356_p10 = pneg %p5355_p9 }
 0x10e   : > { %p5361_p12 = pnand %p5359_p11, %p5356_p10 }
 0x110   : > { %5364 = shalt.err (!%p5361_p12)
}
 0x111   : > { %s5365_s2 = scalar_lea.vmem %s910_s21, 16  ;;  %s5372_s7 = scalar_lea.vmem %s910_s21, 32 }
 0x112   : > { %p5366_p1 = scmp.ne.s32.totalorder %s910_s21, %s5365_s2  ;;  %p5373_p13 = scmp.lt.s32.totalorder %s910_s21, %s910_s21 }
 0x113   : > { %p5374_p0 = scmp.lt.s32.totalorder %s5372_s7, %s5365_s2 }
 0x114   : > { %p5368_p3 = pnand %p5366_p1, %p5851_p8 }
 0x115   : > { %p5375_p2 = por %p5374_p0, %p5373_p13 }
 0x116   : > { %p5369_p4 = pneg %p5368_p3 }
 0x118   : > { %p5376_p5 = pnand %p5375_p2, %p5369_p4 }
 0x11a   : > { %5379 = shalt.err (!%p5376_p5)
}
 0x11b   : > { %4934 = dma.hbm_to_vmem [thread:$0]  (!%p5839_p6), %s6666_s6, 16, %s910_s21, [#allocation18]  }
 0x11c   : > { %s4507_s13 = sadd.s32 4294967294, %s5578_s23   ;;  %s100_s29 = sadd.s32 1, %s5574_s22 }
 0x11d   : > { %s109_s10 = sadd.s32 1, %s5566_s18  ;;  %p102_p8 = scmp.ge.s32.totalorder %s100_s29, 2 }
 0x11e   : > { %p116_p7 = scmp.ne.s32.totalorder %s5566_s18, %s5562_s16  ;;  %p117_p9 = scmp.eq.s32.totalorder %s5578_s23, 0 }
 0x11f   : > { %p122_p10 = scmp.ne.s32.totalorder %s5562_s16, %s5558_s15  ;;  %s6717_s29 = smov (%p102_p8, %s100_s29), 0 }
 0x120   : > { %p5965_p11 = por %p117_p9, %p116_p7  ;;  %p6673_p6 = scmp.eq.s32.totalorder %s5825_s26, 0 }
 0x121   : > { %s104_s4 = ssub.s32 %s5574_s22, %s6717_s29  ;;  %p746_p1 = scmp.eq.s32.totalorder %s5825_s26, 1 }
 0x122   : > { %p5971_p12 = por %p6673_p6, %p122_p10  ;;  %p107_p3 = scmp.eq.s32.totalorder %s104_s4, 0 }
 0x123   : > { %p752_p4 = scmp.eq.s32.totalorder %s4507_s13, 1  ;;  %p5978_p13 = por %p746_p1, %p116_p7 }
 0x124   : > { %s6674_s21 = scalar_select %p5971_p12, 1, 0 }
 0x125   : > { %s6675_s20 = scalar_select %p5978_p13, 1, 0 }
 0x126   : > { %p4958_p0 = scmp.lt.s32.totalorder %s5578_s23, 2  ;;  %p5986_p2 = por %p752_p4, %p122_p10 }
 0x127   : > { %s5984_s1 = scalar_select %p107_p3, %s5566_s18, %s109_s10  }
 0x128   : > { %s6676_s2 = scalar_select %p5986_p2, 1, 0 }
 0x129   : > { %s950_s7 = sand.u32 1, %s5566_s18   ;;  %s4520_s8 = sshll.u32 %s5574_s22, 6 }
 0x12a   : > { %s5991_s6 = sshll.u32 %s950_s7, 2  ;;  %s5995_s4 = scalar_lea.hbm %s6658_s5, %s4520_s8 }
 0x12b   : > { %s954_s13 = scalar_lea.vmem [#allocation2], %s5991_s6  ;;  %p6002_p5 = pnand %p4958_p0, %p5965_p11 }
 0x12c   : > { %s962_s10 = sshll.u32 %s954_s13, 4  ;;  %s6007_s19 = scalar_lea.hbm %s5647_s9, %s4520_s8  ;;  %s5998_s10 = int_to_ptr.vmem [resolvable:$true] %s962_s10 }
 0x12d   : > { %s951_s27 = scalar_lea.sflag [#allocation3], %s950_s7  ;;  %s5380_s30 = scalar_lea.hbm %s5995_s4, 64 }
 0x12e   : > { %p5381_p8 = scmp.ne.s32.totalorder %s5995_s4, %s5380_s30  ;;  %p5382_p7 = pneg %p6002_p5 }
 0x12f   : > { %s5385_s13 = scalar_lea.hbm %s6658_s5, 128  ;;  %p5386_p6 = scmp.lt.u32.totalorder %s5995_s4, %s6658_s5 }
 0x130   : > { %p5383_p9 = pnand %p5382_p7, %p5381_p8  ;;  %p5387_p11 = scmp.lt.u32.totalorder %s5385_s13, %s5380_s30 }
 0x131   : > { %p5389_p3 = scmp.lt.u32.totalorder %s5380_s30, %s5995_s4 }
 0x132   : > { %p5384_p10 = pneg %p5383_p9  ;;  %p5388_p1 = por %p5387_p11, %p5386_p6 }
 0x134   : > { %p5390_p4 = por %p5389_p3, %p5388_p1 }
 0x136   : > { %p5391_p0 = pnand %p5390_p4, %p5384_p10 }
 0x138   : > { %5394 = shalt.err (!%p5391_p0)
}
 0x139   : > { %s5395_s8 = scalar_lea.vmem %s5998_s10, 64  ;;  %s5619_s11 = smov [#allocation2]  }
 0x13a   : > { %p5396_p2 = scmp.ne.s32.totalorder %s5998_s10, %s5395_s8  ;;  %s5400_s7 = sshll.u32 %s5619_s11, 4  ;;  %s5401_s7 = int_to_ptr.vmem [resolvable:$false] %s5400_s7 }
 0x13b   : > { %s5402_s24 = scalar_lea.vmem %s5401_s7, 128  ;;  %p5403_p8 = scmp.lt.s32.totalorder %s5998_s10, %s5401_s7 }
 0x13c   : > { %p5398_p13 = pnand %p5396_p2, %p5382_p7  ;;  %p5404_p9 = scmp.lt.s32.totalorder %s5402_s24, %s5395_s8 }
 0x13e   : > { %p5399_p12 = pneg %p5398_p13  ;;  %p5405_p6 = por %p5404_p9, %p5403_p8 }
 0x140   : > { %p5406_p11 = pnand %p5405_p6, %p5399_p12 }
 0x142   : > { %5409 = shalt.err (!%p5406_p11)
}
 0x143   : > { %4938 = dma.hbm_to_vmem [thread:$0]  (!%p6002_p5), %s5995_s4, 64, %s5998_s10, %s951_s27  }
 0x144   : > { %s973_s30 = scalar_lea.vmem [#allocation5], %s5991_s6  ;;  %s6678_s24 = sand.u32 1, %s5578_s23  }
 0x145   : > { %s980_s13 = sshll.u32 %s973_s30, 4  ;;  %s970_s8 = scalar_lea.sflag [#allocation6], %s6678_s24  ;;  %s981_s13 = int_to_ptr.vmem [resolvable:$true] %s980_s13 }
 0x146   : > { %s5410_s11 = scalar_lea.hbm %s6007_s19, 64  ;;  %s5415_s7 = scalar_lea.hbm %s5647_s9, 128 }
 0x147   : > { %p5411_p12 = scmp.ne.s32.totalorder %s6007_s19, %s5410_s11  ;;  %p5416_p10 = scmp.lt.u32.totalorder %s6007_s19, %s5647_s9 }
 0x148   : > { %p5417_p1 = scmp.lt.u32.totalorder %s5415_s7, %s5410_s11  ;;  %p5419_p4 = scmp.lt.u32.totalorder %s5410_s11, %s6007_s19 }
 0x149   : > { %p5413_p13 = pnand %p5411_p12, %p5382_p7 }
 0x14a   : > { %p5418_p3 = por %p5417_p1, %p5416_p10 }
 0x14b   : > { %p5414_p2 = pneg %p5413_p13 }
 0x14c   : > { %p5420_p0 = por %p5419_p4, %p5418_p3 }
 0x14e   : > { %p5421_p8 = pnand %p5420_p0, %p5414_p2 }
 0x150   : > { %5424 = shalt.err (!%p5421_p8)
}
 0x151   : > { %s5425_s27 = scalar_lea.vmem %s981_s13, 64  ;;  %s5620_s6 = smov [#allocation5]  }
 0x152   : > { %p5426_p9 = scmp.ne.s32.totalorder %s981_s13, %s5425_s27  ;;  %s5430_s4 = sshll.u32 %s5620_s6, 4  ;;  %s5431_s4 = int_to_ptr.vmem [resolvable:$false] %s5430_s4 }
 0x153   : > { %s5432_s10 = scalar_lea.vmem %s5431_s4, 128  ;;  %p5433_p12 = scmp.lt.s32.totalorder %s981_s13, %s5431_s4 }
 0x154   : > { %p5428_p6 = pnand %p5426_p9, %p5382_p7  ;;  %p5434_p13 = scmp.lt.s32.totalorder %s5432_s10, %s5425_s27 }
 0x156   : > { %p5429_p11 = pneg %p5428_p6  ;;  %p5435_p1 = por %p5434_p13, %p5433_p12 }
 0x158   : > { %p5436_p10 = pnand %p5435_p1, %p5429_p11 }
 0x15a   : > { %5439 = shalt.err (!%p5436_p10)
}
 0x15b   : > { %4941 = dma.hbm_to_vmem [thread:$0]  (!%p6002_p5), %s6007_s19, 64, %s981_s13, %s970_s8  }
 0x15c   : > { %p6679_p2 = scmp.ne.s32.totalorder %s6669_s28, 0 }
 0x15d   : > { %s6052_s30 = sand.u32 (!%p6679_p2), 1, %s5562_s16   ;;  %p6680_p7 = scmp.ne.s32.totalorder (!%p6679_p2), %s6674_s21, 0 }
 0x15e   : > { %997 = sbr.rel (%p6679_p2) target bundleno = 4654 (0x122e), region = 136  ;;  %s6055_s24 = sshll.u32 (!%p6679_p2), %s6052_s30, 2 }
 0x15f   : > { %s1000_s11 = scalar_lea.sflag (!%p6679_p2), [#allocation3], %s6052_s30  ;;  %s1003_s7 = scalar_lea.vmem (!%p6679_p2), [#allocation2], %s6055_s24 }
 0x165   : > { %5521 = dma.done.wait (%p6680_p7), %s1000_s11, 64  }
 0x166   : > { %5523 = vsyncadd (%p6680_p7), %s1000_s11, 4294967232  ;;  %s1008_s19 = sand.u32 1, %s5825_s26   ;;  %s1012_s28 = scalar_lea.vmem [#allocation5], %s6055_s24 }
 0x167   : > { %s1009_s12 = scalar_lea.sflag [#allocation6], %s1008_s19 }
 0x168   : > { %5525 = dma.done.wait (%p6680_p7), %s1009_s12, 64  }
 0x169   : > { %5527 = vsyncadd (%p6680_p7), %s1009_s12, 4294967232  ;;  %p6681_p5 = scmp.eq.s32.totalorder %s5825_s26, 0 }
 0x16b   : > { %5529 = dma.done.wait (%p6681_p5), [#allocation6], 16   ;;  %p6682_p3 = pmov %p6681_p5 }
 0x16d   : > { %5531 = vsyncadd (%p6682_p3), [#allocation6], 4294967280  ;;  %p6683_p4 = pmov %p6682_p3 }
 0x16e   : > { %p6684_p0 = pmov %p6682_p3 }
 0x16f   : > { %5533 = dma.done.wait (%p6683_p4), [#allocation9], 32  }
 0x170   : > { %5535 = vsyncadd (%p6684_p0), [#allocation9], 4294967264  ;;  %p6685_p8 = pmov %p6684_p0 }
 0x171   : > { %p6686_p9 = pmov %p6684_p0 }
 0x172   : > { %5537 = dma.done.wait (%p6685_p8), [#allocation12], 32  }
 0x173   : > { %5539 = vsyncadd (%p6686_p9), [#allocation12], 4294967264  ;;  %p6687_p6 = pmov %p6684_p0 }
 0x174   : > { %p6688_p11 = pmov %p6684_p0 }
 0x175   : > { %5541 = dma.done.wait (%p6687_p6), [#allocation15], 32  }
 0x176   : > { %5543 = vsyncadd (%p6688_p11), [#allocation15], 4294967264  ;;  %p6689_p12 = pmov %p6684_p0 }
 0x177   : > { %p6690_p13 = pmov %p6684_p0 }
 0x178   : > { %5545 = dma.done.wait (%p6689_p12), [#allocation18], 32  }
 0x179   : > { %5547 = vsyncadd (%p6690_p13), [#allocation18], 4294967264  ;;  %v5621_v0 = vmov 0.0   ;;  %vm5622_vm0 = vmmov 0   ;;  %v5067_v1 = vld [vmem:[%s5667_s25] sm:$0xff]   ;;  %v5069_v3 = vld [vmem:[%s5667_s25 + $0x8] sm:$0xff]   ;;  %v1356_v25 = vlaneseq }
 0x17a   : > { %4691 = vmatprep.subr.bf16.mxu1 %v5621_v0  ;;  %4683 = vmatprep.subr.bf16.mxu0 %v5621_v0  ;;  %v5068_v2 = vld [vmem:[%s5657_s17] sm:$0xff]   ;;  %v1147_v4 = vld [vmem:[%s1012_s28] sm:$0xf]  ;;  %vm1172_vm1 = vcmask 261120   ;;  %v4543_v7 = vld [vmem:[#allocation8] ss:$0 sm:$0xff] }
 0x17b   : > { %4695 = vmatprep.mubr.msk.bf16.mxu1 %vm5622_vm0, %v5621_v0  ;;  %4687 = vmatprep.mubr.msk.bf16.mxu0 %vm5622_vm0, %v5621_v0  ;;  %v5070_v5 = vld [vmem:[%s5657_s17 + $0x8] sm:$0xff]   ;;  %v6103_v6 = vld [vmem:[%s1003_s7] sm:$0xf]  ;;  %v4539_v8 = vld [vmem:[#allocation7] ss:$0 sm:$0xff]  ;;  %s5623_s26 = smov 104  }
 0x17c   : > { %4692 = vmatpush3.bf16.msra.mxu1 %v5067_v1  ;;  %4684 = vmatpush3.bf16.msra.mxu0 %v5068_v2  ;;  %s5624_s21 = smov 120   ;;  %s5625_s13 = smov 112   ;;  %v5071_v21 = vld [vmem:[%s6659_s3] sm:$0xff]   ;;  %v5072_v22 = vld [vmem:[%s6659_s3 + $0x8] sm:$0xff]   ;;  %v5626_v23 = vmov 1983009808  }
 0x17d   : > { %4693 = vmatprep.subr.bf16.mxu1 %v5621_v0  ;;  %4685 = vmatprep.subr.bf16.mxu0 %v5621_v0  ;;  %v1354_v24 = vunpack.c.l.s4 %v5626_v23  ;;  %v5627_v26 = vmov 1934713408   ;;  %v1357_v29 = vshrl.u32 %v1356_v25, 7  ;;  %v5628_v45 = vmov 0   ;;  %s4536_s8 = sshll.u32 %s6052_s30, 3  ;;  %s6691_s6 = sld [smem:[#allocation38_spill]] }
 0x17e   : > { %v1371_v27 = vunpack.c.l.s4 %v5627_v26  ;;  %vm1852_vm2 = vcmask 64512   ;;  %vm2092_vm3 = vcmask 1043456   ;;  %s6263_s27 = scalar_lea.vmem [#allocation21], %s4536_s8  ;;  %s5629_s4 = smov 16   ;;  %vm2431_vm4 = vcmask 130048  }
 0x17f   : > { %v1355_v28 = vunpack.c.0.s8 %v1354_v24  ;;  %s5630_s10 = smov 8   ;;  %s6626_s11 = smov 24   ;;  %vm2433_vm5 = vcmask 195584   ;;  %vm3541_vm6 = vcmask 97280   ;;  %vm3585_vm7 = vcmask 1045504  }
 0x180   : > { %4694 = vmatpush3.bf16.msra.mxu1 %v5069_v3  ;;  %4686 = vmatpush3.bf16.msra.mxu0 %v5070_v5  ;;  %v1372_v30 = vunpack.c.0.s8 %v1371_v27  ;;  %s6692_s7 = sld [smem:[#allocation44_spill]]  ;;  %s6693_s19 = sld [smem:[#allocation33_spill]]  ;;  %vm4131_vm8 = vcmask 523264  }
 0x181   : > { %4707 = vmatprep.subr.bf16.mxu1 %v5621_v0  ;;  %4699 = vmatprep.subr.bf16.mxu0 %v5621_v0  ;;  %v6127_v31 = vsub.s32 %v1355_v28, %v1357_v29  ;;  %p1140_p1 = scmp.lt.s32.totalorder %s5570_s0, 1  ;;  %s6694_s12 = sld [smem:[#allocation42_spill]] }
 0x182   : > { %v6130_v35 = vsub.s32 %v1372_v30, %v1357_v29  ;;  %p6705_p2 = scmp.ne.s32.totalorder %s6675_s20, 0  ;;  %s5632_s3 = smov [#allocation21]  }
 0x183   : > { %4696 = vmatmul.mubr.msk.bf16.vlgmr.msra.gmra.mrb[0].mxu1 %vm1172_vm1, %v1147_v4  ;;  %4688 = vmatmul.mubr.msk.bf16.vlgmr.msra.gmra.mrb[0].mxu0 %vm1172_vm1, %v6103_v6  ;;  %s1141_s28 = scalar_select %p1140_p1, %s5570_s0, 1 }
 0x184   : > { %4709 = vmatprep.mubr.msk.bf16.mxu1 %vm5622_vm0, %v5621_v0  ;;  %4703 = vmatprep.mubr.msk.bf16.mxu0 %vm5622_vm0, %v5621_v0 }
 0x185   : > { %4700 = vmatpush3.bf16.msra.mxu0 %v5071_v21  ;;  %s4618_s8 = sshll.u32 %s1141_s28, 3  ;;  %s6702_s28 = sld [smem:[#allocation51_spill]] }
 0x186   : > { %4701 = vmatprep.subr.bf16.mxu0 %v5621_v0 }
 0x189   : > { %4702 = vmatpush3.bf16.msra.mxu0 %v5072_v22 }
 0x18a   : > { %4713 = vmatprep.subr.bf16.mxu0 %v5621_v0 }
 0x18c   : > { %4704 = vmatmul.mubr.msk.bf16.vlgmr.msra.gmra.mrb[4].mxu0 %vm1172_vm1, %v1147_v4 }
 0x18d   : > { %4715 = vmatprep.mubr.msk.bf16.mxu0 %vm5622_vm0, %v5621_v0 }
 0x256   : > { %v1276_v9 = vpop.f32.mrb[0].mxu1  ;;  %v1210_v12 = vpop.f32.mrb[0].mxu0 }
 0x257   : > { %v1277_v10 = vadd.f32 %v4543_v7, %v1276_v9  ;;  %v4697_v11 = vpop.f32.mrb[1].mxu1  ;;  %v1211_v14 = vadd.f32 %v4539_v8, %v1210_v12  ;;  %v4689_v15 = vpop.f32.mrb[1].mxu0 }
 0x258   : > { %v1279_v13 = vpop.f32.mrb[2].mxu1  ;;  %v1213_v18 = vpop.f32.mrb[2].mxu0 }
 0x259   : > { %v1514_v16 = vpack.c.bf16 %v1277_v10, %v1277_v10  ;;  %v4698_v17 = vpop.f32.mrb[3].mxu1  ;;  %v4690_v19 = vpop.f32.mrb[3].mxu0  ;;  %v1345_v20 = vpack.c.bf16 %v1211_v14, %v1211_v14 }
 0x25b   : > { %1520 = vrot.lane.b32.xlu1 %v1514_v16, %s5623_s26  ;;  %1516 = vrot.lane.b32.xlu0 %v1514_v16, %s5624_s21  ;;  %v1528_v44 = vrot.slane %v1514_v16, %v6127_v31  ;;  %v1359_v52 = vrot.slane %v1345_v20, %v6127_v31 }
 0x25f   : > { %1518 = vrot.lane.b32.xlu0 %v1514_v16, %s5625_s13  ;;  %1347 = vrot.lane.b32.xlu1 %v1345_v20, %s5624_s21 }
 0x263   : > { %1349 = vrot.lane.b32.xlu0 %v1345_v20, %s5625_s13  ;;  %1351 = vrot.lane.b32.xlu1 %v1345_v20, %s5623_s26 }
 0x2cd   : > { %v1521_v32 = vpop.permute.xlu1 %1520  ;;  %v1517_v33 = vpop.permute.xlu0 %1516 }
 0x2ce   : > { %v1570_v34 = vrot.slane %v1521_v32, %v6127_v31  ;;  %v1562_v36 = vrot.slane %v1517_v33, %v6127_v31 }
 0x2d0   : > { %v1571_v37 = vcombine.low %v1562_v36, %v1570_v34  ;;  %v1572_v38 = vcombine.high %v1562_v36, %v1570_v34 }
 0x2d1   : > { %v1519_v39 = vpop.permute.xlu0 %1518  ;;  %v1348_v40 = vpop.permute.xlu1 %1347 }
 0x2d2   : > { %v1579_v41 = vrot.slane %v1571_v37, %v6130_v35  ;;  %v1586_v42 = vrot.slane %v1572_v38, %v6130_v35  ;;  %v1536_v43 = vrot.slane %v1519_v39, %v6127_v31  ;;  %v1393_v48 = vrot.slane %v1348_v40, %v6127_v31 }
 0x2d4   : > { %v1587_v46 = vcombine.high %v1579_v41, %v5628_v45  ;;  %v1588_v47 = vcombine.high %v1586_v42, %v5628_v45  ;;  %v1537_v49 = vcombine.low %v1528_v44, %v1536_v43  ;;  %v1538_v50 = vcombine.high %v1528_v44, %v1536_v43 }
 0x2d5   : > { %v1350_v51 = vpop.permute.xlu0 %1349  ;;  %v1352_v53 = vpop.permute.xlu1 %1351  ;;  %v1594_v54 = vshrl.u32 %v1579_v41, 16  ;;  %v1610_v55 = vshrl.u32 %v1586_v42, 16 }
 0x2d6   : > { %v1367_v56 = vrot.slane %v1350_v51, %v6127_v31  ;;  %v1401_v57 = vrot.slane %v1352_v53, %v6127_v31  ;;  %v1602_v58 = vshrl.u32 %v1587_v46, 16  ;;  %v1618_v59 = vshrl.u32 %v1588_v47, 16 }
 0x2d7   : > { %v1545_v60 = vrot.slane %v1537_v49, %v6130_v35  ;;  %v1552_v61 = vrot.slane %v1538_v50, %v6130_v35 }
 0x2d8   : > { %v1368_v62 = vcombine.low %v1359_v52, %v1367_v56  ;;  %v1369_v63 = vcombine.high %v1359_v52, %v1367_v56  ;;  %v1402_v1 = vcombine.low %v1393_v48, %v1401_v57  ;;  %v1403_v2 = vcombine.high %v1393_v48, %v1401_v57 }
 0x2d9   : > { %v1553_v3 = vcombine.high %v1545_v60, %v5628_v45  ;;  %v1554_v4 = vcombine.high %v1552_v61, %v5628_v45  ;;  %v1591_v5 = vpack.i.b16 %v1579_v41, %v1545_v60  ;;  %v1593_v7 = vshrl.u32 %v1545_v60, 16 }
 0x2da   : > { %v1607_v8 = vpack.i.b16 %v1586_v42, %v1552_v61  ;;  %v1609_v9 = vshrl.u32 %v1552_v61, 16  ;;  %v1376_v10 = vrot.slane %v1368_v62, %v6130_v35  ;;  %v1383_v11 = vrot.slane %v1369_v63, %v6130_v35 }
 0x2db   : > { %v1595_v12 = vpack.i.b16 %v1594_v54, %v1593_v7  ;;  %v1599_v13 = vpack.i.b16 %v1587_v46, %v1553_v3  ;;  %v1601_v14 = vshrl.u32 %v1553_v3, 16  ;;  %v1615_v15 = vpack.i.b16 %v1588_v47, %v1554_v4 }
 0x2dc   : > { %v1611_v16 = vpack.i.b16 %v1610_v55, %v1609_v9  ;;  %v1617_v17 = vshrl.u32 %v1554_v4, 16  ;;  %v1621_v18 = vcombine.low %v1591_v5, %v1607_v8  ;;  %v1384_v19 = vcombine.high %v1376_v10, %v5628_v45 }
 0x2dd   : > { %v1603_v20 = vpack.i.b16 %v1602_v58, %v1601_v14  ;;  %v1629_v21 = vcombine.low %v1599_v13, %v1615_v15  ;;  %v1385_v22 = vcombine.high %v1383_v11, %v5628_v45  ;;  %v1424_v26 = vshrl.u32 %v1376_v10, 16 }
 0x2de   : > { %v1619_v23 = vpack.i.b16 %v1618_v59, %v1617_v17  ;;  %v1628_v24 = vrot.slane %v1621_v18, %v6127_v31  ;;  %v1646_v25 = vcombine.low %v1595_v12, %v1611_v16  ;;  %v1432_v27 = vshrl.u32 %v1384_v19, 16 }
 0x2df   : > { %v1440_v28 = vshrl.u32 %v1383_v11, 16  ;;  %v1410_v29 = vrot.slane %v1402_v1, %v6130_v35  ;;  %v1417_v30 = vrot.slane %v1403_v2, %v6130_v35  ;;  %v1448_v33 = vshrl.u32 %v1385_v22, 16 }
 0x2e0   : > { %v1654_v32 = vcombine.low %v1603_v20, %v1619_v23  ;;  %v1636_v34 = vrot.slane %v1629_v21, %v6127_v31  ;;  %v1653_v36 = vrot.slane %v1646_v25, %v6127_v31 }
 0x2e1   : > { %v1418_v37 = vcombine.high %v1410_v29, %v5628_v45  ;;  %v1419_v38 = vcombine.high %v1417_v30, %v5628_v45  ;;  %v1422_v39 = vpack.i.b16 %v1410_v29, %v1376_v10  ;;  %v1425_v40 = vshrl.u32 %v1410_v29, 16 }
 0x2e2   : > { %v1438_v41 = vpack.i.b16 %v1417_v30, %v1383_v11  ;;  %v1441_v42 = vshrl.u32 %v1417_v30, 16  ;;  %v1637_v43 = vcombine.low %v1628_v24, %v1636_v34  ;;  %v1661_v44 = vrot.slane %v1654_v32, %v6127_v31  ;;  %v1339_v32 = vpop.f32.mrb[4].mxu0 }
 0x2e3   : > { %v1426_v46 = vpack.i.b16 %v1425_v40, %v1424_v26  ;;  %v1430_v47 = vpack.i.b16 %v1418_v37, %v1384_v19  ;;  %v1433_v48 = vshrl.u32 %v1418_v37, 16  ;;  %v1446_v49 = vpack.i.b16 %v1419_v38, %v1385_v22 }
 0x2e4   : > { %v1442_v50 = vpack.i.b16 %v1441_v42, %v1440_v28  ;;  %v1449_v51 = vshrl.u32 %v1419_v38, 16  ;;  %v1452_v52 = vcombine.low %v1422_v39, %v1438_v41  ;;  %v1644_v53 = vrot.slane %v1637_v43, %v6130_v35 }
 0x2e5   : > { %v1434_v54 = vpack.i.b16 %v1433_v48, %v1432_v27  ;;  %v1460_v55 = vcombine.low %v1430_v47, %v1446_v49  ;;  %v1662_v56 = vcombine.low %v1653_v36, %v1661_v44 }
 0x2e6   : > { %v1450_v57 = vpack.i.b16 %v1449_v51, %v1448_v33  ;;  %v1477_v58 = vcombine.low %v1426_v46, %v1442_v50  ;;  %v1459_v59 = vrot.slane %v1452_v52, %v6127_v31  ;;  %v1674_v63 = vshrl.u32 %v1644_v53, 16  ;;  %v4705_v33 = vpop.f32.mrb[5].mxu0 }
 0x2e7   : > { %v1467_v60 = vrot.slane %v1460_v55, %v6127_v31  ;;  %v1669_v61 = vrot.slane %v1662_v56, %v6130_v35  ;;  %v1645_v10 = vcombine.high %v1644_v53, %v5628_v45  ;;  %v1342_v34 = vpop.f32.mrb[6].mxu0  ;;  %v4547_v55 = vld [vmem:[#allocation10] ss:$0 sm:$0xff] }
 0x2e8   : > { %v1485_v62 = vcombine.low %v1434_v54, %v1450_v57  ;;  %v1484_v5 = vrot.slane %v1477_v58, %v6127_v31  ;;  %v4706_v36 = vpop.f32.mrb[7].mxu0 }
 0x2e9   : > { %v1468_v1 = vcombine.low %v1459_v59, %v1467_v60  ;;  %v1673_v2 = vpack.i.b16 %v1669_v61, %v1644_v53  ;;  %v1675_v3 = vshrl.u32 %v1669_v61, 16  ;;  %v1670_v4 = vcombine.high %v1669_v61, %v5628_v45 }
 0x2ea   : > { %v1492_v7 = vrot.slane %v1485_v62, %v6127_v31  ;;  %v1680_v17 = vshrl.u32 %v1645_v10, 16  ;;  %v1340_v59 = vadd.f32 %v4547_v55, %v1339_v32 }
 0x2eb   : > { %v1857_v8 = vsel %vm1852_vm2, %v1673_v2, 0  ;;  %v1676_v9 = vpack.i.b16 %v1675_v3, %v1674_v63  ;;  %v1475_v13 = vrot.slane %v1468_v1, %v6130_v35  ;;  %v1681_v14 = vshrl.u32 %v1670_v4, 16 }
 0x2ec   : > { %v1493_v11 = vcombine.low %v1484_v5, %v1492_v7  ;;  %4708 = vmatpush3.bf16.xpose.msra.mxu1 %v1857_v8  ;;  %v1679_v16 = vpack.i.b16 %v1670_v4, %v1645_v10  ;;  %v1683_v60 = vpack.c.bf16 %v1340_v59, %v1340_v59 }
 0x2ed   : > { %v1903_v12 = vsel %vm1852_vm2, %v1676_v9, 0  ;;  %4719 = vmatprep.subr.bf16.mxu1 %v5621_v0  ;;  %v1505_v20 = vshrl.u32 %v1475_v13, 16  ;;  %v1682_v21 = vpack.i.b16 %v1681_v14, %v1680_v17  ;;  %v1476_v26 = vcombine.high %v1475_v13, %v5628_v45 }
 0x2ee   : > { %4714 = vmatpush3.bf16.xpose.msra.mxu0 %v1903_v12  ;;  %v1500_v15 = vrot.slane %v1493_v11, %v6130_v35  ;;  %v1949_v22 = vsel %vm1852_vm2, %v1679_v16, 0 }
 0x2ef   : > { %4725 = vmatprep.subr.bf16.mxu0 %v5621_v0  ;;  %v1995_v25 = vsel %vm1852_vm2, %v1682_v21, 0  ;;  %v1511_v29 = vshrl.u32 %v1476_v26, 16 }
 0x2f0   : > { %v1506_v18 = vshrl.u32 %v1500_v15, 16  ;;  %v1504_v19 = vpack.i.b16 %v1500_v15, %v1475_v13  ;;  %v1501_v24 = vcombine.high %v1500_v15, %v5628_v45 }
 0x2f2   : > { %v1507_v23 = vpack.i.b16 %v1506_v18, %v1505_v20  ;;  %v1512_v27 = vshrl.u32 %v1501_v24, 16  ;;  %v1510_v28 = vpack.i.b16 %v1501_v24, %v1476_v26 }
 0x2f3   : > { %4710 = vmatmul.mubr.msk.bf16.vlgmr.msra.gmra.mrb[4].mxu1 %vm1852_vm2, %v1504_v19 }
 0x2f4   : > { %4720 = vmatpush3.bf16.xpose.msra.mxu1 %v1949_v22  ;;  %4721 = vmatprep.mubr.msk.bf16.mxu1 %vm5622_vm0, %v5621_v0  ;;  %v1513_v30 = vpack.i.b16 %v1512_v27, %v1511_v29 }
 0x2f5   : > { %4716 = vmatmul.mubr.msk.bf16.vlgmr.msra.gmra.mrb[8].mxu0 %vm1852_vm2, %v1507_v23  ;;  %4731 = vmatprep.subr.bf16.mxu1 %v5621_v0 }
 0x2f6   : > { %4726 = vmatpush3.bf16.xpose.msra.mxu0 %v1995_v25  ;;  %4727 = vmatprep.mubr.msk.bf16.mxu0 %vm5622_vm0, %v5621_v0 }
 0x2f7   : > { %4737 = vmatprep.subr.bf16.mxu0 %v5621_v0 }
 0x2fb   : > { %4722 = vmatmul.mubr.msk.bf16.vlgmr.msra.gmra.mrb[8].mxu1 %vm1852_vm2, %v1510_v28  ;;  %v1697_v28 = vrot.slane %v1683_v60, %v6127_v31 }
 0x2fc   : > { %4733 = vmatprep.mubr.msk.bf16.mxu1 %vm5622_vm0, %v5621_v0 }
 0x2fd   : > { %4728 = vmatmul.mubr.msk.bf16.vlgmr.msra.gmra.mrb[12].mxu0 %vm1852_vm2, %v1513_v30 }
 0x2fe   : > { %4739 = vmatprep.mubr.msk.bf16.mxu0 %vm5622_vm0, %v5621_v0 }
 0x3c6   : > { %v1893_v37 = vpop.f32.mrb[4].mxu1 }
 0x3c7   : > { %v4711_v38 = vpop.f32.mrb[5].mxu1  ;;  %v2037_v39 = vsel %vm1852_vm2, %v1893_v37, -inf }
 0x3c8   : > { %2038 = vmax.xlane.f32.xlu0 %v2037_v39  ;;  %v1896_v40 = vpop.f32.mrb[6].mxu1  ;;  %v1939_v41 = vpop.f32.mrb[8].mxu0 }
 0x3c9   : > { %v4712_v42 = vpop.f32.mrb[7].mxu1  ;;  %v4717_v43 = vpop.f32.mrb[9].mxu0  ;;  %v2040_v44 = vsel %vm1852_vm2, %v1939_v41, -inf }
 0x3ca   : > { %2041 = vmax.xlane.f32.xlu1 %v2040_v44  ;;  %v1942_v46 = vpop.f32.mrb[10].mxu0 }
 0x3cb   : > { %v4718_v47 = vpop.f32.mrb[11].mxu0 }
 0x3ce   : > { %v1985_v48 = vpop.f32.mrb[8].mxu1 }
 0x3cf   : > { %v4723_v49 = vpop.f32.mrb[9].mxu1  ;;  %v2043_v50 = vsel %vm1852_vm2, %v1985_v48, -inf }
 0x3d0   : > { %2044 = vmax.xlane.f32.xlu0 %v2043_v50  ;;  %v1988_v51 = vpop.f32.mrb[10].mxu1  ;;  %v2031_v52 = vpop.f32.mrb[12].mxu0 }
 0x3d1   : > { %v4724_v53 = vpop.f32.mrb[11].mxu1  ;;  %v4729_v54 = vpop.f32.mrb[13].mxu0  ;;  %v2046_v58 = vsel %vm1852_vm2, %v2031_v52, -inf }
 0x3d2   : > { %v2034_v56 = vpop.f32.mrb[14].mxu0 }
 0x3d3   : > { %v4730_v57 = vpop.f32.mrb[15].mxu0 }
 0x3d4   : > { %2047 = vmax.xlane.f32.xlu0 %v2046_v58 }
 0x3db   : > { %1685 = vrot.lane.b32.xlu1 %v1683_v60, %s5624_s21 }
 0x455   : > { %v2039_v61 = vpop.xlane.xlu0 %2038 }
 0x456   : > { %v2049_v62 = vsub.f32 %v1893_v37, %v2039_v61 }
 0x457   : > { %v2042_v63 = vpop.xlane.xlu1 %2041 }
 0x458   : > { %v2053_v1 = vmul.f32 1.442695, %v2049_v62  ;;  %v2050_v2 = vsub.f32 %v1939_v41, %v2042_v63 }
 0x45a   : > { %5090 = vpow2.f32 %v2053_v1  ;;  %v2055_v3 = vmul.f32 1.442695, %v2050_v2 }
 0x45b   : > { %v1686_v19 = vpop.permute.xlu1 %1685 }
 0x45c   : > { %5092 = vpow2.f32 %v2055_v3  ;;  %v1731_v23 = vrot.slane %v1686_v19, %v6127_v31 }
 0x45d   : > { %v2045_v9 = vpop.xlane.xlu0 %2044 }
 0x45e   : > { %v2051_v11 = vsub.f32 %v1985_v48, %v2045_v9 }
 0x460   : > { %v2057_v13 = vmul.f32 1.442695, %v2051_v11 }
 0x461   : > { %v2048_v10 = vpop.xlane.xlu0 %2047 }
 0x462   : > { %v2052_v12 = vsub.f32 %v2031_v52, %v2048_v10  ;;  %5094 = vpow2.f32 %v2057_v13 }
 0x464   : > { %v6196_v4 = vpop.eup %5090  ;;  %v2059_v14 = vmul.f32 1.442695, %v2052_v12 }
 0x465   : > { %v2061_v5 = vsel %vm1852_vm2, %v6196_v4, 0.0 }
 0x466   : > { %v6200_v7 = vpop.eup %5092  ;;  %2062 = vadd.xlane.f32.xlu1 %v2061_v5  ;;  %5096 = vpow2.f32 %v2059_v14 }
 0x467   : > { %v2064_v8 = vsel %vm1852_vm2, %v6200_v7, 0.0 }
 0x468   : > { %2065 = vadd.xlane.f32.xlu0 %v2064_v8 }
 0x46c   : > { %v6206_v15 = vpop.eup %5094 }
 0x46d   : > { %v2067_v17 = vsel %vm1852_vm2, %v6206_v15, 0.0 }
 0x470   : > { %v6208_v16 = vpop.eup %5096 }
 0x471   : > { %v2070_v18 = vsel %vm1852_vm2, %v6208_v16, 0.0 }
 0x477   : > { %1689 = vrot.lane.b32.xlu1 %v1683_v60, %s5623_s26 }
 0x47e   : > { %1687 = vrot.lane.b32.xlu0 %v1683_v60, %s5625_s13 }
 0x49b   : > { %2068 = vadd.xlane.f32.xlu1 %v2067_v17 }
 0x49d   : > { %2071 = vadd.xlane.f32.xlu0 %v2070_v18 }
 0x4f3   : > { %v2063_v20 = vpop.xlane.xlu1 %2062 }
 0x4f4   : > { %5098 = vrcp.f32 %v2063_v20 }
 0x4f5   : > { %v2066_v21 = vpop.xlane.xlu0 %2065 }
 0x4f6   : > { %5100 = vrcp.f32 %v2066_v21 }
 0x4f7   : > { %v1690_v22 = vpop.permute.xlu1 %1689 }
 0x4f8   : > { %v1739_v24 = vrot.slane %v1690_v22, %v6127_v31 }
 0x4f9   : > { %v1688_v25 = vpop.permute.xlu0 %1687 }
 0x4fa   : > { %v1740_v26 = vcombine.low %v1731_v23, %v1739_v24  ;;  %v1741_v27 = vcombine.high %v1731_v23, %v1739_v24  ;;  %v1705_v29 = vrot.slane %v1688_v25, %v6127_v31 }
 0x4fc   : > { %v1748_v30 = vrot.slane %v1740_v26, %v6130_v35  ;;  %v1755_v32 = vrot.slane %v1741_v27, %v6130_v35  ;;  %v1706_v33 = vcombine.low %v1697_v28, %v1705_v29  ;;  %v1707_v34 = vcombine.high %v1697_v28, %v1705_v29 }
 0x4fe   : > { %v1756_v36 = vcombine.high %v1748_v30, %v5628_v45  ;;  %v1714_v37 = vrot.slane %v1706_v33, %v6130_v35  ;;  %v1721_v38 = vrot.slane %v1707_v34, %v6130_v35  ;;  %v1757_v39 = vcombine.high %v1755_v32, %v5628_v45  ;;  %v5099_v2 = vpop.eup %5098 }
 0x4ff   : > { %v1763_v40 = vshrl.u32 %v1748_v30, 16  ;;  %v1779_v41 = vshrl.u32 %v1755_v32, 16  ;;  %v2081_v14 = vmul.f32 %v5099_v2, %v6196_v4 }
 0x500   : > { %v1722_v42 = vcombine.high %v1714_v37, %v5628_v45  ;;  %v1723_v43 = vcombine.high %v1721_v38, %v5628_v45  ;;  %v1760_v44 = vpack.i.b16 %v1748_v30, %v1714_v37  ;;  %v1762_v46 = vshrl.u32 %v1714_v37, 16  ;;  %v5101_v5 = vpop.eup %5100 }
 0x501   : > { %v1776_v47 = vpack.i.b16 %v1755_v32, %v1721_v38  ;;  %v1778_v48 = vshrl.u32 %v1721_v38, 16  ;;  %v1771_v49 = vshrl.u32 %v1756_v36, 16  ;;  %v1787_v53 = vshrl.u32 %v1757_v39, 16 }
 0x502   : > { %v1768_v50 = vpack.i.b16 %v1756_v36, %v1722_v42  ;;  %v1770_v51 = vshrl.u32 %v1722_v42, 16  ;;  %v1784_v52 = vpack.i.b16 %v1757_v39, %v1723_v43  ;;  %v1764_v54 = vpack.i.b16 %v1763_v40, %v1762_v46 }
 0x503   : > { %v1780_v55 = vpack.i.b16 %v1779_v41, %v1778_v48  ;;  %v1786_v56 = vshrl.u32 %v1723_v43, 16  ;;  %v1790_v58 = vcombine.low %v1760_v44, %v1776_v47  ;;  %v2082_v21 = vmul.f32 %v5101_v5, %v6200_v7 }
 0x504   : > { %v1772_v57 = vpack.i.b16 %v1771_v49, %v1770_v51  ;;  %v1798_v59 = vcombine.low %v1768_v50, %v1784_v52  ;;  %v2085_v28 = vpack.c.bf16 %v2081_v14, %v2081_v14  ;;  %v2274_v37 = vsel %vm1852_vm2, %v2081_v14, 0.0 }
 0x505   : > { %v1788_v60 = vpack.i.b16 %v1787_v53, %v1786_v56  ;;  %v1815_v61 = vcombine.low %v1764_v54, %v1780_v55  ;;  %v1797_v62 = vrot.slane %v1790_v58, %v6127_v31  ;;  %v2086_v30 = vpack.c.bf16 %v2082_v21, %v2082_v21 }
 0x506   : > { %v1805_v63 = vrot.slane %v1798_v59, %v6127_v31  ;;  %v2275_v34 = vsel %vm1852_vm2, %v2082_v21, 0.0 }
 0x507   : > { %v1823_v1 = vcombine.low %v1772_v57, %v1788_v60  ;;  %v1822_v8 = vrot.slane %v1815_v61, %v6127_v31  ;;  %v2276_v40 = vadd.f32 %v2275_v34, %v2274_v37 }
 0x508   : > { %v1806_v3 = vcombine.low %v1797_v62, %v1805_v63 }
 0x509   : > { %v1830_v9 = vrot.slane %v1823_v1, %v6127_v31 }
 0x50a   : > { %v1813_v10 = vrot.slane %v1806_v3, %v6130_v35 }
 0x50b   : > { %v1831_v11 = vcombine.low %v1822_v8, %v1830_v9 }
 0x50c   : > { %v1814_v12 = vcombine.high %v1813_v10, %v5628_v45  ;;  %v1843_v18 = vshrl.u32 %v1813_v10, 16 }
 0x50d   : > { %v1838_v13 = vrot.slane %v1831_v11, %v6130_v35 }
 0x50e   : > { %v1849_v22 = vshrl.u32 %v1814_v12, 16 }
 0x50f   : > { %v1842_v17 = vpack.i.b16 %v1838_v13, %v1813_v10  ;;  %v1844_v19 = vshrl.u32 %v1838_v13, 16  ;;  %v1839_v20 = vcombine.high %v1838_v13, %v5628_v45 }
 0x511   : > { %v2094_v23 = vsel %vm2092_vm3, %v1842_v17, 0  ;;  %v1845_v24 = vpack.i.b16 %v1844_v19, %v1843_v18  ;;  %v1848_v25 = vpack.i.b16 %v1839_v20, %v1814_v12  ;;  %v1850_v26 = vshrl.u32 %v1839_v20, 16  ;;  %v5073_v18 = vld [vmem:[%s6691_s6] sm:$0xff]  }
 0x512   : > { %4732 = vmatpush3.bf16.msra.mxu1 %v2094_v23 }
 0x513   : > { %v2140_v27 = vsel %vm2092_vm3, %v1845_v24, 0  ;;  %4743 = vmatprep.subr.bf16.mxu1 %v5621_v0  ;;  %v1851_v4 = vpack.i.b16 %v1850_v26, %v1849_v22  ;;  %v2186_v29 = vsel %vm2092_vm3, %v1848_v25, 0 }
 0x514   : > { %4738 = vmatpush3.bf16.msra.mxu0 %v2140_v27 }
 0x515   : > { %4734 = vmatmul.mubr.msk.bf16.vlgmr.msra.gmra.mrb[12].mxu1 %vm1852_vm2, %v2085_v28  ;;  %4749 = vmatprep.subr.bf16.mxu0 %v5621_v0  ;;  %v2232_v7 = vsel %vm2092_vm3, %v1851_v4, 0 }
 0x516   : > { %4744 = vmatpush3.bf16.msra.mxu1 %v2186_v29  ;;  %4745 = vmatprep.mubr.msk.bf16.mxu1 %vm5622_vm0, %v5621_v0 }
 0x517   : > { %4740 = vmatmul.mubr.msk.bf16.vlgmr.msra.gmra.mrb[16].mxu0 %vm1852_vm2, %v2086_v30  ;;  %4755 = vmatprep.subr.bf16.mxu1 %v5621_v0  ;;  %v5074_v30 = vld [vmem:[%s6691_s6 + $0x8] sm:$0xff]  }
 0x518   : > { %4750 = vmatpush3.bf16.msra.mxu0 %v2232_v7  ;;  %4751 = vmatprep.mubr.msk.bf16.mxu0 %vm5622_vm0, %v5621_v0 }
 0x519   : > { %4763 = vmatprep.subr.bf16.mxu0 %v5621_v0 }
 0x528   : > { %v2069_v32 = vpop.xlane.xlu1 %2068 }
 0x529   : > { %5102 = vrcp.f32 %v2069_v32 }
 0x52a   : > { %v2072_v33 = vpop.xlane.xlu0 %2071 }
 0x52b   : > { %5104 = vrcp.f32 %v2072_v33 }
 0x533   : > { %v5103_v36 = vpop.eup %5102 }
 0x534   : > { %v2083_v38 = vmul.f32 %v5103_v36, %v6206_v15 }
 0x535   : > { %v5105_v39 = vpop.eup %5104 }
 0x536   : > { %v2277_v41 = vsel %vm1852_vm2, %v2083_v38, 0.0  ;;  %v2084_v42 = vmul.f32 %v5105_v39, %v6208_v16  ;;  %v2087_v43 = vpack.c.bf16 %v2083_v38, %v2083_v38 }
 0x537   : > { %v2278_v44 = vadd.f32 %v2277_v41, %v2276_v40 }
 0x538   : > { %v2279_v46 = vsel %vm1852_vm2, %v2084_v42, 0.0  ;;  %4746 = vmatmul.mubr.msk.bf16.vlgmr.msra.gmra.mrb[16].mxu1 %vm1852_vm2, %v2087_v43  ;;  %v2088_v47 = vpack.c.bf16 %v2084_v42, %v2084_v42 }
 0x539   : > { %4759 = vmatprep.mubr.msk.bf16.mxu1 %vm5622_vm0, %v5621_v0  ;;  %v2280_v48 = vadd.f32 %v2279_v46, %v2278_v44  ;;  %4756 = vmatpush3.bf16.msra.mxu1 %v5073_v18 }
 0x53a   : > { %4752 = vmatmul.mubr.msk.bf16.vlgmr.msra.gmra.mrb[20].mxu0 %vm1852_vm2, %v2088_v47  ;;  %4757 = vmatprep.subr.bf16.mxu1 %v5621_v0 }
 0x53b   : > { %4767 = vmatprep.mubr.msk.bf16.mxu0 %vm5622_vm0, %v5621_v0  ;;  %v2281_v15 = vmul.f32 0.25, %v2280_v48 }
 0x53d   : > { %4208 = vst.msk [vmem:[%s6263_s27] sm:$0xff] %vm1852_vm2, %v2281_v15  ;;  %4758 = vmatpush3.bf16.msra.mxu1 %v5074_v30 }
 0x53e   : > { %4771 = vmatprep.subr.bf16.mxu1 %v5621_v0 }
 0x5e8   : > { %v2130_v16 = vpop.f32.mrb[12].mxu1 }
 0x5e9   : > { %v4735_v49 = vpop.f32.mrb[13].mxu1 }
 0x5ea   : > { %v2133_v50 = vpop.f32.mrb[14].mxu1  ;;  %v2176_v51 = vpop.f32.mrb[16].mxu0 }
 0x5eb   : > { %v4736_v52 = vpop.f32.mrb[15].mxu1  ;;  %v4741_v53 = vpop.f32.mrb[17].mxu0  ;;  %v4561_v50 = vld [vmem:[#allocation11] ss:$0 sm:$0xff] }
 0x5ec   : > { %v2179_v54 = vpop.f32.mrb[18].mxu0 }
 0x5ed   : > { %v4742_v55 = vpop.f32.mrb[19].mxu0 }
 0x60b   : > { %v2222_v56 = vpop.f32.mrb[16].mxu1 }
 0x60c   : > { %v2282_v57 = vcombine.low %v2130_v16, %v2222_v56  ;;  %v2283_v58 = vcombine.high %v2130_v16, %v2222_v56  ;;  %v4747_v59 = vpop.f32.mrb[17].mxu1 }
 0x60d   : > { %v2225_v60 = vpop.f32.mrb[18].mxu1  ;;  %v2268_v61 = vpop.f32.mrb[20].mxu0  ;;  %v5075_v59 = vld [vmem:[%s6692_s7] sm:$0xff]  }
 0x60e   : > { %v2298_v62 = vcombine.low %v2176_v51, %v2268_v61  ;;  %v2299_v63 = vcombine.high %v2176_v51, %v2268_v61  ;;  %v4748_v1 = vpop.f32.mrb[19].mxu1  ;;  %v4753_v2 = vpop.f32.mrb[21].mxu0  ;;  %v2290_v5 = vrot.slane %v2282_v57, %v6127_v31  ;;  %v2297_v8 = vrot.slane %v2283_v58, %v6127_v31  ;;  %v5076_v60 = vld [vmem:[%s6692_s7 + $0x8] sm:$0xff]  }
 0x60f   : > { %v2271_v3 = vpop.f32.mrb[22].mxu0  ;;  %v1148_v51 = vunpack.c.l.bf16 %v6103_v6 }
 0x610   : > { %v2306_v9 = vrot.slane %v2298_v62, %v6127_v31  ;;  %v2313_v10 = vrot.slane %v2299_v63, %v6127_v31  ;;  %v4754_v11 = vpop.f32.mrb[23].mxu0  ;;  %v5078_v3 = vld [vmem:[%s6694_s12] sm:$0xff]  }
 0x611   : > { %4764 = vmatpush3.bf16.msra.mxu0 %v5078_v3 }
 0x612   : > { %v2314_v12 = vcombine.low %v2290_v5, %v2306_v9  ;;  %v2315_v13 = vcombine.high %v2290_v5, %v2306_v9  ;;  %v2330_v14 = vcombine.low %v2297_v8, %v2313_v10  ;;  %v2331_v17 = vcombine.high %v2297_v8, %v2313_v10  ;;  %v5079_v5 = vld [vmem:[%s6694_s12 + $0x8] sm:$0xff]   ;;  %4765 = vmatprep.subr.bf16.mxu0 %v5621_v0  ;;  %v4571_v8 = vld [vmem:[#allocation17] ss:$0 sm:$0xff] }
 0x614   : > { %v2322_v19 = vrot.slane %v2314_v12, %v6130_v35  ;;  %v2329_v20 = vrot.slane %v2315_v13, %v6130_v35  ;;  %v2338_v21 = vrot.slane %v2330_v14, %v6130_v35  ;;  %v2345_v22 = vrot.slane %v2331_v17, %v6130_v35 }
 0x615   : > { %4766 = vmatpush3.bf16.msra.mxu0 %v5079_v5 }
 0x616   : > { %v2350_v23 = vcombine.low %v2322_v19, %v2329_v20  ;;  %v4559_v24 = vcombine.high %v2322_v19, %v2329_v20  ;;  %v2366_v25 = vcombine.low %v2338_v21, %v2345_v22  ;;  %v4560_v26 = vcombine.high %v2338_v21, %v2345_v22  ;;  %4779 = vmatprep.subr.bf16.mxu0 %v5621_v0  ;;  %v4565_v22 = vld [vmem:[#allocation13] ss:$0 sm:$0xff] }
 0x618   : > { %v2357_v27 = vrot.slane %v2350_v23, %v6127_v31  ;;  %v2365_v28 = vrot.slane %v4559_v24, %v6127_v31  ;;  %v2373_v4 = vrot.slane %v2366_v25, %v6127_v31  ;;  %v2381_v29 = vrot.slane %v4560_v26, %v6127_v31  ;;  %v4566_v24 = vld [vmem:[#allocation14] ss:$0 sm:$0xff] }
 0x61a   : > { %v2383_v7 = vcombine.high %v2357_v27, %v2365_v28  ;;  %v2399_v32 = vcombine.high %v2373_v4, %v2381_v29  ;;  %v2382_v33 = vcombine.low %v2357_v27, %v2365_v28  ;;  %v2398_v34 = vcombine.low %v2373_v4, %v2381_v29 }
 0x61c   : > { %v2397_v36 = vrot.slane %v2383_v7, %v6130_v35  ;;  %v2413_v37 = vrot.slane %v2399_v32, %v6130_v35  ;;  %v2390_v38 = vrot.slane %v2382_v33, %v6130_v35  ;;  %v2406_v39 = vrot.slane %v2398_v34, %v6130_v35 }
 0x61e   : > { %v2416_v40 = vcombine.low %v2397_v36, %v2413_v37  ;;  %v2415_v41 = vcombine.high %v2390_v38, %v2406_v39  ;;  %v2417_v42 = vcombine.high %v2397_v36, %v2413_v37  ;;  %v2414_v43 = vcombine.low %v2390_v38, %v2406_v39 }
 0x620   : > { %2423 = vrot.lane.b32.xlu1 %v2416_v40, %s5629_s4  ;;  %2419 = vrot.lane.b32.xlu0 %v2415_v41, %s5630_s10 }
 0x624   : > { %2427 = vrot.lane.b32.xlu1 %v2417_v42, %s6626_s11  ;;  %s1144_s11 = scalar_lea.vmem %s6693_s19, %s4618_s8  ;;  %s6701_s19 = sld [smem:[#allocation50_spill]] }
 0x625   : > { %v6304_v6 = vld [vmem:[%s1144_s11] sm:$0x3f]   ;;  %s6695_s11 = sld [smem:[#allocation46_spill]]  ;;  %s6703_s8 = sld [smem:[#allocation53_spill]] }
 0x62b   : > { %v5080_v27 = vld [vmem:[%s6695_s11] sm:$0xff]  }
 0x692   : > { %v2424_v44 = vpop.permute.xlu1 %2423  ;;  %v2420_v46 = vpop.permute.xlu0 %2419 }
 0x693   : > { %v2430_v47 = vsel %vm1852_vm2, %v2414_v43, %v2420_v46 }
 0x694   : > { %v2432_v15 = vsel %vm2431_vm4, %v2430_v47, %v2424_v44 }
 0x696   : > { %v2428_v48 = vpop.permute.xlu1 %2427 }
 0x697   : > { %v2434_v16 = vsel %vm2433_vm5, %v2432_v15, %v2428_v48 }
 0x698   : > { %v2435_v49 = vpack.c.bf16 %v2434_v16, %v2434_v16 }
 0x69a   : > { %4760 = vmatmul.mubr.msk.bf16.vlgmr.msra.gmra.mrb[20].mxu1 %vm1172_vm1, %v2435_v49 }
 0x69b   : > { %4775 = vmatprep.mubr.msk.bf16.mxu1 %vm5622_vm0, %v5621_v0  ;;  %4772 = vmatpush3.bf16.msra.mxu1 %v5075_v59 }
 0x69c   : > { %4773 = vmatprep.subr.bf16.mxu1 %v5621_v0 }
 0x69f   : > { %4774 = vmatpush3.bf16.msra.mxu1 %v5076_v60 }
 0x6a0   : > { %4787 = vmatprep.subr.bf16.mxu1 %v5621_v0 }
 0x6a2   : > { %4776 = vmatmul.mubr.msk.bf16.vlgmr.msra.gmra.mrb[24].mxu1 %vm1172_vm1, %v6304_v6 }
 0x6a3   : > { %4789 = vmatprep.mubr.msk.bf16.mxu1 %vm5622_vm0, %v5621_v0 }
 0x76d   : > { %v2496_v52 = vpop.f32.mrb[20].mxu1 }
 0x76e   : > { %v2497_v53 = vadd.f32 %v4561_v50, %v2496_v52  ;;  %v4761_v54 = vpop.f32.mrb[21].mxu1 }
 0x76f   : > { %v2499_v55 = vpop.f32.mrb[22].mxu1 }
 0x770   : > { %v4762_v56 = vpop.f32.mrb[23].mxu1  ;;  %v2502_v57 = vadd.f32 %v2497_v53, %v1148_v51 }
 0x772   : > { %v2505_v58 = vsel %vm1172_vm1, %v2502_v57, 0.0 }
 0x773   : > { %2506 = vadd.xlane.f32.xlu0 %v2505_v58 }
 0x775   : > { %v2667_v9 = vpop.f32.mrb[24].mxu1 }
 0x776   : > { %v2668_v10 = vadd.f32 %v4571_v8, %v2667_v9  ;;  %v4777_v11 = vpop.f32.mrb[25].mxu1 }
 0x777   : > { %v2670_v12 = vpop.f32.mrb[26].mxu1 }
 0x778   : > { %v2671_v13 = vadd.f32 %v4571_v8, %v2670_v12  ;;  %v4778_v14 = vpop.f32.mrb[27].mxu1 }
 0x77a   : > { %v2907_v17 = vpack.c.bf16 %v2671_v13, %v2668_v10 }
 0x77c   : > { %v2924_v7 = vrot.slane %v2907_v17, %v6127_v31 }
 0x789   : > { %2909 = vrot.lane.b32.xlu0 %v2907_v17, %s5624_s21 }
 0x78d   : > { %2915 = vrot.lane.b32.xlu0 %v2907_v17, %s5623_s26 }
 0x800   : > { %v2507_v61 = vpop.xlane.xlu0 %2506 }
 0x801   : > { %v2509_v62 = vmul.f32 0.03125, %v2507_v61 }
 0x803   : > { %v2510_v63 = vsub.f32 %v2502_v57, %v2509_v62 }
 0x804   : > { %v2910_v4 = vpop.permute.xlu0 %2909 }
 0x805   : > { %v2511_v1 = vmul.f32 %v2510_v63, %v2510_v63  ;;  %v2967_v33 = vrot.slane %v2910_v4, %v6127_v31 }
 0x807   : > { %v2512_v2 = vsel %vm1172_vm1, %v2511_v1, 0.0 }
 0x808   : > { %2513 = vadd.xlane.f32.xlu1 %v2512_v2  ;;  %v2916_v30 = vpop.permute.xlu0 %2915 }
 0x809   : > { %v2975_v34 = vrot.slane %v2916_v30, %v6127_v31  ;;  %v4581_v46 = vcombine.high %v2910_v4, %v2916_v30  ;;  %v5081_v4 = vld [vmem:[%s6695_s11 + $0x8] sm:$0xff]  }
 0x80b   : > { %v2977_v38 = vcombine.low %v2967_v33, %v2975_v34  ;;  %v2978_v39 = vcombine.high %v2967_v33, %v2975_v34  ;;  %v3000_v16 = vrot.slane %v4581_v46, %v6130_v35 }
 0x80d   : > { %v2985_v43 = vrot.slane %v2977_v38, %v6130_v35  ;;  %v2992_v44 = vrot.slane %v2978_v39, %v6130_v35  ;;  %v3003_v58 = vcombine.high %v3000_v16, %v5628_v45  ;;  %v3040_v11 = vshrl.u32 %v3000_v16, 16 }
 0x80f   : > { %v3001_v49 = vcombine.high %v2985_v43, %v5628_v45  ;;  %v3002_v50 = vcombine.high %v2992_v44, %v5628_v45  ;;  %v3009_v53 = vshrl.u32 %v2985_v43, 16  ;;  %v3025_v54 = vshrl.u32 %v2992_v44, 16 }
 0x810   : > { %v3046_v12 = vshrl.u32 %v3003_v58, 16 }
 0x811   : > { %v3017_v59 = vshrl.u32 %v3001_v49, 16  ;;  %v3033_v60 = vshrl.u32 %v3002_v50, 16 }
 0x819   : > { %2912 = vrot.lane.b32.xlu1 %v2907_v17, %s5625_s13 }
 0x895   : > { %v2514_v18 = vpop.xlane.xlu1 %2513 }
 0x896   : > { %v2515_v19 = vmul.f32 0.03125, %v2514_v18 }
 0x898   : > { %v2516_v20 = vadd.f32 1e-05, %v2515_v19 }
 0x899   : > { %v2913_v29 = vpop.permute.xlu1 %2912 }
 0x89a   : > { %5106 = vrsqrt.f32 %v2516_v20  ;;  %v2932_v32 = vrot.slane %v2913_v29, %v6127_v31  ;;  %v4580_v41 = vcombine.high %v2907_v17, %v2913_v29 }
 0x89c   : > { %v2934_v36 = vcombine.low %v2924_v7, %v2932_v32  ;;  %v2935_v37 = vcombine.high %v2924_v7, %v2932_v32  ;;  %v2957_v47 = vrot.slane %v4580_v41, %v6130_v35 }
 0x89e   : > { %v2942_v40 = vrot.slane %v2934_v36, %v6130_v35  ;;  %v2949_v42 = vrot.slane %v2935_v37, %v6130_v35  ;;  %v2960_v55 = vcombine.high %v2957_v47, %v5628_v45  ;;  %v3039_v5 = vshrl.u32 %v2957_v47, 16 }
 0x89f   : > { %v3038_v13 = vpack.i.b16 %v3000_v16, %v2957_v47 }
 0x8a0   : > { %v2958_v48 = vcombine.high %v2942_v40, %v5628_v45  ;;  %v2959_v15 = vcombine.high %v2949_v42, %v5628_v45  ;;  %v3008_v51 = vshrl.u32 %v2942_v40, 16  ;;  %v3024_v52 = vshrl.u32 %v2949_v42, 16 }
 0x8a1   : > { %v3006_v61 = vpack.i.b16 %v2985_v43, %v2942_v40  ;;  %v3022_v62 = vpack.i.b16 %v2992_v44, %v2949_v42  ;;  %v3045_v8 = vshrl.u32 %v2960_v55, 16  ;;  %v3044_v14 = vpack.i.b16 %v3003_v58, %v2960_v55 }
 0x8a2   : > { %v3016_v56 = vshrl.u32 %v2958_v48, 16  ;;  %v3032_v57 = vshrl.u32 %v2959_v15, 16  ;;  %v3014_v1 = vpack.i.b16 %v3001_v49, %v2958_v48  ;;  %v3026_v2 = vpack.i.b16 %v3025_v54, %v3024_v52  ;;  %v4567_v49 = vld [vmem:[#allocation16] ss:$0 sm:$0xff] }
 0x8a3   : > { %v3030_v3 = vpack.i.b16 %v3002_v50, %v2959_v15  ;;  %v3048_v17 = vcombine.low %v3006_v61, %v3022_v62  ;;  %v3041_v20 = vpack.i.b16 %v3040_v11, %v3039_v5 }
 0x8a4   : > { %v5107_v21 = vpop.eup %5106  ;;  %v3018_v9 = vpack.i.b16 %v3017_v59, %v3016_v56  ;;  %v3034_v10 = vpack.i.b16 %v3033_v60, %v3032_v57  ;;  %v4576_v56 = vld [vmem:[#allocation19] ss:$0 sm:$0xff] }
 0x8a5   : > { %v2518_v23 = vmul.f32 %v5107_v21, %v2510_v63  ;;  %v3010_v63 = vpack.i.b16 %v3009_v53, %v3008_v51  ;;  %v3056_v18 = vcombine.low %v3014_v1, %v3030_v3  ;;  %v3047_v21 = vpack.i.b16 %v3046_v12, %v3045_v8 }
 0x8a7   : > { %v2525_v25 = vmul.f32 %v4565_v22, %v2518_v23  ;;  %v3084_v19 = vcombine.low %v3010_v63, %v3026_v2  ;;  %v3092_v22 = vcombine.low %v3018_v9, %v3034_v10  ;;  %v3074_v23 = vcombine.low %v3038_v13, %v3044_v14 }
 0x8a8   : > { %v3110_v7 = vcombine.low %v3041_v20, %v3047_v21 }
 0x8a9   : > { %v6319_v26 = vadd.f32 %v4566_v24, %v2525_v25  ;;  %v3055_v24 = vrot.slane %v3048_v17, %v6127_v31  ;;  %v3063_v25 = vrot.slane %v3056_v18, %v6127_v31  ;;  %v3081_v33 = vrot.slane %v3074_v23, %v6130_v35 }
 0x8aa   : > { %v3117_v36 = vrot.slane %v3110_v7, %v6130_v35 }
 0x8ab   : > { %v2535_v28 = vpack.c.bf16 %v6319_v26, %v6319_v26  ;;  %v3066_v29 = vcombine.low %v3055_v24, %v3063_v25 }
 0x8ad   : > { %4768 = vmatmul.mubr.msk.bf16.vlgmr.msra.gmra.mrb[24].mxu0 %vm1172_vm1, %v2535_v28  ;;  %v3099_v28 = vrot.slane %v3092_v22, %v6127_v31  ;;  %v3073_v32 = vrot.slane %v3066_v29, %v6130_v35 }
 0x8ae   : > { %4780 = vmatpush3.bf16.msra.mxu0 %v5080_v27  ;;  %4783 = vmatprep.mubr.msk.bf16.mxu0 %vm5622_vm0, %v5621_v0  ;;  %v3091_v27 = vrot.slane %v3084_v19, %v6127_v31 }
 0x8af   : > { %4781 = vmatprep.subr.bf16.mxu0 %v5621_v0  ;;  %v3082_v37 = vcombine.low %v3073_v32, %v3081_v33  ;;  %v6354_v39 = vcombine.high %v3073_v32, %v3081_v33 }
 0x8b0   : > { %v3102_v30 = vcombine.low %v3091_v27, %v3099_v28 }
 0x8b1   : > { %v3123_v42 = vshrl.u32 %v3082_v37, 16  ;;  %v3129_v46 = vshrl.u32 %v6354_v39, 16 }
 0x8b2   : > { %4782 = vmatpush3.bf16.msra.mxu0 %v5081_v4  ;;  %v3109_v34 = vrot.slane %v3102_v30, %v6130_v35 }
 0x8b3   : > { %4793 = vmatprep.subr.bf16.mxu0 %v5621_v0 }
 0x8b4   : > { %v3118_v38 = vcombine.low %v3109_v34, %v3117_v36  ;;  %v6356_v40 = vcombine.high %v3109_v34, %v3117_v36 }
 0x8b5   : > { %4784 = vmatmul.mubr.msk.bf16.vlgmr.msra.gmra.mrb[28].mxu0 %vm1172_vm1, %v6304_v6 }
 0x8b6   : > { %v3122_v41 = vpack.i.b16 %v3118_v38, %v3082_v37  ;;  %v3124_v43 = vshrl.u32 %v3118_v38, 16  ;;  %v3128_v44 = vpack.i.b16 %v6356_v40, %v6354_v39  ;;  %4795 = vmatprep.mubr.msk.bf16.mxu0 %vm5622_vm0, %v5621_v0  ;;  %v3130_v47 = vshrl.u32 %v6356_v40, 16 }
 0x8b8   : > { %v3361_v48 = vsel %vm1852_vm2, %v3122_v41, 0  ;;  %v3125_v15 = vpack.i.b16 %v3124_v43, %v3123_v42  ;;  %v6367_v16 = vpack.i.b16 %v3130_v47, %v3129_v46 }
 0x8b9   : > { %4788 = vmatpush3.bf16.xpose.msra.mxu1 %v3361_v48 }
 0x8ba   : > { %v3407_v6 = vsel %vm1852_vm2, %v3125_v15, 0  ;;  %4799 = vmatprep.subr.bf16.mxu1 %v5621_v0 }
 0x8bb   : > { %4794 = vmatpush3.bf16.xpose.msra.mxu0 %v3407_v6 }
 0x8bc   : > { %4805 = vmatprep.subr.bf16.mxu0 %v5621_v0 }
 0x980   : > { %v2596_v50 = vpop.f32.mrb[24].mxu0 }
 0x981   : > { %v2597_v51 = vadd.f32 %v4567_v49, %v2596_v50  ;;  %v4769_v52 = vpop.f32.mrb[25].mxu0 }
 0x982   : > { %v2599_v53 = vpop.f32.mrb[26].mxu0 }
 0x983   : > { %v2738_v54 = vpack.c.bf16 %v2597_v51, %v2597_v51  ;;  %v4770_v55 = vpop.f32.mrb[27].mxu0 }
 0x985   : > { %2742 = vrot.lane.b32.xlu0 %v2738_v54, %s5625_s13  ;;  %2740 = vrot.lane.b32.xlu1 %v2738_v54, %s5624_s21  ;;  %v2752_v3 = vrot.slane %v2738_v54, %v6127_v31 }
 0x988   : > { %v2731_v57 = vpop.f32.mrb[28].mxu0 }
 0x989   : > { %2744 = vrot.lane.b32.xlu1 %v2738_v54, %s5623_s26  ;;  %v2732_v58 = vadd.f32 %v4576_v56, %v2731_v57  ;;  %v4785_v59 = vpop.f32.mrb[29].mxu0 }
 0x98a   : > { %v2734_v60 = vpop.f32.mrb[30].mxu0  ;;  %v3453_v59 = vsel %vm1852_vm2, %v3128_v44, 0 }
 0x98b   : > { %v2735_v61 = vadd.f32 %v4576_v56, %v2734_v60  ;;  %v4786_v62 = vpop.f32.mrb[31].mxu0 }
 0x98c   : > { %v3499_v62 = vsel %vm1852_vm2, %v6367_v16, 0 }
 0x98d   : > { %v6375_v63 = vpack.c.bf16 %v2735_v61, %v2732_v58 }
 0x98f   : > { %3134 = vrot.lane.b32.xlu0 %v6375_v63, %s5624_s21  ;;  %s6697_s21 = sld [smem:[#allocation49_spill]] }
 0x9f7   : > { %v2741_v1 = vpop.permute.xlu1 %2740  ;;  %v2743_v2 = vpop.permute.xlu0 %2742 }
 0x9f8   : > { %v2760_v5 = vrot.slane %v2743_v2, %v6127_v31  ;;  %v2786_v13 = vrot.slane %v2741_v1, %v6127_v31 }
 0x9fa   : > { %v2761_v8 = vcombine.low %v2752_v3, %v2760_v5  ;;  %v2762_v9 = vcombine.high %v2752_v3, %v2760_v5 }
 0x9fb   : > { %v2745_v10 = vpop.permute.xlu1 %2744 }
 0x9fc   : > { %v2769_v11 = vrot.slane %v2761_v8, %v6130_v35  ;;  %v2794_v12 = vrot.slane %v2745_v10, %v6127_v31  ;;  %v2776_v14 = vrot.slane %v2762_v9, %v6130_v35 }
 0x9fe   : > { %v2795_v17 = vcombine.low %v2786_v13, %v2794_v12  ;;  %v2796_v18 = vcombine.high %v2786_v13, %v2794_v12  ;;  %v2777_v19 = vcombine.high %v2769_v11, %v5628_v45  ;;  %v2778_v22 = vcombine.high %v2776_v14, %v5628_v45 }
 0x9ff   : > { %v2817_v23 = vshrl.u32 %v2769_v11, 16  ;;  %v2833_v29 = vshrl.u32 %v2776_v14, 16 }
 0xa00   : > { %v2803_v20 = vrot.slane %v2795_v17, %v6130_v35  ;;  %v2810_v21 = vrot.slane %v2796_v18, %v6130_v35  ;;  %v2825_v4 = vshrl.u32 %v2777_v19, 16  ;;  %v2841_v37 = vshrl.u32 %v2778_v22, 16 }
 0xa02   : > { %v2811_v24 = vcombine.high %v2803_v20, %v5628_v45  ;;  %v2812_v25 = vcombine.high %v2810_v21, %v5628_v45  ;;  %v2815_v27 = vpack.i.b16 %v2803_v20, %v2769_v11  ;;  %v2818_v28 = vshrl.u32 %v2803_v20, 16 }
 0xa03   : > { %v2831_v30 = vpack.i.b16 %v2810_v21, %v2776_v14  ;;  %v2834_v7 = vshrl.u32 %v2810_v21, 16 }
 0xa04   : > { %v2819_v32 = vpack.i.b16 %v2818_v28, %v2817_v23  ;;  %v2823_v33 = vpack.i.b16 %v2811_v24, %v2777_v19  ;;  %v2826_v34 = vshrl.u32 %v2811_v24, 16  ;;  %v2839_v36 = vpack.i.b16 %v2812_v25, %v2778_v22  ;;  %v3135_v28 = vpop.permute.xlu0 %3134 }
 0xa05   : > { %v2835_v38 = vpack.i.b16 %v2834_v7, %v2833_v29  ;;  %v2842_v41 = vshrl.u32 %v2812_v25, 16  ;;  %v2845_v42 = vcombine.low %v2815_v27, %v2831_v30 }
 0xa06   : > { %v2827_v43 = vpack.i.b16 %v2826_v34, %v2825_v4  ;;  %v2853_v46 = vcombine.low %v2823_v33, %v2839_v36  ;;  %v3192_v33 = vrot.slane %v3135_v28, %v6127_v31 }
 0xa07   : > { %v2843_v47 = vpack.i.b16 %v2842_v41, %v2841_v37  ;;  %v2870_v48 = vcombine.low %v2819_v32, %v2835_v38  ;;  %v2852_v15 = vrot.slane %v2845_v42, %v6127_v31 }
 0xa08   : > { %v2860_v6 = vrot.slane %v2853_v46, %v6127_v31 }
 0xa09   : > { %v2878_v49 = vcombine.low %v2827_v43, %v2843_v47  ;;  %v2877_v51 = vrot.slane %v2870_v48, %v6127_v31  ;;  %v3149_v47 = vrot.slane %v6375_v63, %v6127_v31 }
 0xa0a   : > { %v2861_v50 = vcombine.low %v2852_v15, %v2860_v6 }
 0xa0b   : > { %v2885_v52 = vrot.slane %v2878_v49, %v6127_v31 }
 0xa0c   : > { %v2868_v54 = vrot.slane %v2861_v50, %v6130_v35 }
 0xa0d   : > { %v2886_v53 = vcombine.low %v2877_v51, %v2885_v52 }
 0xa0e   : > { %v2898_v57 = vshrl.u32 %v2868_v54, 16  ;;  %v2869_v1 = vcombine.high %v2868_v54, %v5628_v45 }
 0xa0f   : > { %v2893_v55 = vrot.slane %v2886_v53, %v6130_v35 }
 0xa10   : > { %v2904_v44 = vshrl.u32 %v2869_v1, 16 }
 0xa11   : > { %v2897_v56 = vpack.i.b16 %v2893_v55, %v2868_v54  ;;  %v2899_v58 = vshrl.u32 %v2893_v55, 16  ;;  %v2894_v61 = vcombine.high %v2893_v55, %v5628_v45 }
 0xa13   : > { %4790 = vmatmul.mubr.msk.bf16.vlgmr.msra.gmra.mrb[28].mxu1 %vm1852_vm2, %v2897_v56  ;;  %v2900_v60 = vpack.i.b16 %v2899_v58, %v2898_v57  ;;  %v2905_v39 = vshrl.u32 %v2894_v61, 16  ;;  %v2903_v40 = vpack.i.b16 %v2894_v61, %v2869_v1 }
 0xa14   : > { %4800 = vmatpush3.bf16.xpose.msra.mxu1 %v3453_v59  ;;  %4801 = vmatprep.mubr.msk.bf16.mxu1 %vm5622_vm0, %v5621_v0 }
 0xa15   : > { %4796 = vmatmul.mubr.msk.bf16.vlgmr.msra.gmra.mrb[32].mxu0 %vm1852_vm2, %v2900_v60  ;;  %4811 = vmatprep.subr.bf16.mxu1 %v5621_v0  ;;  %v2906_v2 = vpack.i.b16 %v2905_v39, %v2904_v44 }
 0xa16   : > { %4806 = vmatpush3.bf16.xpose.msra.mxu0 %v3499_v62  ;;  %4807 = vmatprep.mubr.msk.bf16.mxu0 %vm5622_vm0, %v5621_v0 }
 0xa17   : > { %4817 = vmatprep.subr.bf16.mxu0 %v5621_v0 }
 0xa1b   : > { %4802 = vmatmul.mubr.msk.bf16.vlgmr.msra.gmra.mrb[32].mxu1 %vm1852_vm2, %v2903_v40 }
 0xa1c   : > { %4813 = vmatprep.mubr.msk.bf16.mxu1 %vm5622_vm0, %v5621_v0 }
 0xa1d   : > { %4808 = vmatmul.mubr.msk.bf16.vlgmr.msra.gmra.mrb[36].mxu0 %vm1852_vm2, %v2906_v2 }
 0xa1e   : > { %4819 = vmatprep.mubr.msk.bf16.mxu0 %vm5622_vm0, %v5621_v0 }
 0xae6   : > { %v3397_v16 = vpop.f32.mrb[28].mxu1 }
 0xae7   : > { %v4791_v3 = vpop.f32.mrb[29].mxu1  ;;  %v3542_v5 = vsel %vm3541_vm6, %v3397_v16, -inf }
 0xae8   : > { %v3443_v8 = vpop.f32.mrb[32].mxu0  ;;  %3543 = vmax.xlane.f32.xlu0 %v3542_v5  ;;  %v3400_v9 = vpop.f32.mrb[30].mxu1 }
 0xae9   : > { %v4792_v10 = vpop.f32.mrb[31].mxu1  ;;  %v4797_v11 = vpop.f32.mrb[33].mxu0  ;;  %v3545_v12 = vsel %vm3541_vm6, %v3443_v8, -inf }
 0xaea   : > { %3546 = vmax.xlane.f32.xlu1 %v3545_v12  ;;  %v3446_v13 = vpop.f32.mrb[34].mxu0 }
 0xaeb   : > { %v4798_v14 = vpop.f32.mrb[35].mxu0 }
 0xaee   : > { %v6421_v17 = vpop.f32.mrb[32].mxu1 }
 0xaef   : > { %v4803_v18 = vpop.f32.mrb[33].mxu1  ;;  %v3548_v27 = vsel %vm3541_vm6, %v6421_v17, -inf }
 0xaf0   : > { %v3492_v19 = vpop.f32.mrb[34].mxu1  ;;  %v6423_v20 = vpop.f32.mrb[36].mxu0 }
 0xaf1   : > { %v4804_v21 = vpop.f32.mrb[35].mxu1  ;;  %v4809_v22 = vpop.f32.mrb[37].mxu0  ;;  %v3551_v25 = vsel %vm3541_vm6, %v6423_v20, -inf }
 0xaf2   : > { %v3538_v23 = vpop.f32.mrb[38].mxu0 }
 0xaf3   : > { %v4810_v24 = vpop.f32.mrb[39].mxu0 }
 0xafb   : > { %3137 = vrot.lane.b32.xlu1 %v6375_v63, %s5625_s13  ;;  %s6698_s13 = smov 24  }
 0xafe   : > { %3140 = vrot.lane.b32.xlu0 %v6375_v63, %s5623_s26  ;;  %s6696_s26 = sld [smem:[#allocation48_spill]] }
 0xb1d   : > { %3552 = vmax.xlane.f32.xlu0 %v3551_v25 }
 0xb1f   : > { %3549 = vmax.xlane.f32.xlu1 %v3548_v27 }
 0xb75   : > { %v3544_v4 = vpop.xlane.xlu0 %3543 }
 0xb76   : > { %v3554_v29 = vsub.f32 %v3397_v16, %v3544_v4 }
 0xb77   : > { %v3547_v30 = vpop.xlane.xlu1 %3546 }
 0xb78   : > { %v3558_v7 = vmul.f32 1.442695, %v3554_v29  ;;  %v3555_v32 = vsub.f32 %v3443_v8, %v3547_v30 }
 0xb79   : > { %v3141_v34 = vpop.permute.xlu0 %3140 }
 0xb7a   : > { %5108 = vpow2.f32 %v3558_v7  ;;  %v3560_v36 = vmul.f32 1.442695, %v3555_v32  ;;  %v3200_v37 = vrot.slane %v3141_v34, %v6127_v31  ;;  %v4583_v38 = vcombine.high %v3135_v28, %v3141_v34 }
 0xb7b   : > { %v3138_v41 = vpop.permute.xlu1 %3137 }
 0xb7c   : > { %5110 = vpow2.f32 %v3560_v36  ;;  %v3202_v42 = vcombine.low %v3192_v33, %v3200_v37  ;;  %v3203_v43 = vcombine.high %v3192_v33, %v3200_v37  ;;  %v3225_v46 = vrot.slane %v4583_v38, %v6130_v35 }
 0xb7d   : > { %v3157_v48 = vrot.slane %v3138_v41, %v6127_v31  ;;  %v4582_v15 = vcombine.high %v6375_v63, %v3138_v41 }
 0xb7e   : > { %v3210_v6 = vrot.slane %v3202_v42, %v6130_v35  ;;  %v3217_v49 = vrot.slane %v3203_v43, %v6130_v35  ;;  %v3228_v50 = vcombine.high %v3225_v46, %v5628_v45  ;;  %v3265_v56 = vshrl.u32 %v3225_v46, 16 }
 0xb7f   : > { %v3159_v51 = vcombine.low %v3149_v47, %v3157_v48  ;;  %v3160_v52 = vcombine.high %v3149_v47, %v3157_v48  ;;  %v3182_v53 = vrot.slane %v4582_v15, %v6130_v35 }
 0xb80   : > { %v3226_v54 = vcombine.high %v3210_v6, %v5628_v45  ;;  %v3227_v55 = vcombine.high %v3217_v49, %v5628_v45  ;;  %v3234_v57 = vshrl.u32 %v3210_v6, 16  ;;  %v3250_v61 = vshrl.u32 %v3217_v49, 16 }
 0xb81   : > { %v3167_v58 = vrot.slane %v3159_v51, %v6130_v35  ;;  %v3174_v63 = vrot.slane %v3160_v52, %v6130_v35  ;;  %v3185_v59 = vcombine.high %v3182_v53, %v5628_v45  ;;  %v3271_v1 = vshrl.u32 %v3228_v50, 16 }
 0xb82   : > { %v3242_v60 = vshrl.u32 %v3226_v54, 16  ;;  %v3258_v62 = vshrl.u32 %v3227_v55, 16  ;;  %v3264_v8 = vshrl.u32 %v3182_v53, 16  ;;  %v3263_v24 = vpack.i.b16 %v3225_v46, %v3182_v53 }
 0xb83   : > { %v3183_v39 = vcombine.high %v3167_v58, %v5628_v45  ;;  %v3184_v40 = vcombine.high %v3174_v63, %v5628_v45  ;;  %v3231_v44 = vpack.i.b16 %v3210_v6, %v3167_v58  ;;  %v3233_v2 = vshrl.u32 %v3167_v58, 16 }
 0xb84   : > { %v5109_v16 = vpop.eup %5108  ;;  %v3247_v3 = vpack.i.b16 %v3217_v49, %v3174_v63  ;;  %v3249_v5 = vshrl.u32 %v3174_v63, 16  ;;  %v3269_v9 = vpack.i.b16 %v3228_v50, %v3185_v59  ;;  %v3270_v21 = vshrl.u32 %v3185_v59, 16 }
 0xb85   : > { %v3235_v10 = vpack.i.b16 %v3234_v57, %v3233_v2  ;;  %v3239_v11 = vpack.i.b16 %v3226_v54, %v3183_v39  ;;  %v3241_v12 = vshrl.u32 %v3183_v39, 16  ;;  %v3255_v13 = vpack.i.b16 %v3227_v55, %v3184_v40 }
 0xb86   : > { %v5111_v14 = vpop.eup %5110  ;;  %v3251_v18 = vpack.i.b16 %v3250_v61, %v3249_v5  ;;  %v3257_v19 = vshrl.u32 %v3184_v40, 16  ;;  %v3273_v22 = vcombine.low %v3231_v44, %v3247_v3  ;;  %v3566_v45 = vsel %vm3541_vm6, %v5109_v16, 0.0 }
 0xb87   : > { %v3243_v23 = vpack.i.b16 %v3242_v60, %v3241_v12  ;;  %v3281_v25 = vcombine.low %v3239_v11, %v3255_v13  ;;  %v3272_v28 = vpack.i.b16 %v3271_v1, %v3270_v21  ;;  %3567 = vadd.xlane.f32.xlu0 %v3566_v45  ;;  %v3569_v29 = vsel %vm3541_vm6, %v5111_v14, 0.0 }
 0xb88   : > { %v3259_v27 = vpack.i.b16 %v3258_v62, %v3257_v19  ;;  %v3309_v4 = vcombine.low %v3235_v10, %v3251_v18  ;;  %3570 = vadd.xlane.f32.xlu1 %v3569_v29  ;;  %v3280_v30 = vrot.slane %v3273_v22, %v6127_v31  ;;  %v3266_v32 = vpack.i.b16 %v3265_v56, %v3264_v8 }
 0xb89   : > { %v3288_v7 = vrot.slane %v3281_v25, %v6127_v31  ;;  %v3299_v33 = vcombine.low %v3263_v24, %v3269_v9  ;;  %v3578_v59 = vpack.c.bf16 %v5109_v16, %v5109_v16  ;;  %v3579_v62 = vpack.c.bf16 %v5111_v14, %v5111_v14 }
 0xb8a   : > { %v3317_v34 = vcombine.low %v3243_v23, %v3259_v27  ;;  %v3316_v37 = vrot.slane %v3309_v4, %v6127_v31  ;;  %v3335_v41 = vcombine.low %v3266_v32, %v3272_v28 }
 0xb8b   : > { %v3291_v36 = vcombine.low %v3280_v30, %v3288_v7  ;;  %v3306_v43 = vrot.slane %v3299_v33, %v6130_v35 }
 0xb8c   : > { %v3324_v38 = vrot.slane %v3317_v34, %v6127_v31  ;;  %v3342_v15 = vrot.slane %v3335_v41, %v6130_v35 }
 0xb8d   : > { %v3298_v42 = vrot.slane %v3291_v36, %v6130_v35 }
 0xb8e   : > { %v3327_v46 = vcombine.low %v3316_v37, %v3324_v38 }
 0xb8f   : > { %v3307_v47 = vcombine.low %v3298_v42, %v3306_v43  ;;  %v3308_v49 = vcombine.high %v3298_v42, %v3306_v43 }
 0xb90   : > { %v3334_v48 = vrot.slane %v3327_v46, %v6130_v35 }
 0xb91   : > { %v3348_v52 = vshrl.u32 %v3307_v47, 16  ;;  %v3354_v58 = vshrl.u32 %v3308_v49, 16 }
 0xb92   : > { %v3343_v6 = vcombine.low %v3334_v48, %v3342_v15  ;;  %v3344_v50 = vcombine.high %v3334_v48, %v3342_v15 }
 0xb94   : > { %v3347_v51 = vpack.i.b16 %v3343_v6, %v3307_v47  ;;  %v3349_v53 = vshrl.u32 %v3343_v6, 16  ;;  %v3355_v54 = vshrl.u32 %v3344_v50, 16  ;;  %v3353_v57 = vpack.i.b16 %v3344_v50, %v3308_v49 }
 0xb96   : > { %v3587_v55 = vsel %vm3585_vm7, %v3347_v51, 0  ;;  %v3350_v56 = vpack.i.b16 %v3349_v53, %v3348_v52  ;;  %v3356_v60 = vpack.i.b16 %v3355_v54, %v3354_v58  ;;  %v3679_v61 = vsel %vm3585_vm7, %v3353_v57, 0  ;;  %v5082_v57 = vld [vmem:[%s6696_s26] sm:$0xff]  }
 0xb97   : > { %4812 = vmatpush3.bf16.msra.mxu1 %v3587_v55 }
 0xb98   : > { %v3633_v63 = vsel %vm3585_vm7, %v3350_v56, 0  ;;  %4823 = vmatprep.subr.bf16.mxu1 %v5621_v0  ;;  %v3725_v1 = vsel %vm3585_vm7, %v3356_v60, 0 }
 0xb99   : > { %4818 = vmatpush3.bf16.msra.mxu0 %v3633_v63 }
 0xb9a   : > { %4814 = vmatmul.mubr.msk.bf16.vlgmr.msra.gmra.mrb[36].mxu1 %vm3541_vm6, %v3578_v59  ;;  %4829 = vmatprep.subr.bf16.mxu0 %v5621_v0 }
 0xb9b   : > { %4824 = vmatpush3.bf16.msra.mxu1 %v3679_v61  ;;  %4825 = vmatprep.mubr.msk.bf16.mxu1 %vm5622_vm0, %v5621_v0 }
 0xb9c   : > { %4820 = vmatmul.mubr.msk.bf16.vlgmr.msra.gmra.mrb[40].mxu0 %vm3541_vm6, %v3579_v62  ;;  %4835 = vmatprep.subr.bf16.mxu1 %v5621_v0 }
 0xb9d   : > { %4830 = vmatpush3.bf16.msra.mxu0 %v3725_v1  ;;  %4831 = vmatprep.mubr.msk.bf16.mxu0 %vm5622_vm0, %v5621_v0 }
 0xb9e   : > { %4843 = vmatprep.subr.bf16.mxu0 %v5621_v0 }
 0xbaa   : > { %v3553_v39 = vpop.xlane.xlu0 %3552 }
 0xbab   : > { %v3557_v40 = vsub.f32 %v6423_v20, %v3553_v39 }
 0xbac   : > { %v3550_v44 = vpop.xlane.xlu1 %3549 }
 0xbad   : > { %v3564_v2 = vmul.f32 1.442695, %v3557_v40  ;;  %v3556_v16 = vsub.f32 %v6421_v17, %v3550_v44 }
 0xbaf   : > { %5112 = vpow2.f32 %v3564_v2  ;;  %v3562_v3 = vmul.f32 1.442695, %v3556_v16 }
 0xbb1   : > { %5114 = vpow2.f32 %v3562_v3  ;;  %v5083_v3 = vld [vmem:[%s6696_s26 + $0x8] sm:$0xff]  }
 0xbb9   : > { %v5113_v5 = vpop.eup %5112 }
 0xbba   : > { %v3575_v8 = vsel %vm3541_vm6, %v5113_v5, 0.0  ;;  %v3581_v9 = vpack.c.bf16 %v5113_v5, %v5113_v5 }
 0xbbb   : > { %v5115_v10 = vpop.eup %5114  ;;  %3576 = vadd.xlane.f32.xlu1 %v3575_v8 }
 0xbbc   : > { %4832 = vmatmul.mubr.msk.bf16.vlgmr.msra.gmra.mrb[44].mxu0 %vm3541_vm6, %v3581_v9  ;;  %v3572_v11 = vsel %vm3541_vm6, %v5115_v10, 0.0  ;;  %v3580_v12 = vpack.c.bf16 %v5115_v10, %v5115_v10 }
 0xbbd   : > { %3573 = vadd.xlane.f32.xlu0 %v3572_v11  ;;  %4847 = vmatprep.mubr.msk.bf16.mxu0 %vm5622_vm0, %v5621_v0 }
 0xbbe   : > { %4826 = vmatmul.mubr.msk.bf16.vlgmr.msra.gmra.mrb[40].mxu1 %vm3541_vm6, %v3580_v12 }
 0xbbf   : > { %4839 = vmatprep.mubr.msk.bf16.mxu1 %vm5622_vm0, %v5621_v0  ;;  %4836 = vmatpush3.bf16.msra.mxu1 %v5082_v57 }
 0xbc0   : > { %4837 = vmatprep.subr.bf16.mxu1 %v5621_v0 }
 0xbc3   : > { %4838 = vmatpush3.bf16.msra.mxu1 %v5083_v3 }
 0xbc4   : > { %4851 = vmatprep.subr.bf16.mxu1 %v5621_v0 }
 0xc14   : > { %v3568_v24 = vpop.xlane.xlu0 %3567 }
 0xc15   : > { %v3571_v23 = vpop.xlane.xlu1 %3570 }
 0xc16   : > { %5116 = vrcp.f32 %v3571_v23 }
 0xc20   : > { %v5117_v27 = vpop.eup %5116 }
 0xc48   : > { %v3577_v25 = vpop.xlane.xlu1 %3576 }
 0xc49   : > { %5118 = vrcp.f32 %v3577_v25 }
 0xc4a   : > { %v3574_v45 = vpop.xlane.xlu0 %3573  ;;  %5120 = vrcp.f32 %v3568_v24 }
 0xc4b   : > { %5122 = vrcp.f32 %v3574_v45  ;;  %v4594_v45 = vld [vmem:[%s6697_s21] ss:$0 sm:$0xff]  ;;  %s6704_s21 = sld [smem:[#allocation55_spill]] }
 0xc53   : > { %v5119_v28 = vpop.eup %5118 }
 0xc54   : > { %v5121_v29 = vpop.eup %5120 }
 0xc55   : > { %v5123_v33 = vpop.eup %5122 }
 0xc6d   : > { %v3623_v17 = vpop.f32.mrb[36].mxu1 }
 0xc6e   : > { %v4815_v20 = vpop.f32.mrb[37].mxu1  ;;  %v3771_v37 = vmul.f32 %v5121_v29, %v3623_v17 }
 0xc6f   : > { %v3626_v13 = vpop.f32.mrb[38].mxu1  ;;  %v3669_v14 = vpop.f32.mrb[40].mxu0 }
 0xc70   : > { %v4816_v18 = vpop.f32.mrb[39].mxu1  ;;  %v4821_v19 = vpop.f32.mrb[41].mxu0  ;;  %v3772_v30 = vmul.f32 %v5117_v27, %v3669_v14 }
 0xc71   : > { %v3672_v21 = vpop.f32.mrb[42].mxu0 }
 0xc72   : > { %v4822_v22 = vpop.f32.mrb[43].mxu0 }
 0xc8f   : > { %v3761_v4 = vpop.f32.mrb[44].mxu0 }
 0xc90   : > { %v3774_v7 = vmul.f32 %v5119_v28, %v3761_v4  ;;  %v4833_v32 = vpop.f32.mrb[45].mxu0 }
 0xc91   : > { %v3715_v34 = vpop.f32.mrb[40].mxu1  ;;  %v3764_v36 = vpop.f32.mrb[46].mxu0 }
 0xc92   : > { %v3791_v38 = vcombine.low %v3772_v30, %v3774_v7  ;;  %v3792_v41 = vcombine.high %v3772_v30, %v3774_v7  ;;  %v3773_v42 = vmul.f32 %v5123_v33, %v3715_v34  ;;  %v4827_v43 = vpop.f32.mrb[41].mxu1  ;;  %v4834_v46 = vpop.f32.mrb[47].mxu0 }
 0xc93   : > { %v3718_v47 = vpop.f32.mrb[42].mxu1 }
 0xc94   : > { %v3775_v48 = vcombine.low %v3771_v37, %v3773_v42  ;;  %v3776_v15 = vcombine.high %v3771_v37, %v3773_v42  ;;  %v4828_v6 = vpop.f32.mrb[43].mxu1  ;;  %v3799_v49 = vrot.slane %v3791_v38, %v6127_v31  ;;  %v3806_v50 = vrot.slane %v3792_v41, %v6127_v31 }
 0xc95   : > { %v4598_v6 = vld [vmem:[%s6701_s19] ss:$0 sm:$0xff]  ;;  %s4243_s19 = sshll.u32 %s6263_s27, 4  ;;  %s4244_s19 = int_to_ptr.vmem [resolvable:$true] %s4243_s19 }
 0xc96   : > { %v3783_v51 = vrot.slane %v3775_v48, %v6127_v31  ;;  %v3790_v52 = vrot.slane %v3776_v15, %v6127_v31 }
 0xc98   : > { %v3807_v53 = vcombine.low %v3783_v51, %v3799_v49  ;;  %v3808_v54 = vcombine.high %v3783_v51, %v3799_v49  ;;  %v3823_v55 = vcombine.low %v3790_v52, %v3806_v50  ;;  %v3824_v56 = vcombine.high %v3790_v52, %v3806_v50  ;;  %v4599_v50 = vld [vmem:[%s6702_s28] ss:$0 sm:$0xff] }
 0xc9a   : > { %v3815_v58 = vrot.slane %v3807_v53, %v6130_v35  ;;  %v3822_v63 = vrot.slane %v3808_v54, %v6130_v35  ;;  %v3831_v59 = vrot.slane %v3823_v55, %v6130_v35  ;;  %v3838_v60 = vrot.slane %v3824_v56, %v6130_v35  ;;  %v4600_v56 = vld [vmem:[%s6703_s8] ss:$0 sm:$0xff]  ;;  %s4215_s8 = scalar_lea.sflag [#allocation22], %s6052_s30 }
 0xc9c   : > { %v3843_v61 = vcombine.low %v3815_v58, %v3822_v63  ;;  %v4592_v62 = vcombine.high %v3815_v58, %v3822_v63  ;;  %v3859_v1 = vcombine.low %v3831_v59, %v3838_v60  ;;  %v4593_v39 = vcombine.high %v3831_v59, %v3838_v60 }
 0xc9e   : > { %v3850_v40 = vrot.slane %v3843_v61, %v6127_v31  ;;  %v3858_v44 = vrot.slane %v4592_v62, %v6127_v31  ;;  %v3866_v2 = vrot.slane %v3859_v1, %v6127_v31  ;;  %v3874_v16 = vrot.slane %v4593_v39, %v6127_v31  ;;  %v4604_v1 = vld [vmem:[%s6704_s21] ss:$0 sm:$0xff]  ;;  %s5440_s21 = scalar_lea.vmem %s4244_s19, 128 }
 0xc9f   : > { %p5441_p10 = scmp.ne.s32.totalorder %s4244_s19, %s5440_s21 }
 0xca0   : > { %v3876_v5 = vcombine.high %v3850_v40, %v3858_v44  ;;  %v3892_v8 = vcombine.high %v3866_v2, %v3874_v16  ;;  %v3875_v9 = vcombine.low %v3850_v40, %v3858_v44  ;;  %v3891_v10 = vcombine.low %v3866_v2, %v3874_v16 }
 0xca1   : > { %p5442_p7 = pnand %p5441_p10, %p6705_p2 }
 0xca2   : > { %v3890_v11 = vrot.slane %v3876_v5, %v6130_v35  ;;  %v3906_v12 = vrot.slane %v3892_v8, %v6130_v35  ;;  %v3883_v17 = vrot.slane %v3875_v9, %v6130_v35  ;;  %v3899_v20 = vrot.slane %v3891_v10, %v6130_v35 }
 0xca3   : > { %p5443_p5 = pneg %p5442_p7 }
 0xca4   : > { %v3909_v13 = vcombine.low %v3890_v11, %v3906_v12  ;;  %v3908_v14 = vcombine.high %v3883_v17, %v3899_v20  ;;  %v3910_v31 = vcombine.high %v3890_v11, %v3906_v12  ;;  %v3907_v18 = vcombine.low %v3883_v17, %v3899_v20 }
 0xca6   : > { %3916 = vrot.lane.b32.xlu1 %v3909_v13, %s5629_s4  ;;  %3912 = vrot.lane.b32.xlu0 %v3908_v14, %s5630_s10  ;;  %s6699_s4 = sld [smem:[#allocation52_spill]]  ;;  %s6700_s10 = sld [smem:[#allocation54_spill]] }
 0xcaa   : > { %3920 = vrot.lane.b32.xlu1 %v3910_v31, %s6698_s13  ;;  %s4615_s13 = sshll.u32 %s5570_s0, 7 }
 0xcab   : > { %s6538_s28 = scalar_lea.hbm %s5792_s14, %s4615_s13 }
 0xcac   : > { %v5084_v41 = vld [vmem:[%s6699_s4] sm:$0xff]   ;;  %v5085_v42 = vld [vmem:[%s6699_s4 + $0x8] sm:$0xff]   ;;  %v5088_v54 = vld [vmem:[%s6700_s10 + $0x10] sm:$0xff]   ;;  %s5444_s4 = sshll.u32 %s5632_s3, 4  ;;  %s5445_s4 = int_to_ptr.vmem [resolvable:$false] %s5444_s4 }
 0xcad   : > { %4844 = vmatpush3.bf16.msra.mxu0 %v5084_v41  ;;  %v5087_v43 = vld [vmem:[%s6700_s10 + $0x8] sm:$0xff]   ;;  %v5089_v55 = vld [vmem:[%s6700_s10 + $0x18] sm:$0xff]   ;;  %s5446_s5 = scalar_lea.vmem %s5445_s4, 256  ;;  %p5447_p3 = scmp.lt.s32.totalorder %s4244_s19, %s5445_s4 }
 0xcae   : > { %4845 = vmatprep.subr.bf16.mxu0 %v5621_v0  ;;  %p5448_p4 = scmp.lt.s32.totalorder %s5446_s5, %s5440_s21 }
 0xcb0   : > { %p5449_p0 = por %p5448_p4, %p5447_p3 }
 0xcb1   : > { %4846 = vmatpush3.bf16.msra.mxu0 %v5085_v42 }
 0xcb2   : > { %p5450_p8 = pnand %p5449_p0, %p5443_p5 }
 0xd18   : > { %v3917_v19 = vpop.permute.xlu1 %3916  ;;  %v3913_v21 = vpop.permute.xlu0 %3912 }
 0xd19   : > { %v3923_v22 = vsel %vm1852_vm2, %v3907_v18, %v3913_v21 }
 0xd1a   : > { %v3924_v24 = vsel %vm2431_vm4, %v3923_v22, %v3917_v19 }
 0xd1c   : > { %v3921_v23 = vpop.permute.xlu1 %3920 }
 0xd1d   : > { %v3925_v35 = vsel %vm2433_vm5, %v3924_v24, %v3921_v23 }
 0xd1e   : > { %v3926_v25 = vpack.c.bf16 %v3925_v35, %v3925_v35 }
 0xd20   : > { %4840 = vmatmul.mubr.msk.bf16.vlgmr.msra.gmra.mrb[44].mxu1 %vm1172_vm1, %v3926_v25 }
 0xd21   : > { %4859 = vmatprep.mubr.msk.bf16.mxu1 %vm5622_vm0, %v5621_v0 }
 0xdf3   : > { %v3987_v27 = vpop.f32.mrb[44].mxu1 }
 0xdf4   : > { %v3988_v28 = vadd.f32 %v4594_v45, %v3987_v27  ;;  %v4841_v4 = vpop.f32.mrb[45].mxu1 }
 0xdf5   : > { %v3990_v29 = vpop.f32.mrb[46].mxu1 }
 0xdf6   : > { %v4842_v30 = vpop.f32.mrb[47].mxu1  ;;  %v3993_v7 = vadd.f32 %v3988_v28, %v6319_v26  ;;  %v5086_v26 = vld [vmem:[%s6700_s10] sm:$0xff]  }
 0xdf7   : > { %4852 = vmatpush3.bf16.msra.mxu1 %v5086_v26 }
 0xdf8   : > { %v3996_v32 = vsel %vm1172_vm1, %v3993_v7, 0.0  ;;  %4853 = vmatprep.subr.bf16.mxu1 %v5621_v0 }
 0xdf9   : > { %3997 = vadd.xlane.f32.xlu0 %v3996_v32 }
 0xdfb   : > { %4854 = vmatpush3.bf16.msra.mxu1 %v5087_v43 }
 0xdfc   : > { %4855 = vmatprep.subr.bf16.mxu1 %v5621_v0 }
 0xdff   : > { %4856 = vmatpush3.bf16.msra.mxu1 %v5088_v54 }
 0xe00   : > { %4857 = vmatprep.subr.bf16.mxu1 %v5621_v0 }
 0xe03   : > { %4858 = vmatpush3.bf16.msra.mxu1 %v5089_v55 }
 0xe86   : > { %v3998_v33 = vpop.xlane.xlu0 %3997 }
 0xe87   : > { %v3999_v34 = vmul.f32 0.03125, %v3998_v33 }
 0xe89   : > { %v4000_v36 = vsub.f32 %v3993_v7, %v3999_v34 }
 0xe8b   : > { %v4001_v37 = vmul.f32 %v4000_v36, %v4000_v36 }
 0xe8d   : > { %v4002_v38 = vsel %vm1172_vm1, %v4001_v37, 0.0 }
 0xe8e   : > { %4003 = vadd.xlane.f32.xlu1 %v4002_v38 }
 0xf1b   : > { %v4004_v46 = vpop.xlane.xlu1 %4003 }
 0xf1c   : > { %v4005_v47 = vmul.f32 0.03125, %v4004_v46 }
 0xf1e   : > { %v4006_v48 = vadd.f32 1e-05, %v4005_v47 }
 0xf20   : > { %5124 = vrsqrt.f32 %v4006_v48 }
 0xf2a   : > { %v5125_v15 = vpop.eup %5124 }
 0xf2b   : > { %v4008_v49 = vmul.f32 %v5125_v15, %v4000_v36 }
 0xf2d   : > { %v4015_v51 = vmul.f32 %v4598_v6, %v4008_v49 }
 0xf2f   : > { %v4022_v52 = vadd.f32 %v4599_v50, %v4015_v51 }
 0xf31   : > { %v4023_v53 = vpack.c.bf16 %v4022_v52, %v4022_v52 }
 0xf33   : > { %4848 = vmatmul.mubr.msk.bf16.vlgmr.msra.gmra.mrb[48].mxu0 %vm1172_vm1, %v4023_v53 }
0x1006   : > { %v4084_v57 = vpop.f32.mrb[48].mxu0 }
0x1007   : > { %v4085_v58 = vadd.f32 %v4600_v56, %v4084_v57  ;;  %v4849_v63 = vpop.f32.mrb[49].mxu0 }
0x1008   : > { %v4087_v59 = vpop.f32.mrb[50].mxu0 }
0x1009   : > { %v4090_v60 = vmax.f32 %v4085_v58, 0.0  ;;  %v4850_v61 = vpop.f32.mrb[51].mxu0 }
0x100b   : > { %v4091_v62 = vpack.c.bf16 %v4090_v60, %v4090_v60 }
0x100d   : > { %4860 = vmatmul.mubr.msk.bf16.vlgmr.msra.gmra.mrb[48].mxu1 %vm4131_vm8, %v4091_v62 }
0x10e0   : > { %v4169_v39 = vpop.f32.mrb[48].mxu1 }
0x10e1   : > { %v4170_v40 = vadd.f32 %v4604_v1, %v4169_v39  ;;  %v4861_v44 = vpop.f32.mrb[49].mxu1 }
0x10e2   : > { %v4172_v0 = vpop.f32.mrb[50].mxu1 }
0x10e3   : > { %v4862_v2 = vpop.f32.mrb[51].mxu1  ;;  %v4175_v16 = vadd.f32 %v4170_v40, %v4022_v52 }
0x10e5   : > { %v4178_v3 = vsel %vm1172_vm1, %v4175_v16, 0.0 }
0x10e6   : > { %4179 = vadd.xlane.f32.xlu0 %v4178_v3 }
0x1173   : > { %v4180_v5 = vpop.xlane.xlu0 %4179 }
0x1174   : > { %v4181_v8 = vmul.f32 0.03125, %v4180_v5 }
0x1176   : > { %v4182_v9 = vsub.f32 %v4175_v16, %v4181_v8 }
0x1178   : > { %v4183_v10 = vmul.f32 %v4182_v9, %v4182_v9 }
0x117a   : > { %v4184_v11 = vsel %vm1172_vm1, %v4183_v10, 0.0 }
0x117b   : > { %4185 = vadd.xlane.f32.xlu0 %v4184_v11 }
0x117c   : > { %5453 = shalt.err (!%p5450_p8)
}
0x117d   : > { %s5454_s27 = scalar_lea.hbm %s6538_s28, 128  ;;  %s5458_s3 = scalar_lea.hbm %s5792_s14, 256 }
0x117e   : > { %p5455_p9 = scmp.ne.s32.totalorder %s6538_s28, %s5454_s27  ;;  %p5459_p12 = scmp.lt.u32.totalorder %s6538_s28, %s5792_s14 }
0x117f   : > { %p5460_p13 = scmp.lt.u32.totalorder %s5458_s3, %s5454_s27  ;;  %p5462_p10 = scmp.lt.u32.totalorder %s5454_s27, %s6538_s28 }
0x1180   : > { %p5456_p6 = pnand %p5455_p9, %p6705_p2 }
0x1181   : > { %p5461_p1 = por %p5460_p13, %p5459_p12 }
0x1182   : > { %p5457_p11 = pneg %p5456_p6 }
0x1183   : > { %p5463_p7 = por %p5462_p10, %p5461_p1 }
0x1185   : > { %p5464_p5 = pnand %p5463_p7, %p5457_p11 }
0x1187   : > { %5467 = shalt.err (!%p5464_p5)
}
0x1188   : > { %s6706_s5 = sld [smem:[#allocation56_spill]]  ;;  %s6707_s4 = sld [smem:[#allocation57_spill]]  ;;  %vm4206_vm9 = vcmask 257024  }
0x1189   : > { %4904 = dma.vmem_to_hbm [thread:$0]  (%p6705_p2), %s4244_s19, 128, %s6538_s28, %s4215_s8  }
0x118a   : > { %s6708_s13 = sld [smem:[#allocation58_spill]]  ;;  %s4614_s21 = sshll.u32 %s5570_s0, 6 }
0x118b   : > { %s1132_s27 = scalar_lea.vmem [#allocation20], %s6055_s24  ;;  %s4210_s19 = scalar_lea.sflag [#allocation4], %s6052_s30 }
0x118c   : > { %s4229_s3 = sshll.u32 %s1132_s27, 4  ;;  %s5633_s0 = smov [#allocation20]   ;;  %s6561_s3 = int_to_ptr.vmem [resolvable:$true] %s4229_s3 }
0x118d   : > { %s5468_s28 = scalar_lea.vmem %s6561_s3, 64  ;;  %s5472_s24 = sshll.u32 %s5633_s0, 4  ;;  %s5473_s24 = int_to_ptr.vmem [resolvable:$false] %s5472_s24 }
0x118e   : > { %v4610_v14 = vld [vmem:[%s6706_s5] ss:$0 sm:$0xff]  ;;  %p5469_p3 = scmp.ne.s32.totalorder %s6561_s3, %s5468_s28  ;;  %s5474_s8 = scalar_lea.vmem %s5473_s24, 128 }
0x118f   : > { %v4611_v18 = vld [vmem:[%s6707_s4] ss:$0 sm:$0xff]  ;;  %p5475_p8 = scmp.lt.s32.totalorder %s6561_s3, %s5473_s24  ;;  %p5476_p9 = scmp.lt.s32.totalorder %s5474_s8, %s5468_s28 }
0x1190   : > { %s6559_s6 = scalar_lea.hbm %s6708_s13, %s4614_s21  ;;  %p5470_p4 = pnand %p5469_p3, %p6705_p2 }
0x1191   : > { %p5477_p6 = por %p5476_p9, %p5475_p8 }
0x1192   : > { %p5471_p0 = pneg %p5470_p4 }
0x1194   : > { %p5478_p11 = pnand %p5477_p6, %p5471_p0 }
0x1208   : > { %v4186_v12 = vpop.xlane.xlu0 %4185 }
0x1209   : > { %v4187_v17 = vmul.f32 0.03125, %v4186_v12 }
0x120b   : > { %v4188_v20 = vadd.f32 1e-05, %v4187_v17 }
0x120d   : > { %5126 = vrsqrt.f32 %v4188_v20 }
0x1217   : > { %v5127_v13 = vpop.eup %5126 }
0x1218   : > { %v4190_v31 = vmul.f32 %v5127_v13, %v4182_v9 }
0x121a   : > { %v4197_v19 = vmul.f32 %v4610_v14, %v4190_v31 }
0x121c   : > { %v4204_v21 = vadd.f32 %v4611_v18, %v4197_v19 }
0x121e   : > { %v4205_v22 = vpack.c.bf16 %v4204_v21, %v4204_v21 }
0x1220   : > { %4207 = vst.msk [vmem:[%s1132_s27] sm:$0xf] %vm4206_vm9, %v4205_v22 }
0x1221   : > { %5481 = shalt.err (!%p5478_p11)
}
0x1222   : > { %s5482_s30 = scalar_lea.hbm %s6559_s6, 64  ;;  %s5486_s5 = scalar_lea.hbm %s6708_s13, 128 }
0x1223   : > { %p5483_p12 = scmp.ne.s32.totalorder %s6559_s6, %s5482_s30  ;;  %p5487_p10 = scmp.lt.u32.totalorder %s6559_s6, %s6708_s13 }
0x1224   : > { %p5488_p7 = scmp.lt.u32.totalorder %s5486_s5, %s5482_s30  ;;  %p5490_p3 = scmp.lt.u32.totalorder %s5482_s30, %s6559_s6 }
0x1225   : > { %p5484_p13 = pnand %p5483_p12, %p6705_p2 }
0x1226   : > { %p5489_p5 = por %p5488_p7, %p5487_p10 }
0x1227   : > { %p5485_p1 = pneg %p5484_p13 }
0x1228   : > { %p5491_p4 = por %p5490_p3, %p5489_p5 }
0x122a   : > { %p5492_p0 = pnand %p5491_p4, %p5485_p1 }
0x122c   : > { %5495 = shalt.err (!%p5492_p0)
}
0x122d   : > { %4903 = dma.vmem_to_hbm [thread:$0]  (%p6705_p2), %s6561_s3, 64, %s6559_s6, %s4210_s19  }
0x122e PF: > { %s4255_s4 = sand.u32 1, %s5558_s15   ;;  %p6709_p8 = scmp.ne.s32.totalorder %s6676_s2, 0 }
0x122f   : > { %p6710_p9 = scmp.ge.s32.totalorder %s5578_s23, 2  ;;  %s4256_s21 = scalar_lea.sflag [#allocation4], %s4255_s4 }
0x1231   : > { %p4943_p6 = pnand %p6710_p9, %p6709_p8 }
0x1233   : > { %5549 = dma.done.wait (!%p4943_p6), %s4256_s21, 64  }
0x1234   : > { %5551 = vsyncadd (!%p4943_p6), %s4256_s21, 4294967232  ;;  %s4265_s27 = scalar_lea.sflag [#allocation22], %s4255_s4 }
0x1235   : > { %5553 = dma.done.wait (!%p4943_p6), %s4265_s27, 128  }
0x1236   : > { %5555 = vsyncadd (!%p4943_p6), %s4265_s27, 4294967168  ;;  %s88_s23 = sadd.s32 1, %s5578_s23   ;;  %s6711_s15 = smov %s5562_s16 }
0x1237   : > { %p85_p11 = scmp.ge.s32.totalorder %s88_s23, 4   ;;  %s6712_s16 = smov %s5566_s18 }
0x1238   : > { %s6713_s18 = smov %s5984_s1  ;;  %s6714_s0 = smov %s5574_s22 }
0x1239   : > { %s6715_s22 = smov %s6717_s29  ;;  %87 = sbr.rel (!%p85_p11) target bundleno = 74 (0x4a), region = 280 }
0x1240   :  { %4270 = vsyncpa [#allocation3], 1 }
0x1241   :  { %4272 = vsyncpa [#allocation3 + $0x1], 1 }
0x1242   :  { %4273 = vsyncpa [#allocation6], 1 }
0x1243   :  { %4275 = vsyncpa [#allocation6 + $0x1], 1 }
0x1244   :  { %4276 = vsyncpa [#allocation9], 1 }
0x1245   :  { %4277 = vsyncpa [#allocation12], 1 }
0x1246   :  { %4278 = vsyncpa [#allocation15], 1 }
0x1247   :  { %4279 = vsyncpa [#allocation18], 1 }
0x1248   :  { %4280 = vsyncpa [#allocation4], 1 }
0x1249   :  { %4282 = vsyncpa [#allocation4 + $0x1], 1 }
0x124a   :  { %4283 = vsyncpa [#allocation22], 1 }
0x124b   :  { %4285 = vsyncpa [#allocation22 + $0x1], 1 }

</bundles_post_ra>
